<compile_context>
chip_gen: v6e
topology: v6e:2x2x1
jax: 0.10.0
libtpu: 0.0.40
codegen_flags: <defaults>
</compile_context>

<pallas_src>
import functools
import math

import jax
import jax.numpy as jnp
import numpy as np
from jax import lax
from jax.experimental import pallas as pl
from jax.experimental.pallas import tpu as pltpu

LN_EPS = 1e-5


# ---------------------------------------------------------------------------
# Shared math
# ---------------------------------------------------------------------------
def _layer_norm(x, w, b, eps=LN_EPS):
    # Fused statistics: mean and E[x^2] in one pass (var = E[x^2] - mu^2),
    # halving the cross-lane XLU reductions vs mean-then-centered-variance.
    mu = jnp.mean(x, axis=-1, keepdims=True)
    msq = jnp.mean(x * x, axis=-1, keepdims=True)
    var = jnp.maximum(msq - mu * mu, 0.0)
    return (x - mu) * lax.rsqrt(var + eps) * w + b


# ---------------------------------------------------------------------------
# Kernel
# ---------------------------------------------------------------------------
def transformer_classifier_kernel(
    x_ref, pe_ref, w_emb_ref, b_emb_ref,
    in_w_ref, in_b_ref, out_w_ref, out_b_ref,
    ln1_w_ref, ln1_b_ref, lin1_w_ref, lin1_b_ref,
    lin2_w_ref, lin2_b_ref, ln2_w_ref, ln2_b_ref,
    cls_w_ref, cls_b_ref, o_ref, h_ref,
    *, nhead,
):
    l = pl.program_id(1)
    num_layers = pl.num_programs(1)

    Bt, S, in_pad = x_ref.shape
    d_model = w_emb_ref.shape[1]
    hd = d_model // nhead
    M = Bt * S
    G = nhead * Bt
    scale = 1.0 / math.sqrt(hd)
    bf16 = jnp.bfloat16

    # ---- embedding + positional encoding (only on the first layer step) ---
    @pl.when(l == 0)
    def _():
        x = x_ref[...].reshape(M, in_pad)                    # already bf16
        h0 = jnp.dot(x, w_emb_ref[...], preferred_element_type=jnp.float32)
        h0 = h0 + b_emb_ref[...]
        h0 = (h0.reshape(Bt, S, d_model) + pe_ref[...][None]).reshape(M, d_model)
        h_ref[...] = h0

    h = h_ref[...]                                           # (M, d_model) f32

    # ---- self attention (post-norm encoder layer) --------------------------
    qkv = jnp.dot(h.astype(bf16), in_w_ref[0],
                  preferred_element_type=jnp.float32) + in_b_ref[0]   # (M, 3d)
    # Head split once on qkv: minor-dim reshape + one major<->sublane relayout.
    qkv_h = pltpu.einshape("mgh->gmh",
                           qkv.astype(bf16).reshape(M, 3 * nhead, hd))
    qkv_h = qkv_h.reshape(3 * nhead, Bt, S, hd)
    q = qkv_h[:nhead].reshape(G, S, hd)                      # bf16
    k = qkv_h[nhead:2 * nhead].reshape(G, S, hd)             # bf16
    v = qkv_h[2 * nhead:].reshape(G, S, hd)                  # bf16

    # TODO(synk): for long sequences, block this over K (flash-style online
    # softmax) to bound the (G, S, S) intermediates; S is tiny here.
    s = jnp.einsum('gqh,gkh->gqk', q, k,
                   preferred_element_type=jnp.float32) * scale
    s = s - jnp.max(s, axis=-1, keepdims=True)
    p = jnp.exp(s)
    p = p * pl.reciprocal(jnp.sum(p, axis=-1, keepdims=True), approx=True)
    ctx = jnp.einsum('gqk,gkh->gqh', p.astype(bf16), v,
                     preferred_element_type=jnp.float32)     # (G, S, hd) f32

    # Merge heads back to (M, d_model) lanes, then ONE dense out-projection.
    ctx = ctx.reshape(nhead, M, hd).astype(bf16)
    ctx = pltpu.einshape("nmh->mnh", ctx).reshape(M, d_model)
    attn = jnp.dot(ctx, out_w_ref[0],
                   preferred_element_type=jnp.float32) + out_b_ref[0]
    # TODO(synk): dropout omitted (eval-mode / deterministic semantics).
    h = _layer_norm(h + attn, ln1_w_ref[0], ln1_b_ref[0])

    # ---- feed-forward ------------------------------------------------------
    ff = jnp.dot(h.astype(bf16), lin1_w_ref[0],
                 preferred_element_type=jnp.float32) + lin1_b_ref[0]
    ff = jnp.maximum(ff, 0.0)
    ff = jnp.dot(ff.astype(bf16), lin2_w_ref[0],
                 preferred_element_type=jnp.float32) + lin2_b_ref[0]
    h = _layer_norm(h + ff, ln2_w_ref[0], ln2_b_ref[0])
    h_ref[...] = h

    # ---- mean pool + classification head (only on the last layer step) ----
    @pl.when(l == num_layers - 1)
    def _():
        pooled = jnp.sum(h.reshape(Bt, S, d_model), axis=1) * (1.0 / S)
        logits = jnp.dot(pooled.astype(bf16), cls_w_ref[...],
                         preferred_element_type=jnp.float32) + cls_b_ref[...]
        o_ref[0] = logits.astype(o_ref.dtype)                # (Bt, NC_PAD)


# ---------------------------------------------------------------------------
# Wrapper helpers
# ---------------------------------------------------------------------------
def _round_up(x, m):
    return (x + m - 1) // m * m


def _tpu_budget():
    """(physical VMEM bytes, TensorCore count) with conservative fallbacks."""
    phys_vmem = 64 << 20                    # v7x per-TC VMEM = smallest of gens
    try:
        info = pltpu.get_tpu_info()
        v = int(getattr(info, "vmem_capacity_bytes", phys_vmem))
        if v >= (16 << 20):
            phys_vmem = v
    except Exception:
        pass
    num_tc = 1
    try:
        kind = jax.devices()[0].device_kind.lower()
        if "v7" in kind or "7x" in kind:
            num_tc = 2                      # 2 TensorCores per chip on v7x
    except Exception:
        pass
    return phys_vmem, num_tc


def _pick_bt(B, S, in_pad, d_model, dim_ff, nhead, act_budget, num_tc):
    """Largest divisor of B whose per-tile activation footprint fits VMEM.

    On multi-TC chips Bt is capped at B // num_tc so the "parallel" batch grid
    has at least num_tc tiles (otherwise one TensorCore idles).
    Falls back to Bt=1 if even a single example exceeds the budget.
    """
    def act_bytes(bt):
        m = bt * S
        g = nhead * bt
        by = 0
        by += 2 * bt * S * in_pad * 2            # x tile (bf16, double-buffered)
        by += m * d_model * 4                    # resident h scratch (f32)
        by += m * 3 * d_model * (4 + 2)          # qkv f32 + bf16 head relayout
        by += 2 * g * S * S * 4 + g * S * S * 2  # scores + probs f32, probs bf16
        by += 2 * m * d_model * (4 + 2)          # ctx / attn temporaries
        by += m * dim_ff * (4 + 2)               # FF intermediate f32 + bf16
        return by

    max_bt = B if num_tc <= 1 else max(1, B // num_tc)
    bt = 1
    for c in range(1, max_bt + 1):
        if B % c == 0 and act_bytes(c) <= act_budget:
            bt = c
    return bt, act_bytes(bt)


# ---------------------------------------------------------------------------
# Wrapper
# ---------------------------------------------------------------------------
def transformer_classifier(x, pe, params, *, nhead):
    B, S, in_dim = x.shape
    d_model = params['w_emb_t'].shape[1]
    num_classes = params['cls_w_t'].shape[1]
    num_layers = params['in_w_t'].shape[0]
    dim_ff = params['lin1_w_t'].shape[2]
    assert d_model % nhead == 0, "d_model must be divisible by nhead"

    in_pad = _round_up(in_dim, 128)
    nc_pad = _round_up(num_classes, 128)
    f32, bf16 = jnp.float32, jnp.bfloat16

    # --- pad to lane-dense shapes; matmul weights in bf16 ------------------
    w_emb = (jnp.zeros((in_pad, d_model), f32)
             .at[:in_dim].set(params['w_emb_t']).astype(bf16))
    cls_w = (jnp.zeros((d_model, nc_pad), f32)
             .at[:, :num_classes].set(params['cls_w_t']).astype(bf16))
    cls_b = (jnp.zeros((1, nc_pad), f32)
             .at[:, :num_classes].set(params['cls_b']))

    # (kind, array) in kernel-argument order after x and pe.
    weights = [
        ('const', w_emb),
        ('const', params['b_emb'].astype(f32)),
        ('layer', params['in_w_t'].astype(bf16)),
        ('layer', params['in_b'].astype(f32)),
        ('layer', params['out_w_t'].astype(bf16)),
        ('layer', params['out_b'].astype(f32)),
        ('layer', params['ln1_w'].astype(f32)),
        ('layer', params['ln1_b'].astype(f32)),
        ('layer', params['lin1_w_t'].astype(bf16)),
        ('layer', params['lin1_b'].astype(f32)),
        ('layer', params['lin2_w_t'].astype(bf16)),
        ('layer', params['lin2_b'].astype(f32)),
        ('layer', params['ln2_w'].astype(f32)),
        ('layer', params['ln2_b'].astype(f32)),
        ('const', cls_w),
        ('const', cls_b),
    ]
    arrays = [a for _, a in weights]

    # Stream x in bf16 (kernel matmuls are bf16 anyway) -> half the DMA bytes.
    x_p = jnp.zeros((B, S, in_pad), bf16).at[:, :, :in_dim].set(x.astype(bf16))

    # --- VMEM model: pick batch tile + explicit scoped-VMEM limit ----------
    phys_vmem, num_tc = _tpu_budget()
    const_bytes = (sum(int(a.size) * a.dtype.itemsize
                       for k, a in weights if k == 'const')
                   + int(pe.size) * pe.dtype.itemsize)
    layer_bytes = sum(int(a.size) * a.dtype.itemsize // num_layers
                      for k, a in weights if k == 'layer')
    weight_vmem = const_bytes + 2 * layer_bytes      # per-layer blocks 2x buffered

    scoped_cap = max(32 << 20, min(int(phys_vmem * 0.8), 112 << 20))
    act_budget = scoped_cap - weight_vmem - (4 << 20)

    Bt, act_bytes = _pick_bt(B, S, in_pad, d_model, dim_ff, nhead,
                             act_budget, num_tc)
    n_tiles = B // Bt
    vmem_limit = int(min(scoped_cap,
                         max(32 << 20, weight_vmem + 2 * act_bytes + (8 << 20))))

    # --- BlockSpecs ---------------------------------------------------------
    def const_spec(a):
        zeros = (0,) * a.ndim
        return pl.BlockSpec(a.shape, lambda b, l, _z=zeros: _z)

    def layer_spec(a):
        blk = (1,) + a.shape[1:]
        tail = (0,) * (a.ndim - 1)
        return pl.BlockSpec(blk, lambda b, l, _t=tail: (l,) + _t)

    in_specs = [pl.BlockSpec((Bt, S, in_pad), lambda b, l: (b, 0, 0)),
                const_spec(pe)]
    for kind, a in weights:
        # Constant-index blocks are only fetched once (index never changes);
        # per-layer blocks double-buffer so next-layer DMA overlaps compute.
        in_specs.append(const_spec(a) if kind == 'const' else layer_spec(a))
    out_spec = pl.BlockSpec((1, Bt, nc_pad), lambda b, l: (b, 0, 0))

    # --- rough cost hint for the XLA scheduler ------------------------------
    M_total = B * S
    hd = d_model // nhead
    flops_layer = (2 * M_total * d_model * 3 * d_model
                   + 2 * nhead * B * S * S * hd * 2
                   + 2 * M_total * d_model * d_model
                   + 2 * M_total * d_model * dim_ff * 2)
    flops = (2 * M_total * in_pad * d_model + num_layers * flops_layer
             + 2 * B * d_model * nc_pad)
    transcendentals = num_layers * nhead * B * S * (S + 1)
    bytes_accessed = (int(x_p.size) * 2 + int(pe.size) * 4 + const_bytes
                      + n_tiles * (Bt * nc_pad * 4 + num_layers * layer_bytes))

    kernel = functools.partial(transformer_classifier_kernel, nhead=nhead)
    out = pl.pallas_call(
        kernel,
        out_shape=jax.ShapeDtypeStruct((n_tiles, Bt, nc_pad), jnp.float32),
        grid_spec=pltpu.PrefetchScalarGridSpec(
            num_scalar_prefetch=0,
            grid=(n_tiles, num_layers),
            in_specs=in_specs,
            out_specs=out_spec,
            scratch_shapes=[pltpu.VMEM((Bt * S, d_model), jnp.float32)],
        ),
        compiler_params=pltpu.CompilerParams(
            dimension_semantics=("parallel", "arbitrary"),
            vmem_limit_bytes=vmem_limit),
        cost_estimate=pl.CostEstimate(flops=int(flops),
                                      transcendentals=int(transcendentals),
                                      bytes_accessed=int(bytes_accessed)),
    )(x_p, pe, *arrays)
    return out.reshape(B, nc_pad)[:, :num_classes]


# ---------------------------------------------------------------------------
# Parameters / positional encoding / pure-JAX f32 reference
# ---------------------------------------------------------------------------
def make_positional_encoding(seq_len, d_model):
    pos = jnp.arange(seq_len, dtype=jnp.float32)[:, None]
    div = jnp.exp(jnp.arange(0, d_model, 2, dtype=jnp.float32)
                  * (-math.log(10000.0) / d_model))
    pe = jnp.zeros((seq_len, d_model), jnp.float32)
    pe = pe.at[:, 0::2].set(jnp.sin(pos * div))
    pe = pe.at[:, 1::2].set(jnp.cos(pos * div))
    return pe


def init_params(key, input_size, num_classes, d_model, num_layers,
                dim_feedforward):
    ks = jax.random.split(key, 12)

    def w(k, shape, scale=0.02):
        return (scale * jax.random.normal(k, shape)).astype(jnp.float32)

    return {
        'w_emb_t':  w(ks[0], (input_size, d_model)),
        'b_emb':    w(ks[1], (1, d_model)),
        'in_w_t':   w(ks[2], (num_layers, d_model, 3 * d_model)),
        'in_b':     w(ks[3], (num_layers, 1, 3 * d_model)),
        'out_w_t':  w(ks[4], (num_layers, d_model, d_model)),
        'out_b':    w(ks[5], (num_layers, 1, d_model)),
        'ln1_w':    jnp.ones((num_layers, 1, d_model), jnp.float32),
        'ln1_b':    jnp.zeros((num_layers, 1, d_model), jnp.float32),
        'lin1_w_t': w(ks[6], (num_layers, d_model, dim_feedforward)),
        'lin1_b':   w(ks[7], (num_layers, 1, dim_feedforward)),
        'lin2_w_t': w(ks[8], (num_layers, dim_feedforward, d_model)),
        'lin2_b':   w(ks[9], (num_layers, 1, d_model)),
        'ln2_w':    jnp.ones((num_layers, 1, d_model), jnp.float32),
        'ln2_b':    jnp.zeros((num_layers, 1, d_model), jnp.float32),
        'cls_w_t':  w(ks[10], (d_model, num_classes)),
        'cls_b':    w(ks[11], (1, num_classes)),
    }


def reference_forward(x, pe, p, nhead):
    B, S, _ = x.shape
    d = p['w_emb_t'].shape[1]
    hd = d // nhead
    h = x @ p['w_emb_t'] + p['b_emb'] + pe
    for l in range(p['in_w_t'].shape[0]):
        qkv = h @ p['in_w_t'][l] + p['in_b'][l]
        q, k, v = qkv[..., :d], qkv[..., d:2 * d], qkv[..., 2 * d:]
        q = q.reshape(B, S, nhead, hd).transpose(0, 2, 1, 3)
        k = k.reshape(B, S, nhead, hd).transpose(0, 2, 1, 3)
        v = v.reshape(B, S, nhead, hd).transpose(0, 2, 1, 3)
        s = (q @ k.transpose(0, 1, 3, 2)) / math.sqrt(hd)
        a = jax.nn.softmax(s, axis=-1)
        ctx = (a @ v).transpose(0, 2, 1, 3).reshape(B, S, d)
        attn = ctx @ p['out_w_t'][l] + p['out_b'][l]
        h = _layer_norm(h + attn, p['ln1_w'][l], p['ln1_b'][l])
        ff = jax.nn.relu(h @ p['lin1_w_t'][l] + p['lin1_b'][l])
        ff = ff @ p['lin2_w_t'][l] + p['lin2_b'][l]
        h = _layer_norm(h + ff, p['ln2_w'][l], p['ln2_b'][l])
    pooled = h.mean(axis=1)
    return pooled @ p['cls_w_t'] + p['cls_b']


# ---------------------------------------------------------------------------
if __name__ == "__main__":
    B, S = 2, 8
    input_size, num_classes = 16, 4
    d_model, nhead, num_layers, dim_feedforward = 128, 8, 2, 256

    key = jax.random.PRNGKey(0)
    kx, kp = jax.random.split(key)
    x = jax.random.normal(kx, (B, S, input_size), jnp.float32)
    params = init_params(kp, input_size, num_classes, d_model, num_layers,
                         dim_feedforward)
    pe = make_positional_encoding(S, d_model)

    out = transformer_classifier(x, pe, params, nhead=nhead)
    out = jax.block_until_ready(out)

    ref = reference_forward(x, pe, params, nhead)
    # bf16 MXU operands (incl. x / q / k / v / p) + approx reciprocal in the
    # softmax -> relaxed tolerance vs the pure-f32 reference. Intentional.
    np.testing.assert_allclose(np.asarray(out), np.asarray(ref),
                               rtol=2e-2, atol=2e-2)
    print("KERNEL_OK")
</pallas_src>

<mosaic_0001>
module attributes {stable_mosaic.version = 11 : i64} {
  func.func @transformer_classifier_kernel(%arg0: i32, %arg1: i32, %arg2: memref<2x8x128xbf16, #tpu.memory_space<vmem>>, %arg3: memref<8x128xf32, #tpu.memory_space<vmem>>, %arg4: memref<128x128xbf16, #tpu.memory_space<vmem>>, %arg5: memref<1x128xf32, #tpu.memory_space<vmem>>, %arg6: memref<1x128x384xbf16, #tpu.memory_space<vmem>>, %arg7: memref<1x1x384xf32, #tpu.memory_space<vmem>>, %arg8: memref<1x128x128xbf16, #tpu.memory_space<vmem>>, %arg9: memref<1x1x128xf32, #tpu.memory_space<vmem>>, %arg10: memref<1x1x128xf32, #tpu.memory_space<vmem>>, %arg11: memref<1x1x128xf32, #tpu.memory_space<vmem>>, %arg12: memref<1x128x256xbf16, #tpu.memory_space<vmem>>, %arg13: memref<1x1x256xf32, #tpu.memory_space<vmem>>, %arg14: memref<1x256x128xbf16, #tpu.memory_space<vmem>>, %arg15: memref<1x1x128xf32, #tpu.memory_space<vmem>>, %arg16: memref<1x1x128xf32, #tpu.memory_space<vmem>>, %arg17: memref<1x1x128xf32, #tpu.memory_space<vmem>>, %arg18: memref<128x128xbf16, #tpu.memory_space<vmem>>, %arg19: memref<1x128xf32, #tpu.memory_space<vmem>>, %arg20: memref<1x2x128xf32, #tpu.memory_space<vmem>>, %arg21: memref<16x128xf32, #tpu.memory_space<vmem>>) attributes {dimension_semantics = [#tpu.dimension_semantics<parallel>, #tpu.dimension_semantics<arbitrary>], iteration_bounds = array<i64: 1, 2>, scalar_prefetch = 0 : i64, scratch_operands = 1 : i64, tpu.core_type = #tpu.core_type<tc>, window_params = [{transform_indices = @transform_0, window_bounds = array<i64: 2, 8, 128>}, {pipeline_mode = #tpu.pipeline_mode<synchronous>, transform_indices = @transform_1, window_bounds = array<i64: 8, 128>}, {pipeline_mode = #tpu.pipeline_mode<synchronous>, transform_indices = @transform_2, window_bounds = array<i64: 128, 128>}, {pipeline_mode = #tpu.pipeline_mode<synchronous>, transform_indices = @transform_3, window_bounds = array<i64: 1, 128>}, {transform_indices = @transform_4, window_bounds = array<i64: 1, 128, 384>}, {transform_indices = @transform_5, window_bounds = array<i64: 1, 1, 384>}, {transform_indices = @transform_6, window_bounds = array<i64: 1, 128, 128>}, {transform_indices = @transform_7, window_bounds = array<i64: 1, 1, 128>}, {transform_indices = @transform_8, window_bounds = array<i64: 1, 1, 128>}, {transform_indices = @transform_9, window_bounds = array<i64: 1, 1, 128>}, {transform_indices = @transform_10, window_bounds = array<i64: 1, 128, 256>}, {transform_indices = @transform_11, window_bounds = array<i64: 1, 1, 256>}, {transform_indices = @transform_12, window_bounds = array<i64: 1, 256, 128>}, {transform_indices = @transform_13, window_bounds = array<i64: 1, 1, 128>}, {transform_indices = @transform_14, window_bounds = array<i64: 1, 1, 128>}, {transform_indices = @transform_15, window_bounds = array<i64: 1, 1, 128>}, {pipeline_mode = #tpu.pipeline_mode<synchronous>, transform_indices = @transform_16, window_bounds = array<i64: 128, 128>}, {pipeline_mode = #tpu.pipeline_mode<synchronous>, transform_indices = @transform_17, window_bounds = array<i64: 1, 128>}, {transform_indices = @transform_18, window_bounds = array<i64: 1, 2, 128>}]} {
    %c0_i32 = arith.constant 0 : i32
    %0 = arith.cmpi eq, %arg1, %c0_i32 : i32
    %1 = arith.extui %0 : i1 to i32
    %c0_i32_0 = arith.constant 0 : i32
    %2 = arith.cmpi ne, %1, %c0_i32_0 : i32
    scf.if %2 {
      %c0_62 = arith.constant 0 : index
      %c0_63 = arith.constant 0 : index
      %c0_64 = arith.constant 0 : index
      %128 = vector.load %arg2[%c0_62, %c0_63, %c0_64] : memref<2x8x128xbf16, #tpu.memory_space<vmem>>, vector<2x8x128xbf16>
      %129 = vector.shape_cast %128 : vector<2x8x128xbf16> to vector<16x128xbf16>
      %c0_65 = arith.constant 0 : index
      %c0_66 = arith.constant 0 : index
      %130 = vector.load %arg4[%c0_65, %c0_66] : memref<128x128xbf16, #tpu.memory_space<vmem>>, vector<128x128xbf16>
      %cst_67 = arith.constant dense<0.000000e+00> : vector<16x128xf32>
      %131 = tpu.matmul %129, %130, %cst_67 {dimension_numbers = #tpu.dot_dimension_numbers<[1], [0], [0], [1], [0, 0, 1, 1], [], []>} : vector<16x128xbf16>, vector<128x128xbf16>, vector<16x128xf32> -> vector<16x128xf32>
      %c0_68 = arith.constant 0 : index
      %c0_69 = arith.constant 0 : index
      %132 = vector.load %arg5[%c0_68, %c0_69] : memref<1x128xf32, #tpu.memory_space<vmem>>, vector<1x128xf32>
      %133 = vector.broadcast %132 : vector<1x128xf32> to vector<16x128xf32>
      %134 = arith.addf %131, %133 : vector<16x128xf32>
      %135 = vector.shape_cast %134 : vector<16x128xf32> to vector<2x8x128xf32>
      %c0_70 = arith.constant 0 : index
      %c0_71 = arith.constant 0 : index
      %136 = vector.load %arg3[%c0_70, %c0_71] : memref<8x128xf32, #tpu.memory_space<vmem>>, vector<8x128xf32>
      %137 = vector.shape_cast %136 : vector<8x128xf32> to vector<1x8x128xf32>
      %138 = vector.broadcast %137 : vector<1x8x128xf32> to vector<2x8x128xf32>
      %139 = arith.addf %135, %138 : vector<2x8x128xf32>
      %140 = vector.shape_cast %139 : vector<2x8x128xf32> to vector<16x128xf32>
      %c0_72 = arith.constant 0 : index
      %c0_73 = arith.constant 0 : index
      %141 = vector.load %arg21[%c0_72, %c0_73] : memref<16x128xf32, #tpu.memory_space<vmem>>, vector<16x128xf32>
      tpu.vector_store %arg21[%c0_72, %c0_73], %140 {strides = array<i32>} : memref<16x128xf32, #tpu.memory_space<vmem>>, vector<16x128xf32>,
    } else {
    }
    %c0 = arith.constant 0 : index
    %c0_1 = arith.constant 0 : index
    %3 = vector.load %arg21[%c0, %c0_1] : memref<16x128xf32, #tpu.memory_space<vmem>>, vector<16x128xf32>
    %4 = arith.truncf %3 : vector<16x128xf32> to vector<16x128xbf16>
    %c0_2 = arith.constant 0 : index
    %c0_3 = arith.constant 0 : index
    %c0_4 = arith.constant 0 : index
    %5 = vector.load %arg6[%c0_2, %c0_3, %c0_4] : memref<1x128x384xbf16, #tpu.memory_space<vmem>>, vector<1x128x384xbf16>
    %6 = vector.shape_cast %5 : vector<1x128x384xbf16> to vector<128x384xbf16>
    %cst = arith.constant dense<0.000000e+00> : vector<16x384xf32>
    %7 = tpu.matmul %4, %6, %cst {dimension_numbers = #tpu.dot_dimension_numbers<[1], [0], [0], [1], [0, 0, 1, 1], [], []>} : vector<16x128xbf16>, vector<128x384xbf16>, vector<16x384xf32> -> vector<16x384xf32>
    %c0_5 = arith.constant 0 : index
    %c0_6 = arith.constant 0 : index
    %c0_7 = arith.constant 0 : index
    %8 = vector.load %arg7[%c0_5, %c0_6, %c0_7] : memref<1x1x384xf32, #tpu.memory_space<vmem>>, vector<1x1x384xf32>
    %9 = vector.shape_cast %8 : vector<1x1x384xf32> to vector<1x384xf32>
    %10 = vector.broadcast %9 : vector<1x384xf32> to vector<16x384xf32>
    %11 = arith.addf %7, %10 : vector<16x384xf32>
    %12 = arith.truncf %11 : vector<16x384xf32> to vector<16x384xbf16>
    %13 = vector.shape_cast %12 : vector<16x384xbf16> to vector<16x24x16xbf16>
    %14 = tpu.transpose %13, [1, 0, 2] : vector<16x24x16xbf16> -> vector<24x16x16xbf16>
    %15 = vector.shape_cast %14 : vector<24x16x16xbf16> to vector<24x2x8x16xbf16>
    %16 = vector.extract_strided_slice %15 {offsets = [0, 0, 0, 0], sizes = [8, 2, 8, 16], strides = [1, 1, 1, 1]} : vector<24x2x8x16xbf16> to vector<8x2x8x16xbf16>
    %17 = vector.shape_cast %16 : vector<8x2x8x16xbf16> to vector<16x8x16xbf16>
    %18 = vector.extract_strided_slice %15 {offsets = [8, 0, 0, 0], sizes = [8, 2, 8, 16], strides = [1, 1, 1, 1]} : vector<24x2x8x16xbf16> to vector<8x2x8x16xbf16>
    %19 = vector.shape_cast %18 : vector<8x2x8x16xbf16> to vector<16x8x16xbf16>
    %20 = vector.extract_strided_slice %15 {offsets = [16, 0, 0, 0], sizes = [8, 2, 8, 16], strides = [1, 1, 1, 1]} : vector<24x2x8x16xbf16> to vector<8x2x8x16xbf16>
    %21 = vector.shape_cast %20 : vector<8x2x8x16xbf16> to vector<16x8x16xbf16>
    "tpu.trace_start"() <{level = 10 : i32, message = "gqh,gkh->gqk"}> : () -> ()
    %cst_8 = arith.constant dense<0.000000e+00> : vector<16x8x8xf32>
    %22 = tpu.matmul %17, %19, %cst_8 {dimension_numbers = #tpu.dot_dimension_numbers<[2], [2], [1], [1], [0, 0, 0, 1, 1, 1], [0], [0]>} : vector<16x8x16xbf16>, vector<16x8x16xbf16>, vector<16x8x8xf32> -> vector<16x8x8xf32>
    "tpu.trace_stop"() : () -> ()
    %cst_9 = arith.constant 2.500000e-01 : f32
    %23 = vector.broadcast %cst_9 : f32 to vector<16x8x8xf32>
    %24 = arith.mulf %22, %23 : vector<16x8x8xf32>
    %cst_10 = arith.constant dense<0xFF800000> : vector<16x8xf32>
    %25 = vector.multi_reduction <maximumf>, %24, %cst_10 [2] : vector<16x8x8xf32> to vector<16x8xf32>
    %26 = vector.shape_cast %25 : vector<16x8xf32> to vector<16x8x1xf32>
    %27 = vector.broadcast %26 : vector<16x8x1xf32> to vector<16x8x8xf32>
    %28 = arith.subf %24, %27 : vector<16x8x8xf32>
    %29 = math.exp %28 : vector<16x8x8xf32>
    %cst_11 = arith.constant dense<0.000000e+00> : vector<16x8xf32>
    %30 = vector.multi_reduction <add>, %29, %cst_11 [2] : vector<16x8x8xf32> to vector<16x8xf32>
    %31 = vector.shape_cast %30 : vector<16x8xf32> to vector<16x8x1xf32>
    %32 = tpu.reciprocal %31 {approx = true} : vector<16x8x1xf32> -> vector<16x8x1xf32>
    %33 = vector.broadcast %32 : vector<16x8x1xf32> to vector<16x8x8xf32>
    %34 = arith.mulf %29, %33 : vector<16x8x8xf32>
    %35 = arith.truncf %34 : vector<16x8x8xf32> to vector<16x8x8xbf16>
    "tpu.trace_start"() <{level = 10 : i32, message = "gqk,gkh->gqh"}> : () -> ()
    %cst_12 = arith.constant dense<0.000000e+00> : vector<16x8x16xf32>
    %36 = tpu.matmul %35, %21, %cst_12 {dimension_numbers = #tpu.dot_dimension_numbers<[2], [1], [1], [2], [0, 0, 0, 1, 1, 2], [0], [0]>} : vector<16x8x8xbf16>, vector<16x8x16xbf16>, vector<16x8x16xf32> -> vector<16x8x16xf32>
    "tpu.trace_stop"() : () -> ()
    %37 = vector.shape_cast %36 : vector<16x8x16xf32> to vector<8x16x16xf32>
    %38 = arith.truncf %37 : vector<8x16x16xf32> to vector<8x16x16xbf16>
    %39 = tpu.transpose %38, [1, 0, 2] : vector<8x16x16xbf16> -> vector<16x8x16xbf16>
    %40 = vector.shape_cast %39 : vector<16x8x16xbf16> to vector<16x128xbf16>
    %c0_13 = arith.constant 0 : index
    %c0_14 = arith.constant 0 : index
    %c0_15 = arith.constant 0 : index
    %41 = vector.load %arg8[%c0_13, %c0_14, %c0_15] : memref<1x128x128xbf16, #tpu.memory_space<vmem>>, vector<1x128x128xbf16>
    %42 = vector.shape_cast %41 : vector<1x128x128xbf16> to vector<128x128xbf16>
    %cst_16 = arith.constant dense<0.000000e+00> : vector<16x128xf32>
    %43 = tpu.matmul %40, %42, %cst_16 {dimension_numbers = #tpu.dot_dimension_numbers<[1], [0], [0], [1], [0, 0, 1, 1], [], []>} : vector<16x128xbf16>, vector<128x128xbf16>, vector<16x128xf32> -> vector<16x128xf32>
    %c0_17 = arith.constant 0 : index
    %c0_18 = arith.constant 0 : index
    %c0_19 = arith.constant 0 : index
    %44 = vector.load %arg9[%c0_17, %c0_18, %c0_19] : memref<1x1x128xf32, #tpu.memory_space<vmem>>, vector<1x1x128xf32>
    %45 = vector.shape_cast %44 : vector<1x1x128xf32> to vector<1x128xf32>
    %46 = vector.broadcast %45 : vector<1x128xf32> to vector<16x128xf32>
    %47 = arith.addf %43, %46 : vector<16x128xf32>
    %48 = arith.addf %3, %47 : vector<16x128xf32>
    %c0_20 = arith.constant 0 : index
    %c0_21 = arith.constant 0 : index
    %c0_22 = arith.constant 0 : index
    %49 = vector.load %arg10[%c0_20, %c0_21, %c0_22] : memref<1x1x128xf32, #tpu.memory_space<vmem>>, vector<1x1x128xf32>
    %50 = vector.shape_cast %49 : vector<1x1x128xf32> to vector<1x128xf32>
    %c0_23 = arith.constant 0 : index
    %c0_24 = arith.constant 0 : index
    %c0_25 = arith.constant 0 : index
    %51 = vector.load %arg11[%c0_23, %c0_24, %c0_25] : memref<1x1x128xf32, #tpu.memory_space<vmem>>, vector<1x1x128xf32>
    %52 = vector.shape_cast %51 : vector<1x1x128xf32> to vector<1x128xf32>
    %cst_26 = arith.constant dense<0.000000e+00> : vector<16xf32>
    %53 = vector.multi_reduction <add>, %48, %cst_26 [1] : vector<16x128xf32> to vector<16xf32>
    %54 = vector.shape_cast %53 : vector<16xf32> to vector<16x1xf32>
    %cst_27 = arith.constant 1.280000e+02 : f32
    %55 = vector.broadcast %cst_27 : f32 to vector<16x1xf32>
    %56 = arith.divf %54, %55 : vector<16x1xf32>
    %57 = arith.mulf %48, %48 : vector<16x128xf32>
    %cst_28 = arith.constant dense<0.000000e+00> : vector<16xf32>
    %58 = vector.multi_reduction <add>, %57, %cst_28 [1] : vector<16x128xf32> to vector<16xf32>
    %59 = vector.shape_cast %58 : vector<16xf32> to vector<16x1xf32>
    %cst_29 = arith.constant 1.280000e+02 : f32
    %60 = vector.broadcast %cst_29 : f32 to vector<16x1xf32>
    %61 = arith.divf %59, %60 : vector<16x1xf32>
    %62 = arith.mulf %56, %56 : vector<16x1xf32>
    %63 = arith.subf %61, %62 : vector<16x1xf32>
    %cst_30 = arith.constant 0.000000e+00 : f32
    %64 = vector.broadcast %cst_30 : f32 to vector<16x1xf32>
    %65 = arith.maximumf %63, %64 : vector<16x1xf32>
    %66 = vector.broadcast %56 : vector<16x1xf32> to vector<16x128xf32>
    %67 = arith.subf %48, %66 : vector<16x128xf32>
    %cst_31 = arith.constant 9.99999974E-6 : f32
    %68 = vector.broadcast %cst_31 : f32 to vector<16x1xf32>
    %69 = arith.addf %65, %68 : vector<16x1xf32>
    %70 = math.rsqrt %69 : vector<16x1xf32>
    %71 = vector.broadcast %70 : vector<16x1xf32> to vector<16x128xf32>
    %72 = arith.mulf %67, %71 : vector<16x128xf32>
    %73 = vector.broadcast %50 : vector<1x128xf32> to vector<16x128xf32>
    %74 = arith.mulf %72, %73 : vector<16x128xf32>
    %75 = vector.broadcast %52 : vector<1x128xf32> to vector<16x128xf32>
    %76 = arith.addf %74, %75 : vector<16x128xf32>
    %77 = arith.truncf %76 : vector<16x128xf32> to vector<16x128xbf16>
    %c0_32 = arith.constant 0 : index
    %c0_33 = arith.constant 0 : index
    %c0_34 = arith.constant 0 : index
    %78 = vector.load %arg12[%c0_32, %c0_33, %c0_34] : memref<1x128x256xbf16, #tpu.memory_space<vmem>>, vector<1x128x256xbf16>
    %79 = vector.shape_cast %78 : vector<1x128x256xbf16> to vector<128x256xbf16>
    %cst_35 = arith.constant dense<0.000000e+00> : vector<16x256xf32>
    %80 = tpu.matmul %77, %79, %cst_35 {dimension_numbers = #tpu.dot_dimension_numbers<[1], [0], [0], [1], [0, 0, 1, 1], [], []>} : vector<16x128xbf16>, vector<128x256xbf16>, vector<16x256xf32> -> vector<16x256xf32>
    %c0_36 = arith.constant 0 : index
    %c0_37 = arith.constant 0 : index
    %c0_38 = arith.constant 0 : index
    %81 = vector.load %arg13[%c0_36, %c0_37, %c0_38] : memref<1x1x256xf32, #tpu.memory_space<vmem>>, vector<1x1x256xf32>
    %82 = vector.shape_cast %81 : vector<1x1x256xf32> to vector<1x256xf32>
    %83 = vector.broadcast %82 : vector<1x256xf32> to vector<16x256xf32>
    %84 = arith.addf %80, %83 : vector<16x256xf32>
    %cst_39 = arith.constant 0.000000e+00 : f32
    %85 = vector.broadcast %cst_39 : f32 to vector<16x256xf32>
    %86 = arith.maximumf %84, %85 : vector<16x256xf32>
    %87 = arith.truncf %86 : vector<16x256xf32> to vector<16x256xbf16>
    %c0_40 = arith.constant 0 : index
    %c0_41 = arith.constant 0 : index
    %c0_42 = arith.constant 0 : index
    %88 = vector.load %arg14[%c0_40, %c0_41, %c0_42] : memref<1x256x128xbf16, #tpu.memory_space<vmem>>, vector<1x256x128xbf16>
    %89 = vector.shape_cast %88 : vector<1x256x128xbf16> to vector<256x128xbf16>
    %cst_43 = arith.constant dense<0.000000e+00> : vector<16x128xf32>
    %90 = tpu.matmul %87, %89, %cst_43 {dimension_numbers = #tpu.dot_dimension_numbers<[1], [0], [0], [1], [0, 0, 1, 1], [], []>} : vector<16x256xbf16>, vector<256x128xbf16>, vector<16x128xf32> -> vector<16x128xf32>
    %c0_44 = arith.constant 0 : index
    %c0_45 = arith.constant 0 : index
    %c0_46 = arith.constant 0 : index
    %91 = vector.load %arg15[%c0_44, %c0_45, %c0_46] : memref<1x1x128xf32, #tpu.memory_space<vmem>>, vector<1x1x128xf32>
    %92 = vector.shape_cast %91 : vector<1x1x128xf32> to vector<1x128xf32>
    %93 = vector.broadcast %92 : vector<1x128xf32> to vector<16x128xf32>
    %94 = arith.addf %90, %93 : vector<16x128xf32>
    %95 = arith.addf %76, %94 : vector<16x128xf32>
    %c0_47 = arith.constant 0 : index
    %c0_48 = arith.constant 0 : index
    %c0_49 = arith.constant 0 : index
    %96 = vector.load %arg16[%c0_47, %c0_48, %c0_49] : memref<1x1x128xf32, #tpu.memory_space<vmem>>, vector<1x1x128xf32>
    %97 = vector.shape_cast %96 : vector<1x1x128xf32> to vector<1x128xf32>
    %c0_50 = arith.constant 0 : index
    %c0_51 = arith.constant 0 : index
    %c0_52 = arith.constant 0 : index
    %98 = vector.load %arg17[%c0_50, %c0_51, %c0_52] : memref<1x1x128xf32, #tpu.memory_space<vmem>>, vector<1x1x128xf32>
    %99 = vector.shape_cast %98 : vector<1x1x128xf32> to vector<1x128xf32>
    %cst_53 = arith.constant dense<0.000000e+00> : vector<16xf32>
    %100 = vector.multi_reduction <add>, %95, %cst_53 [1] : vector<16x128xf32> to vector<16xf32>
    %101 = vector.shape_cast %100 : vector<16xf32> to vector<16x1xf32>
    %cst_54 = arith.constant 1.280000e+02 : f32
    %102 = vector.broadcast %cst_54 : f32 to vector<16x1xf32>
    %103 = arith.divf %101, %102 : vector<16x1xf32>
    %104 = arith.mulf %95, %95 : vector<16x128xf32>
    %cst_55 = arith.constant dense<0.000000e+00> : vector<16xf32>
    %105 = vector.multi_reduction <add>, %104, %cst_55 [1] : vector<16x128xf32> to vector<16xf32>
    %106 = vector.shape_cast %105 : vector<16xf32> to vector<16x1xf32>
    %cst_56 = arith.constant 1.280000e+02 : f32
    %107 = vector.broadcast %cst_56 : f32 to vector<16x1xf32>
    %108 = arith.divf %106, %107 : vector<16x1xf32>
    %109 = arith.mulf %103, %103 : vector<16x1xf32>
    %110 = arith.subf %108, %109 : vector<16x1xf32>
    %cst_57 = arith.constant 0.000000e+00 : f32
    %111 = vector.broadcast %cst_57 : f32 to vector<16x1xf32>
    %112 = arith.maximumf %110, %111 : vector<16x1xf32>
    %113 = vector.broadcast %103 : vector<16x1xf32> to vector<16x128xf32>
    %114 = arith.subf %95, %113 : vector<16x128xf32>
    %cst_58 = arith.constant 9.99999974E-6 : f32
    %115 = vector.broadcast %cst_58 : f32 to vector<16x1xf32>
    %116 = arith.addf %112, %115 : vector<16x1xf32>
    %117 = math.rsqrt %116 : vector<16x1xf32>
    %118 = vector.broadcast %117 : vector<16x1xf32> to vector<16x128xf32>
    %119 = arith.mulf %114, %118 : vector<16x128xf32>
    %120 = vector.broadcast %97 : vector<1x128xf32> to vector<16x128xf32>
    %121 = arith.mulf %119, %120 : vector<16x128xf32>
    %122 = vector.broadcast %99 : vector<1x128xf32> to vector<16x128xf32>
    %123 = arith.addf %121, %122 : vector<16x128xf32>
    %c0_59 = arith.constant 0 : index
    %c0_60 = arith.constant 0 : index
    %124 = vector.load %arg21[%c0_59, %c0_60] : memref<16x128xf32, #tpu.memory_space<vmem>>, vector<16x128xf32>
    tpu.vector_store %arg21[%c0_59, %c0_60], %123 {strides = array<i32>} : memref<16x128xf32, #tpu.memory_space<vmem>>, vector<16x128xf32>,
    %c1_i32 = arith.constant 1 : i32
    %125 = arith.cmpi eq, %arg1, %c1_i32 : i32
    %126 = arith.extui %125 : i1 to i32
    %c0_i32_61 = arith.constant 0 : i32
    %127 = arith.cmpi ne, %126, %c0_i32_61 : i32
    scf.if %127 {
      %128 = vector.shape_cast %123 : vector<16x128xf32> to vector<2x8x128xf32>
      %cst_62 = arith.constant dense<0.000000e+00> : vector<2x128xf32>
      %129 = vector.multi_reduction <add>, %128, %cst_62 [1] : vector<2x8x128xf32> to vector<2x128xf32>
      %cst_63 = arith.constant 1.250000e-01 : f32
      %130 = vector.broadcast %cst_63 : f32 to vector<2x128xf32>
      %131 = arith.mulf %129, %130 : vector<2x128xf32>
      %132 = arith.truncf %131 : vector<2x128xf32> to vector<2x128xbf16>
      %c0_64 = arith.constant 0 : index
      %c0_65 = arith.constant 0 : index
      %133 = vector.load %arg18[%c0_64, %c0_65] : memref<128x128xbf16, #tpu.memory_space<vmem>>, vector<128x128xbf16>
      %cst_66 = arith.constant dense<0.000000e+00> : vector<2x128xf32>
      %134 = tpu.matmul %132, %133, %cst_66 {dimension_numbers = #tpu.dot_dimension_numbers<[1], [0], [0], [1], [0, 0, 1, 1], [], []>} : vector<2x128xbf16>, vector<128x128xbf16>, vector<2x128xf32> -> vector<2x128xf32>
      %c0_67 = arith.constant 0 : index
      %c0_68 = arith.constant 0 : index
      %135 = vector.load %arg19[%c0_67, %c0_68] : memref<1x128xf32, #tpu.memory_space<vmem>>, vector<1x128xf32>
      %136 = vector.broadcast %135 : vector<1x128xf32> to vector<2x128xf32>
      %137 = arith.addf %134, %136 : vector<2x128xf32>
      %c0_69 = arith.constant 0 : index
      %c0_70 = arith.constant 0 : index
      %c0_71 = arith.constant 0 : index
      %138 = vector.load %arg20[%c0_69, %c0_70, %c0_71] : memref<1x2x128xf32, #tpu.memory_space<vmem>>, vector<1x2x128xf32>
      %139 = vector.shape_cast %138 : vector<1x2x128xf32> to vector<2x128xf32>
      %140 = vector.shape_cast %137 : vector<2x128xf32> to vector<1x2x128xf32>
      tpu.vector_store %arg20[%c0_69, %c0_70, %c0_71], %140 {strides = array<i32>} : memref<1x2x128xf32, #tpu.memory_space<vmem>>, vector<1x2x128xf32>,
    } else {
    }
    return
  }
  func.func @transform_0(%arg0: i32, %arg1: i32) -> (i32, i32, i32) {
    %c0_i32 = arith.constant 0 : i32
    %c0_i32_0 = arith.constant 0 : i32
    %c0_i32_1 = arith.constant 0 : i32
    return %arg0, %c0_i32, %c0_i32_0 : i32, i32, i32
  }
  func.func @transform_1(%arg0: i32, %arg1: i32) -> (i32, i32) {
    %c0_i32 = arith.constant 0 : i32
    %c0_i32_0 = arith.constant 0 : i32
    %c0_i32_1 = arith.constant 0 : i32
    return %c0_i32, %c0_i32_0 : i32, i32
  }
  func.func @transform_2(%arg0: i32, %arg1: i32) -> (i32, i32) {
    %c0_i32 = arith.constant 0 : i32
    %c0_i32_0 = arith.constant 0 : i32
    %c0_i32_1 = arith.constant 0 : i32
    return %c0_i32, %c0_i32_0 : i32, i32
  }
  func.func @transform_3(%arg0: i32, %arg1: i32) -> (i32, i32) {
    %c0_i32 = arith.constant 0 : i32
    %c0_i32_0 = arith.constant 0 : i32
    %c0_i32_1 = arith.constant 0 : i32
    return %c0_i32, %c0_i32_0 : i32, i32
  }
  func.func @transform_4(%arg0: i32, %arg1: i32) -> (i32, i32, i32) {
    %c0_i32 = arith.constant 0 : i32
    %c0_i32_0 = arith.constant 0 : i32
    %c0_i32_1 = arith.constant 0 : i32
    return %arg1, %c0_i32, %c0_i32_0 : i32, i32, i32
  }
  func.func @transform_5(%arg0: i32, %arg1: i32) -> (i32, i32, i32) {
    %c0_i32 = arith.constant 0 : i32
    %c0_i32_0 = arith.constant 0 : i32
    %c0_i32_1 = arith.constant 0 : i32
    return %arg1, %c0_i32, %c0_i32_0 : i32, i32, i32
  }
  func.func @transform_6(%arg0: i32, %arg1: i32) -> (i32, i32, i32) {
    %c0_i32 = arith.constant 0 : i32
    %c0_i32_0 = arith.constant 0 : i32
    %c0_i32_1 = arith.constant 0 : i32
    return %arg1, %c0_i32, %c0_i32_0 : i32, i32, i32
  }
  func.func @transform_7(%arg0: i32, %arg1: i32) -> (i32, i32, i32) {
    %c0_i32 = arith.constant 0 : i32
    %c0_i32_0 = arith.constant 0 : i32
    %c0_i32_1 = arith.constant 0 : i32
    return %arg1, %c0_i32, %c0_i32_0 : i32, i32, i32
  }
  func.func @transform_8(%arg0: i32, %arg1: i32) -> (i32, i32, i32) {
    %c0_i32 = arith.constant 0 : i32
    %c0_i32_0 = arith.constant 0 : i32
    %c0_i32_1 = arith.constant 0 : i32
    return %arg1, %c0_i32, %c0_i32_0 : i32, i32, i32
  }
  func.func @transform_9(%arg0: i32, %arg1: i32) -> (i32, i32, i32) {
    %c0_i32 = arith.constant 0 : i32
    %c0_i32_0 = arith.constant 0 : i32
    %c0_i32_1 = arith.constant 0 : i32
    return %arg1, %c0_i32, %c0_i32_0 : i32, i32, i32
  }
  func.func @transform_10(%arg0: i32, %arg1: i32) -> (i32, i32, i32) {
    %c0_i32 = arith.constant 0 : i32
    %c0_i32_0 = arith.constant 0 : i32
    %c0_i32_1 = arith.constant 0 : i32
    return %arg1, %c0_i32, %c0_i32_0 : i32, i32, i32
  }
  func.func @transform_11(%arg0: i32, %arg1: i32) -> (i32, i32, i32) {
    %c0_i32 = arith.constant 0 : i32
    %c0_i32_0 = arith.constant 0 : i32
    %c0_i32_1 = arith.constant 0 : i32
    return %arg1, %c0_i32, %c0_i32_0 : i32, i32, i32
  }
  func.func @transform_12(%arg0: i32, %arg1: i32) -> (i32, i32, i32) {
    %c0_i32 = arith.constant 0 : i32
    %c0_i32_0 = arith.constant 0 : i32
    %c0_i32_1 = arith.constant 0 : i32
    return %arg1, %c0_i32, %c0_i32_0 : i32, i32, i32
  }
  func.func @transform_13(%arg0: i32, %arg1: i32) -> (i32, i32, i32) {
    %c0_i32 = arith.constant 0 : i32
    %c0_i32_0 = arith.constant 0 : i32
    %c0_i32_1 = arith.constant 0 : i32
    return %arg1, %c0_i32, %c0_i32_0 : i32, i32, i32
  }
  func.func @transform_14(%arg0: i32, %arg1: i32) -> (i32, i32, i32) {
    %c0_i32 = arith.constant 0 : i32
    %c0_i32_0 = arith.constant 0 : i32
    %c0_i32_1 = arith.constant 0 : i32
    return %arg1, %c0_i32, %c0_i32_0 : i32, i32, i32
  }
  func.func @transform_15(%arg0: i32, %arg1: i32) -> (i32, i32, i32) {
    %c0_i32 = arith.constant 0 : i32
    %c0_i32_0 = arith.constant 0 : i32
    %c0_i32_1 = arith.constant 0 : i32
    return %arg1, %c0_i32, %c0_i32_0 : i32, i32, i32
  }
  func.func @transform_16(%arg0: i32, %arg1: i32) -> (i32, i32) {
    %c0_i32 = arith.constant 0 : i32
    %c0_i32_0 = arith.constant 0 : i32
    %c0_i32_1 = arith.constant 0 : i32
    return %c0_i32, %c0_i32_0 : i32, i32
  }
  func.func @transform_17(%arg0: i32, %arg1: i32) -> (i32, i32) {
    %c0_i32 = arith.constant 0 : i32
    %c0_i32_0 = arith.constant 0 : i32
    %c0_i32_1 = arith.constant 0 : i32
    return %c0_i32, %c0_i32_0 : i32, i32
  }
  func.func @transform_18(%arg0: i32, %arg1: i32) -> (i32, i32, i32) {
    %c0_i32 = arith.constant 0 : i32
    %c0_i32_0 = arith.constant 0 : i32
    %c0_i32_1 = arith.constant 0 : i32
    return %arg0, %c0_i32, %c0_i32_0 : i32, i32, i32
  }
}

</mosaic_0001>

<bundles_post_ra>
// kernel: tpu_custom_call.1
= control target key start
LH: loop header
LB: loop body
LE: loop exit
PB: predicated region body
PF: predicated region fallthrough
CT: control target
= control target key end

     0   :  { %s7981_s0 = inlined_call_operand.hbm [shape: bf16[2,8,128], index: 0, kind: input, shape index: {}]   ;;  %s7982_s1 = inlined_call_operand.hbm [shape: f32[8,128], index: 1, kind: input, shape index: {}]   ;;  %s7983_s2 = inlined_call_operand.hbm [shape: bf16[128,128], index: 2, kind: input, shape index: {}]   ;;  %s7984_s3 = inlined_call_operand.hbm [shape: f32[1,128], index: 3, kind: input, shape index: {}]   ;;  %s7985_s4 = inlined_call_operand.hbm [shape: bf16[2,128,384], index: 4, kind: input, shape index: {}]   ;;  %s7986_s5 = inlined_call_operand.vmem [shape: f32[2,1,384], index: 5, kind: input, shape index: {}]   ;;  %s7987_s6 = inlined_call_operand.hbm [shape: bf16[2,128,128], index: 6, kind: input, shape index: {}]   ;;  %s7988_s7 = inlined_call_operand.vmem [shape: f32[2,1,128], index: 7, kind: input, shape index: {}]   ;;  %s7989_s8 = inlined_call_operand.vmem [shape: f32[2,1,128], index: 8, kind: input, shape index: {}]   ;;  %s7990_s9 = inlined_call_operand.vmem [shape: f32[2,1,128], index: 9, kind: input, shape index: {}]   ;;  %s7991_s10 = inlined_call_operand.hbm [shape: bf16[2,128,256], index: 10, kind: input, shape index: {}]   ;;  %s7992_s11 = inlined_call_operand.vmem [shape: f32[2,1,256], index: 11, kind: input, shape index: {}]   ;;  %s7993_s12 = inlined_call_operand.hbm [shape: bf16[2,256,128], index: 12, kind: input, shape index: {}]   ;;  %s7994_s13 = inlined_call_operand.vmem [shape: f32[2,1,128], index: 13, kind: input, shape index: {}]   ;;  %s7995_s14 = inlined_call_operand.vmem [shape: f32[2,1,128], index: 14, kind: input, shape index: {}]   ;;  %s7996_s15 = inlined_call_operand.vmem [shape: f32[2,1,128], index: 15, kind: input, shape index: {}]   ;;  %s7997_s16 = inlined_call_operand.hbm [shape: bf16[128,128], index: 16, kind: input, shape index: {}]   ;;  %s7998_s17 = inlined_call_operand.vmem [shape: f32[1,128], index: 17, kind: input, shape index: {}]   ;;  %s7999_s18 = inlined_call_operand.hbm [shape: f32[1,2,128], index: 18, kind: output, shape index: {}]  }
   0x1   :  { %8014 = sst [smem:[#allocation27_spill]] %s7981_s0 }
   0x2   :  { %8015 = sst [smem:[#allocation28_spill]] %s7982_s1 }
   0x3   :  { %8016 = sst [smem:[#allocation29_spill]] %s7983_s2 }
   0x4   :  { %8017 = sst [smem:[#allocation30_spill]] %s7984_s3 }
   0x5   :  { %8018 = sst [smem:[#allocation31_spill]] %s7985_s4 }
   0x6   :  { %8019 = sst [smem:[#allocation32_spill]] %s7986_s5 }
   0x7   :  { %8020 = sst [smem:[#allocation33_spill]] %s7987_s6 }
   0x8   :  { %8021 = sst [smem:[#allocation34_spill]] %s7989_s8 }
   0x9   :  { %8022 = sst [smem:[#allocation35_spill]] %s7990_s9 }
   0xa   :  { %8023 = sst [smem:[#allocation36_spill]] %s7991_s10 }
   0xb   :  { %8024 = sst [smem:[#allocation37_spill]] %s7992_s11 }
   0xc   :  { %8025 = sst [smem:[#allocation38_spill]] %s7993_s12 }
   0xd   :  { %8026 = sst [smem:[#allocation39_spill]] %s7994_s13 }
   0xe   :  { %8027 = sst [smem:[#allocation40_spill]] %s7995_s14 }
   0xf   :  { %8028 = sst [smem:[#allocation41_spill]] %s7996_s15 }
  0x10   :  { %8029 = sst [smem:[#allocation42_spill]] %s7997_s16 }
  0x11   :  { %8030 = sst [smem:[#allocation43_spill]] %s7998_s17 }
  0x12   :  { %8031 = sst [smem:[#allocation44_spill]] %s7999_s18 }
  0x13   :  { %23 = vsyncpa [#allocation4], 0 }
  0x14   :  { %24 = vsyncpa [#allocation7], 0 }
  0x15   :  { %25 = vsyncpa [#allocation10], 0 }
  0x16   :  { %26 = vsyncpa [#allocation5], 0  ;;  %s6836_s27 = smov 0   ;;  %s6838_s28 = smov 0  }
  0x17   :  { %s6840_s29 = smov 0   ;;  %s6842_s30 = smov 0  }
  0x18   :  { %s6844_s0 = smov 0   ;;  %s6846_s19 = smov 0  }
  0x19 LB: > { %8032 = sst [smem:[#allocation23_spill]] %s6695_s29  ;;  %s6865_s1 = sadd.s32 4294967295, %s6707_s19   ;;  %s6707_s19 = sphi %s6846_s19, %s32_s19   ;;  %s6703_s0 = sphi %s6844_s0, %s8089_s0   ;;  %s6699_s30 = sphi %s6842_s30, %s8088_s30   ;;  %s6695_s29 = sphi %s6840_s29, %s8084_s29   ;;  %s6691_s28 = sphi %s6838_s28, %s8087_s28   ;;  %s6687_s27 = sphi %s6836_s27, %s8086_s27  }
  0x1a   : > { %8033 = sst [smem:[#allocation24_spill]] %s6707_s19  ;;  %p153_p0 = scmp.ne.s32.totalorder %s6691_s28, %s6687_s27 }
  0x1b   : > { %p8005_p1 = scmp.eq.s32.totalorder %s6865_s1, 0  ;;  %p5423_p2 = scmp.ge.s32.totalorder %s6707_s19, 1 }
  0x1c   : > { %p518_p3 = scmp.lt.s32.totalorder %s6707_s19, 3  ;;  %s6709_s22 = smov [#allocation3]  }
  0x1d   : > { %p6873_p4 = por %p8005_p1, %p153_p0  ;;  %s533_s2 = sshll.u32 %s6709_s22, 4  ;;  %s534_s2 = int_to_ptr.vmem [resolvable:$true] %s533_s2 }
  0x1e   : > { %p6877_p5 = pnand %p5423_p2, %p518_p3  ;;  %s41_s24 = sadd.s32 1, %s6703_s0 }
  0x1f   : > { %s8034_s20 = scalar_select %p6873_p4, 1, 0 }
  0x20   : > { %s8035_s21 = scalar_select %p6877_p5, 1, 0 }
  0x21   : > { %p6082_p6 = pneg %p6877_p5  ;;  %s6382_s26 = scalar_lea.vmem %s534_s2, 128 }
  0x22   : > { %p6383_p9 = scmp.ne.s32.totalorder %s534_s2, %s6382_s26  ;;  %p6390_p12 = scmp.lt.s32.totalorder %s534_s2, %s534_s2 }
  0x23   : > { %p6885_p7 = pnand %p6082_p6, %p8005_p1  ;;  %p6391_p13 = scmp.lt.s32.totalorder %s6382_s26, %s6382_s26 }
  0x25   : > { %p6892_p8 = pneg %p6885_p7  ;;  %p6392_p0 = por %p6391_p13, %p6390_p12 }
  0x27   : > { %p6385_p10 = pnand %p6383_p9, %p6892_p8 }
  0x29   : > { %p6386_p11 = pneg %p6385_p10 }
  0x2b   : > { %p6393_p2 = pnand %p6392_p0, %p6386_p11 }
  0x2d   : > { %6396 = shalt.err (!%p6393_p2)
}
  0x2e   : > { %s8000_s27 = smov 64   ;;  %s8002_s22 = smov 4  }
  0x2f   : > { %s8038_s17 = sld [smem:[#allocation27_spill]]  ;;  %p42_p3 = scmp.ge.s32.totalorder %s41_s24, 2 }
  0x30   : > { %s140_s15 = sadd.s32 1, %s6695_s29  ;;  %p147_p6 = scmp.ne.s32.totalorder %s6695_s29, %s6691_s28 }
  0x31   : > { %p148_p9 = scmp.eq.s32.totalorder %s6707_s19, 0  ;;  %s8091_s24 = smov (%p42_p3, %s41_s24), 0 }
  0x32   : > { %8039 = sst [smem:[#allocation25_spill]] %s8091_s24  ;;  %p6116_p11 = scmp.lt.s32.totalorder %s6707_s19, 2 }
  0x33   : > { %p149_p10 = por %p148_p9, %p147_p6  ;;  %s137_s14 = ssub.s32 %s6703_s0, %s8091_s24 }
  0x34   : > { %s598_s13 = sand.u32 1, %s6707_s19   ;;  %p138_p12 = scmp.eq.s32.totalorder %s137_s14, 0 }
  0x35   : > { %6085 = dma.hbm_to_vmem [thread:$0]  (!%p6885_p7), %s8038_s17, 128, %s534_s2, [#allocation4], %s8000_s27, %s8000_s27, %s8002_s22  }
  0x36   : > { %s6917_s11 = sand.u32 1, %s6695_s29   ;;  %s6047_s5 = smul.u32 3072, %s6703_s0 }
  0x37   : > { %s6921_s9 = scalar_select %p138_p12, %s6695_s29, %s140_s15  }
  0x38   : > { %s6046_s18 = smul.u32 192, %s6917_s11  ;;  %s8041_s4 = sld [smem:[#allocation31_spill]] }
  0x39   : > { %8040 = sst [smem:[#allocation26_spill]] %s6921_s9  ;;  %p6927_p13 = pnand %p6116_p11, %p149_p10 }
  0x3a   : > { %s602_s22 = scalar_lea.vmem [#allocation11], %s6046_s18  ;;  %s6931_s14 = scalar_lea.sflag [#allocation4], %s598_s13 }
  0x3b   : > { %s8042_s27 = scalar_select %p6927_p13, 1, 0 }
  0x3c   : > { %s609_s24 = sshll.u32 %s602_s22, 4  ;;  %p8009_p0 = pneg %p6927_p13  ;;  %s610_s24 = int_to_ptr.vmem [resolvable:$true] %s609_s24 }
  0x3d   : > { %s6410_s15 = scalar_lea.vmem %s610_s24, 3072 }
  0x3e   : > { %s608_s26 = scalar_lea.hbm %s8041_s4, %s6047_s5  ;;  %p6411_p2 = scmp.ne.s32.totalorder %s610_s24, %s6410_s15 }
  0x3f   : > { %s6712_s5 = smov [#allocation11]  }
  0x40   : > { %p6413_p3 = pnand %p6411_p2, %p8009_p0  ;;  %s6415_s17 = sshll.u32 %s6712_s5, 4  ;;  %s6416_s17 = int_to_ptr.vmem [resolvable:$false] %s6415_s17 }
  0x41   : > { %s6417_s2 = scalar_lea.vmem %s6416_s17, 6144  ;;  %p6418_p9 = scmp.lt.s32.totalorder %s610_s24, %s6416_s17 }
  0x42   : > { %p6414_p6 = pneg %p6413_p3  ;;  %p6419_p10 = scmp.lt.s32.totalorder %s6417_s2, %s6410_s15 }
  0x44   : > { %p6420_p11 = por %p6419_p10, %p6418_p9 }
  0x46   : > { %p6421_p12 = pnand %p6420_p11, %p6414_p6 }
  0x48   : > { %6424 = shalt.err (!%p6421_p12)
}
  0x49   : > { %s6713_s22 = smov 192   ;;  %s6714_s13 = smov 12  }
  0x4a   : > { %6101 = dma.hbm_to_vmem [thread:$0]  (!%p6927_p13), %s608_s26, 3072, %s610_s24, %s6931_s14, %s6713_s22, %s6713_s22, %s6714_s13  }
  0x4b   : > { %s6715_s18 = smov [#allocation6]   ;;  %s5431_s9 = sshll.u32 %s6917_s11, 6 }
  0x4c   : > { %s547_s4 = sshll.u32 %s6715_s18, 4  ;;  %s548_s4 = int_to_ptr.vmem [resolvable:$true] %s547_s4 }
  0x4d   : > { %s6436_s5 = scalar_lea.vmem %s548_s4, 128  ;;  %p6444_p9 = scmp.lt.s32.totalorder %s548_s4, %s548_s4 }
  0x4e   : > { %p6437_p2 = scmp.ne.s32.totalorder %s548_s4, %s6436_s5  ;;  %p6445_p6 = scmp.lt.s32.totalorder %s6436_s5, %s6436_s5 }
  0x50   : > { %p6439_p3 = pnand %p6437_p2, %p6892_p8  ;;  %p6446_p10 = por %p6445_p6, %p6444_p9 }
  0x52   : > { %p6440_p1 = pneg %p6439_p3 }
  0x54   : > { %p6447_p11 = pnand %p6446_p10, %p6440_p1 }
  0x56   : > { %6450 = shalt.err (!%p6447_p11)
}
  0x57   : > { %s8043_s2 = sld [smem:[#allocation28_spill]]  ;;  %s5649_s24 = sshll.u32 %s6703_s0, 10 }
  0x58   : > { %s630_s26 = scalar_lea.vmem [#allocation12], %s5431_s9  ;;  %s8044_s6 = sld [smem:[#allocation33_spill]] }
  0x59   : > { %s637_s22 = sshll.u32 %s630_s26, 4  ;;  %s6716_s19 = smov [#allocation12]   ;;  %s638_s22 = int_to_ptr.vmem [resolvable:$true] %s637_s22 }
  0x5a   : > { %s6464_s5 = scalar_lea.vmem %s638_s22, 1024  ;;  %s6469_s8 = sshll.u32 %s6716_s19, 4  ;;  %s6470_s8 = int_to_ptr.vmem [resolvable:$false] %s6469_s8 }
  0x5b   : > { %p6465_p12 = scmp.ne.s32.totalorder %s638_s22, %s6464_s5  ;;  %s6471_s15 = scalar_lea.vmem %s6470_s8, 2048 }
  0x5c   : > { %p6472_p3 = scmp.lt.s32.totalorder %s638_s22, %s6470_s8  ;;  %p6473_p9 = scmp.lt.s32.totalorder %s6471_s15, %s6464_s5 }
  0x5d   : > { %6088 = dma.hbm_to_vmem [thread:$0]  (!%p6885_p7), %s8043_s2, 128, %s548_s4, [#allocation7]  }
  0x5e   : > { %s636_s29 = scalar_lea.hbm %s8044_s6, %s5649_s24  ;;  %p6467_p1 = pnand %p6465_p12, %p8009_p0 }
  0x5f   : > { %p6474_p6 = por %p6473_p9, %p6472_p3 }
  0x60   : > { %p6468_p2 = pneg %p6467_p1 }
  0x62   : > { %p6475_p10 = pnand %p6474_p6, %p6468_p2 }
  0x64   : > { %6478 = shalt.err (!%p6475_p10)
}
  0x65   : > { %s8045_s4 = smov 4   ;;  %s8046_s9 = smov 64  }
  0x66   : > { %6104 = dma.hbm_to_vmem [thread:$0]  (!%p6927_p13), %s636_s29, 1024, %s638_s22, %s6931_s14, %s8046_s9, %s8046_s9, %s8045_s4  }
  0x67   : > { %s8008_s17 = sshll.u32 %s6917_s11, 7  ;;  %s6717_s2 = smov [#allocation8]  }
  0x68   : > { %s557_s19 = sshll.u32 %s6717_s2, 4  ;;  %s5650_s24 = sshll.u32 %s6703_s0, 11  ;;  %s558_s19 = int_to_ptr.vmem [resolvable:$true] %s557_s19 }
  0x69   : > { %s6490_s8 = scalar_lea.vmem %s558_s19, 1024  ;;  %p6498_p2 = scmp.lt.s32.totalorder %s558_s19, %s558_s19 }
  0x6a   : > { %p6491_p11 = scmp.ne.s32.totalorder %s558_s19, %s6490_s8  ;;  %p6499_p3 = scmp.lt.s32.totalorder %s6490_s8, %s6490_s8 }
  0x6c   : > { %p6493_p12 = pnand %p6491_p11, %p6892_p8  ;;  %p6500_p9 = por %p6499_p3, %p6498_p2 }
  0x6e   : > { %p6494_p1 = pneg %p6493_p12 }
  0x70   : > { %p6501_p6 = pnand %p6500_p9, %p6494_p1 }
  0x72   : > { %6504 = shalt.err (!%p6501_p6)
}
  0x73   : > { %s8047_s22 = sld [smem:[#allocation29_spill]]  ;;  %s669_s15 = scalar_lea.vmem [#allocation13], %s8008_s17 }
  0x74   : > { %s8048_s10 = sld [smem:[#allocation36_spill]]  ;;  %s676_s2 = sshll.u32 %s669_s15, 4  ;;  %s677_s2 = int_to_ptr.vmem [resolvable:$true] %s676_s2 }
  0x75   : > { %s6518_s8 = scalar_lea.vmem %s677_s2, 2048  ;;  %s6718_s29 = smov [#allocation13]  }
  0x76   : > { %p6519_p10 = scmp.ne.s32.totalorder %s677_s2, %s6518_s8  ;;  %s6523_s26 = sshll.u32 %s6718_s29, 4  ;;  %s6524_s26 = int_to_ptr.vmem [resolvable:$false] %s6523_s26 }
  0x77   : > { %s6525_s6 = scalar_lea.vmem %s6524_s26, 4096  ;;  %p6526_p1 = scmp.lt.s32.totalorder %s677_s2, %s6524_s26 }
  0x78   : > { %p6521_p11 = pnand %p6519_p10, %p8009_p0  ;;  %p6527_p2 = scmp.lt.s32.totalorder %s6525_s6, %s6518_s8 }
  0x79   : > { %6091 = dma.hbm_to_vmem [thread:$0]  (!%p6885_p7), %s8047_s22, 1024, %s558_s19, [#allocation7], %s8046_s9, %s8046_s9, %s8045_s4  }
  0x7a   : > { %s675_s5 = scalar_lea.hbm %s8048_s10, %s5650_s24  ;;  %p6522_p12 = pneg %p6521_p11 }
  0x7b   : > { %p6528_p3 = por %p6527_p2, %p6526_p1 }
  0x7d   : > { %p6529_p9 = pnand %p6528_p3, %p6522_p12 }
  0x7f   : > { %6532 = shalt.err (!%p6529_p9)
}
  0x80   : > { %s6719_s19 = smov 128   ;;  %s6720_s22 = smov 8  }
  0x81   : > { %6107 = dma.hbm_to_vmem [thread:$0]  (!%p6927_p13), %s675_s5, 2048, %s677_s2, %s6931_s14, %s6719_s19, %s6719_s19, %s6720_s22  }
  0x82   : > { %s6721_s13 = smov [#allocation9]   ;;  %s6722_s15 = smov [#allocation15]  }
  0x83   : > { %s571_s18 = sshll.u32 %s6721_s13, 4  ;;  %s581_s17 = sshll.u32 %s6722_s15, 4  ;;  %s572_s18 = int_to_ptr.vmem [resolvable:$true] %s571_s18  ;;  %s582_s17 = int_to_ptr.vmem [resolvable:$true] %s581_s17 }
  0x84   : > { %s6544_s29 = scalar_lea.vmem %s572_s18, 16  ;;  %s6551_s6 = scalar_lea.vmem %s572_s18, 32 }
  0x85   : > { %p6545_p6 = scmp.ne.s32.totalorder %s572_s18, %s6544_s29  ;;  %p6552_p12 = scmp.lt.s32.totalorder %s572_s18, %s572_s18 }
  0x86   : > { %p6553_p1 = scmp.lt.s32.totalorder %s6551_s6, %s6544_s29 }
  0x87   : > { %p6547_p10 = pnand %p6545_p6, %p6892_p8 }
  0x88   : > { %p6554_p2 = por %p6553_p1, %p6552_p12 }
  0x89   : > { %p6548_p11 = pneg %p6547_p10 }
  0x8b   : > { %p6555_p3 = pnand %p6554_p2, %p6548_p11 }
  0x8d   : > { %6558 = shalt.err (!%p6555_p3)
}
  0x8e   : > { %s8049_s3 = sld [smem:[#allocation30_spill]]  ;;  %s6570_s2 = scalar_lea.vmem %s582_s17, 1024 }
  0x8f   : > { %p6571_p9 = scmp.ne.s32.totalorder %s582_s17, %s6570_s2  ;;  %p6578_p10 = scmp.lt.s32.totalorder %s582_s17, %s582_s17 }
  0x90   : > { %p6579_p4 = scmp.lt.s32.totalorder %s6570_s2, %s6570_s2 }
  0x91   : > { %p6573_p0 = pnand %p6571_p9, %p6892_p8 }
  0x92   : > { %p6580_p5 = por %p6579_p4, %p6578_p10 }
  0x93   : > { %p6574_p6 = pneg %p6573_p0 }
  0x94   : > { %6094 = dma.hbm_to_vmem [thread:$0]  (!%p6885_p7), %s8049_s3, 16, %s572_s18, [#allocation10]  }
  0x95   : > { %p6581_p13 = pnand %p6580_p5, %p6574_p6 }
  0x97   : > { %6584 = shalt.err (!%p6581_p13)
}
  0x98   : > { %s8050_s16 = sld [smem:[#allocation42_spill]]  ;;  %s8052_s18 = sshll.u32 %s6917_s11, 7 }
  0x99   : > { %s8051_s12 = sld [smem:[#allocation38_spill]]  ;;  %s697_s15 = scalar_lea.vmem [#allocation14], %s8052_s18 }
  0x9a   : > { %s704_s29 = sshll.u32 %s697_s15, 4  ;;  %p8053_p5 = scmp.ne.s32.totalorder %s8042_s27, 0  ;;  %s705_s29 = int_to_ptr.vmem [resolvable:$true] %s704_s29 }
  0x9b   : > { %s6598_s23 = scalar_lea.vmem %s705_s29, 2048  ;;  %s6723_s6 = smov [#allocation14]  }
  0x9c   : > { %p6599_p4 = scmp.ne.s32.totalorder %s705_s29, %s6598_s23  ;;  %p8054_p8 = pneg %p8053_p5 }
  0x9d   : > { %s6603_s8 = sshll.u32 %s6723_s6, 4  ;;  %s6604_s8 = int_to_ptr.vmem [resolvable:$false] %s6603_s8 }
  0x9e   : > { %6097 = dma.hbm_to_vmem [thread:$0]  (!%p6885_p7), %s8050_s16, 1024, %s582_s17, [#allocation7], %s8046_s9, %s8046_s9, %s8045_s4  }
  0x9f   : > { %s703_s13 = scalar_lea.hbm %s8051_s12, %s5650_s24  ;;  %p6601_p13 = pnand %p6599_p4, %p8054_p8 }
  0xa0   : > { %s6605_s5 = scalar_lea.vmem %s6604_s8, 4096  ;;  %p6606_p7 = scmp.lt.s32.totalorder %s705_s29, %s6604_s8 }
  0xa1   : > { %p6602_p0 = pneg %p6601_p13  ;;  %p6607_p11 = scmp.lt.s32.totalorder %s6605_s5, %s6598_s23 }
  0xa3   : > { %p6608_p12 = por %p6607_p11, %p6606_p7 }
  0xa5   : > { %p6609_p1 = pnand %p6608_p12, %p6602_p0 }
  0xa7   : > { %6612 = shalt.err (!%p6609_p1)
}
  0xa8   : > { %6110 = dma.hbm_to_vmem [thread:$0]  (!%p8053_p5), %s703_s13, 2048, %s705_s29, %s6931_s14, %s8046_s9, %s8046_s9, %s8045_s4  }
  0xa9   : > { %p8055_p2 = scmp.ne.s32.totalorder %s8035_s21, 0 }
  0xaa   : > { %p8056_p3 = scmp.eq.s32.totalorder (!%p8055_p2), %s6865_s1, 0 }
  0xab   : > { %734 = sbr.rel (%p8055_p2) target bundleno = 3035 (0xbdb), region = 92 }
  0xb0   : > { %6662 = dma.done.wait (%p8056_p3), [#allocation4], 128   ;;  %p8057_p9 = pmov %p8056_p3 }
  0xb1   : > { %p8058_p6 = pmov %p8056_p3 }
  0xb2   : > { %6664 = vsyncadd (%p8057_p9), [#allocation4], 4294967168 }
  0xb3   : > { %6666 = dma.done.wait (%p8058_p6), [#allocation7], 1152   ;;  %p8059_p10 = pmov %p8056_p3 }
  0xb4   : > { %p8060_p4 = pmov %p8056_p3 }
  0xb5   : > { %6668 = vsyncadd (%p8059_p10), [#allocation7], 4294966144 }
  0xb6   : > { %6670 = dma.done.wait (%p8060_p4), [#allocation10], 16   ;;  %p8061_p5 = pmov %p8056_p3 }
  0xb7   : > { %s752_s11 = sand.u32 1, %s6865_s1   ;;  %s754_s21 = sand.u32 1, %s6691_s28  }
  0xb8   : > { %6672 = vsyncadd (%p8061_p5), [#allocation10], 4294967280  ;;  %s6048_s27 = smul.u32 192, %s754_s21  ;;  %s753_s14 = scalar_lea.sflag [#allocation4], %s752_s11 }
  0xb9   : > { %p8062_p8 = scmp.ne.s32.totalorder %s8034_s20, 0 }
  0xba   : > { %s7036_s4 = scalar_lea.vmem [#allocation11], %s6048_s27 }
  0xbb   : > { %6674 = dma.done.wait (%p8062_p8), %s753_s14, 8192  }
  0xbc   : > { %6676 = vsyncadd (%p8062_p8), %s753_s14, 4294959104  ;;  %s5445_s9 = sshll.u32 %s754_s21, 6  ;;  %s5446_s17 = sshll.u32 %s754_s21, 7 }
  0xbd   : > { %s7042_s24 = scalar_lea.vmem [#allocation12], %s5445_s9  ;;  %s7044_s2 = scalar_lea.vmem [#allocation13], %s5446_s17 }
  0xbe   : > { %s7046_s26 = scalar_lea.vmem [#allocation14], %s5446_s17  ;;  %p8063_p13 = pmov %p8056_p3 }
  0xbf   : > { %p8064_p0 = pmov %p8056_p3 }
  0xc0   : > { %6678 = dma.done.wait (%p8063_p13), [#allocation7], 1024  }
  0xc1   : > { %6680 = vsyncadd (%p8064_p0), [#allocation7], 4294966272  ;;  %p877_p7 = scmp.lt.s32.totalorder %s6699_s30, 1  ;;  %s8067_s14 = sld [smem:[#allocation32_spill]] }
  0xc2   : > { %s8068_s12 = sld [smem:[#allocation37_spill]]  ;;  %p5450_p11 = scmp.ne.s32.totalorder %s6699_s30, 0 }
  0xc3   : > { %s7054_s19 = scalar_select %p877_p7, %s6699_s30, 1 }
  0xc4   : > { %s8069_s13 = sld [smem:[#allocation39_spill]] }
  0xc5   : > { %s6049_s20 = smul.u32 3, %s7054_s19  ;;  %s5449_s17 = sshll.u32 %s7054_s19, 1 }
  0xc6   : > { %s8070_s23 = sld [smem:[#allocation40_spill]] }
  0xc7   : > { %s7072_s9 = scalar_lea.vmem %s8067_s14, %s6049_s20  ;;  %s8071_s11 = sld [smem:[#allocation41_spill]] }
  0xc8   : > { %s7078_s16 = scalar_lea.vmem %s8068_s12, %s5449_s17 }
  0xc9   : > { %907 = sbr.rel (%p5450_p11) target bundleno = 441 (0x1b9), region = 132 }
  0xca   : > { %s896_s18 = scalar_lea.vmem %s8069_s13, %s7054_s19 }
  0xcc   : > { %s899_s6 = scalar_lea.vmem %s8070_s23, %s7054_s19 }
  0xcd   : > { %s902_s21 = scalar_lea.vmem %s8071_s11, %s7054_s19 }
  0xce   : > { %v6200_v0 = vld [vmem:[#allocation8 + $0x38] sm:$0xff]   ;;  %v6724_v1 = vmov 0.0   ;;  %v6201_v2 = vld [vmem:[#allocation8 + $0x30] sm:$0xff]   ;;  %vm6725_vm0 = vmmov 0   ;;  %v6202_v3 = vld [vmem:[#allocation8 + $0x28] sm:$0xff]  }
  0xcf   : > { %5774 = vmatprep.subr.bf16.mxu0 %v6724_v1  ;;  %5790 = vmatprep.mubr.msk.bf16.mxu0 %vm6725_vm0, %v6724_v1  ;;  %v6203_v4 = vld [vmem:[#allocation8 + $0x20] sm:$0xff]   ;;  %v6204_v5 = vld [vmem:[#allocation8 + $0x18] sm:$0xff]   ;;  %v6205_v6 = vld [vmem:[#allocation8 + $0x10] sm:$0xff]  }
  0xd0   : > { %5775 = vmatpush3.bf16.msra.mxu0 %v6200_v0  ;;  %v6206_v7 = vld [vmem:[#allocation8 + $0x8] sm:$0xff]   ;;  %v6207_v8 = vld [vmem:[#allocation8] sm:$0xff]   ;;  %v6208_v9 = vld [vmem:[#allocation3] sm:$0xff]  }
  0xd1   : > { %5776 = vmatprep.subr.bf16.mxu0 %v6724_v1  ;;  %v5451_v10 = vld [vmem:[#allocation9] ss:$0 sm:$0xff]  ;;  %v1028_v12 = vld [vmem:[#allocation6] sm:$0xff] }
  0xd4   : > { %5777 = vmatpush3.bf16.msra.mxu0 %v6201_v2 }
  0xd5   : > { %5778 = vmatprep.subr.bf16.mxu0 %v6724_v1 }
  0xd8   : > { %5779 = vmatpush3.bf16.msra.mxu0 %v6202_v3 }
  0xd9   : > { %5780 = vmatprep.subr.bf16.mxu0 %v6724_v1 }
  0xdc   : > { %5781 = vmatpush3.bf16.msra.mxu0 %v6203_v4 }
  0xdd   : > { %5782 = vmatprep.subr.bf16.mxu0 %v6724_v1 }
  0xe0   : > { %5783 = vmatpush3.bf16.msra.mxu0 %v6204_v5 }
  0xe1   : > { %5784 = vmatprep.subr.bf16.mxu0 %v6724_v1 }
  0xe4   : > { %5785 = vmatpush3.bf16.msra.mxu0 %v6205_v6 }
  0xe5   : > { %5786 = vmatprep.subr.bf16.mxu0 %v6724_v1 }
  0xe8   : > { %5787 = vmatpush3.bf16.msra.mxu0 %v6206_v7 }
  0xe9   : > { %5788 = vmatprep.subr.bf16.mxu0 %v6724_v1 }
  0xec   : > { %5789 = vmatpush3.bf16.msra.mxu0 %v6207_v8 }
  0xef   : > { %5791 = vmatmul.mubr.bf16.vlgmr.msra.gmra.mxu0 %v6208_v9 }
 0x1af   : > { %v1021_v11 = vpop.f32.mrf.mxu0 }
 0x1b0   : > { %v1022_v13 = vadd.f32 %v5451_v10, %v1021_v11 }
 0x1b1   : > { %v5792_v14 = vpop.f32.mrf.mxu0 }
 0x1b2   : > { %v1029_v15 = vadd.f32 %v1028_v12, %v1022_v13 }
 0x1b3   : > { %v1024_v16 = vpop.f32.mrf.mxu0 }
 0x1b4   : > { %1031 = vst [vmem:[#allocation2] sm:$0xff] %v1029_v15  ;;  %v1025_v17 = vadd.f32 %v5451_v10, %v1024_v16 }
 0x1b5   : > { %v5793_v18 = vpop.f32.mrf.mxu0 }
 0x1b6   : > { %v1030_v19 = vadd.f32 %v1028_v12, %v1025_v17 }
 0x1b8   : > { %1032 = vst [vmem:[#allocation2 + $0x8] sm:$0xff] %v1030_v19 }
 0x1b9 PF: > { %v6209_v20 = vld [vmem:[%s7036_s4 + $0xac] ss:$12 sps:$4 sm:$0xff]   ;;  %v6211_v21 = vld [vmem:[%s7036_s4 + $0xa8] ss:$12 sps:$4 sm:$0xff]   ;;  %v6726_v22 = vmov 0   ;;  %v6727_v41 = vmov 0.0   ;;  %v1070_v49 = vlaneseq  ;;  %s8072_s27 = scalar_lea.vmem %s7988_s7, %s7054_s19 }
 0x1ba   : > { %1245 = vmatprep.mubr.bf16.mxu0 %v6726_v22  ;;  %1213 = vmatprep.subr.bf16.mxu0 %v6209_v20  ;;  %v6212_v23 = vld [vmem:[%s7036_s4 + $0x94] ss:$12 sps:$4 sm:$0xff]   ;;  %v6214_v24 = vld [vmem:[%s7036_s4 + $0x90] ss:$12 sps:$4 sm:$0xff]   ;;  %v6217_v26 = vld [vmem:[%s7036_s4 + $0x78] ss:$12 sps:$4 sm:$0xff]  }
 0x1bb   : > { %1214 = vmatpush1.bf16.msra.mxu0 %v6211_v21  ;;  %v6215_v25 = vld [vmem:[%s7036_s4 + $0x7c] ss:$12 sps:$4 sm:$0xff]   ;;  %v6218_v27 = vld [vmem:[%s7036_s4 + $0x64] ss:$12 sps:$4 sm:$0xff]   ;;  %v6220_v28 = vld [vmem:[%s7036_s4 + $0x60] ss:$12 sps:$4 sm:$0xff]   ;;  %5794 = vmatprep.subr.bf16.mxu1 %v6727_v41 }
 0x1bc   : > { %1215 = vmatprep.subr.bf16.mxu0 %v6212_v23  ;;  %v6221_v29 = vld [vmem:[%s7036_s4 + $0x4c] ss:$12 sps:$4 sm:$0xff]   ;;  %v6223_v30 = vld [vmem:[%s7036_s4 + $0x48] ss:$12 sps:$4 sm:$0xff]   ;;  %v6226_v32 = vld [vmem:[%s7036_s4 + $0x30] ss:$12 sps:$4 sm:$0xff]  }
 0x1bd   : > { %v6224_v31 = vld [vmem:[%s7036_s4 + $0x34] ss:$12 sps:$4 sm:$0xff]   ;;  %v6227_v33 = vld [vmem:[%s7036_s4 + $0x1c] ss:$12 sps:$4 sm:$0xff]   ;;  %v6229_v34 = vld [vmem:[%s7036_s4 + $0x18] ss:$12 sps:$4 sm:$0xff]  }
 0x1be   : > { %v6230_v35 = vld [vmem:[%s7036_s4 + $0x4] ss:$12 sps:$4 sm:$0xff]   ;;  %v6232_v36 = vld [vmem:[%s7036_s4] ss:$12 sps:$4 sm:$0xff]   ;;  %v6236_v44 = vld [vmem:[%s7036_s4 + $0x68] ss:$12 sps:$4 sm:$0xff]  }
 0x1bf   : > { %1216 = vmatpush1.bf16.msra.mxu0 %v6214_v24  ;;  %v1033_v37 = vld [vmem:[#allocation2] sm:$0xff]  ;;  %v1034_v38 = vld [vmem:[#allocation2 + $0x8] sm:$0xff]  ;;  %vm6728_vm1 = vmmov 0   ;;  %v7134_v50 = vshrl.u32 %v1070_v49, 7  ;;  %s6729_s3 = smov 96   ;;  %s6730_s10 = smov 112  }
 0x1c0   : > { %1217 = vmatprep.subr.bf16.mxu0 %v6215_v25  ;;  %v1035_v39 = vpack.c.bf16 %v1034_v38, %v1033_v37  ;;  %v6233_v40 = vld [vmem:[%s7036_s4 + $0xb0] ss:$12 sps:$4 sm:$0xff]   ;;  %v6234_v42 = vld [vmem:[%s7036_s4 + $0x98] ss:$12 sps:$4 sm:$0xff]   ;;  %v6235_v43 = vld [vmem:[%s7036_s4 + $0x80] ss:$12 sps:$4 sm:$0xff]   ;;  %5810 = vmatprep.mubr.msk.bf16.mxu1 %vm6728_vm1, %v6727_v41 }
 0x1c1   : > { %5795 = vmatpush3.bf16.msra.mxu1 %v6233_v40  ;;  %v6237_v45 = vld [vmem:[%s7036_s4 + $0x50] ss:$12 sps:$4 sm:$0xff]   ;;  %v6238_v46 = vld [vmem:[%s7036_s4 + $0x38] ss:$12 sps:$4 sm:$0xff]   ;;  %v6239_v47 = vld [vmem:[%s7036_s4 + $0x20] ss:$12 sps:$4 sm:$0xff]  }
 0x1c2   : > { %5796 = vmatprep.subr.bf16.mxu1 %v6727_v41  ;;  %v6240_v48 = vld [vmem:[%s7036_s4 + $0x8] ss:$12 sps:$4 sm:$0xff]   ;;  %v1072_v51 = vsub.s32 0, %v7134_v50  ;;  %v1068_v52 = vld [vmem:[%s7072_s9] sm:$0x7]  ;;  %v1076_v55 = vsub.s32 1, %v7134_v50 }
 0x1c3   : > { %1218 = vmatpush1.bf16.msra.mxu0 %v6217_v26  ;;  %s6731_s12 = smov 80   ;;  %s6732_s4 = smov 48   ;;  %v1080_v2 = vsub.s32 2, %v7134_v50  ;;  %v6736_v15 = vmov 1983009808   ;;  %vm2425_vm2 = vcmask 130048  }
 0x1c4   : > { %1219 = vmatprep.subr.bf16.mxu0 %v6218_v27  ;;  %v1073_v54 = vrot.slane %v1068_v52, %v1072_v51  ;;  %v1077_v59 = vrot.slane %v1068_v52, %v1076_v55  ;;  %s6733_s20 = smov 64   ;;  %s6734_s13 = smov 16   ;;  %v1444_v16 = vunpack.c.l.s4 %v6736_v15  ;;  %v6737_v17 = vmov 1934713408  }
 0x1c5   : > { %5797 = vmatpush3.bf16.msra.mxu1 %v6234_v42  ;;  %s6735_s23 = smov 32   ;;  %v1081_v5 = vrot.slane %v1068_v52, %v1080_v2  ;;  %v1508_v18 = vunpack.c.l.s4 %v6737_v17  ;;  %vm3178_vm3 = vcmask 64512   ;;  %vm3374_vm4 = vcmask 1043456   ;;  %s8073_s9 = sld [smem:[#allocation34_spill]] }
 0x1c6   : > { %5798 = vmatprep.subr.bf16.mxu1 %v6727_v41  ;;  %v1445_v21 = vunpack.c.0.s8 %v1444_v16  ;;  %vm4461_vm5 = vcmask 261120   ;;  %vm4464_vm6 = vcmask 392192   ;;  %vm4467_vm7 = vcmask 523264   ;;  %s8075_s15 = sld [smem:[#allocation35_spill]]  ;;  %p5635_p12 = scmp.ne.s32.totalorder %s6699_s30, 1 }
 0x1c7   : > { %1220 = vmatpush1.bf16.msra.mxu0 %v6220_v28  ;;  %v1509_v23 = vunpack.c.0.s8 %v1508_v18  ;;  %vm4470_vm8 = vcmask 654336   ;;  %vm4473_vm9 = vcmask 785408   ;;  %vm4476_vm10 = vcmask 916480  }
 0x1c8   : > { %1221 = vmatprep.subr.bf16.mxu0 %v6221_v29 }
 0x1c9   : > { %5799 = vmatpush3.bf16.msra.mxu1 %v6235_v43 }
 0x1ca   : > { %5800 = vmatprep.subr.bf16.mxu1 %v6727_v41 }
 0x1cb   : > { %1222 = vmatpush1.bf16.msra.mxu0 %v6223_v30  ;;  %s8074_s17 = scalar_lea.vmem %s8073_s9, %s7054_s19 }
 0x1cc   : > { %1223 = vmatprep.subr.bf16.mxu0 %v6224_v31  ;;  %s8076_s29 = scalar_lea.vmem %s8075_s15, %s7054_s19 }
 0x1cd   : > { %5801 = vmatpush3.bf16.msra.mxu1 %v6236_v44 }
 0x1ce   : > { %5802 = vmatprep.subr.bf16.mxu1 %v6727_v41 }
 0x1cf   : > { %1224 = vmatpush1.bf16.msra.mxu0 %v6226_v32 }
 0x1d0   : > { %1225 = vmatprep.subr.bf16.mxu0 %v6227_v33 }
 0x1d1   : > { %5803 = vmatpush3.bf16.msra.mxu1 %v6237_v45 }
 0x1d2   : > { %5804 = vmatprep.subr.bf16.mxu1 %v6727_v41 }
 0x1d3   : > { %1226 = vmatpush1.bf16.msra.mxu0 %v6229_v34 }
 0x1d4   : > { %1227 = vmatprep.subr.bf16.mxu0 %v6230_v35  ;;  %v7180_v35 = vsub.s32 %v1445_v21, %v7134_v50 }
 0x1d5   : > { %5805 = vmatpush3.bf16.msra.mxu1 %v6238_v46 }
 0x1d6   : > { %5806 = vmatprep.subr.bf16.mxu1 %v6727_v41 }
 0x1d7   : > { %1228 = vmatpush1.bf16.msra.mxu0 %v6232_v36  ;;  %v7183_v36 = vsub.s32 %v1509_v23, %v7134_v50  ;;  %v5616_v50 = vld [vmem:[%s896_s18] ss:$0 sm:$0xff] }
 0x1d8   : > { %5838 = vmatprep.subr.bf16.mxu0 %v6727_v41 }
 0x1d9   : > { %5807 = vmatpush3.bf16.msra.mxu1 %v6239_v47 }
 0x1da   : > { %1246 = vmatmul.mubr.bf16.vlgmr.msra.gmra.mxu0 %v1035_v39  ;;  %5808 = vmatprep.subr.bf16.mxu1 %v6727_v41 }
 0x1db   : > { %5840 = vmatprep.mubr.msk.bf16.mxu0 %vm6728_vm1, %v6727_v41 }
 0x1dd   : > { %5809 = vmatpush3.bf16.msra.mxu1 %v6240_v48 }
 0x1de   : > { %5814 = vmatprep.subr.bf16.mxu1 %v6727_v41 }
 0x1e0   : > { %5811 = vmatmul.mubr.bf16.vlgmr.msra.gmra.mxu1 %v1035_v39 }
 0x1e1   : > { %5816 = vmatprep.mubr.msk.bf16.mxu1 %vm6728_vm1, %v6727_v41 }
 0x29a   : > { %v1247_v53 = vpop.f32.mrf.mxu0 }
 0x29b   : > { %v1248_v58 = vadd.f32 %v1247_v53, %v1073_v54 }
 0x29c   : > { %v1249_v56 = vpop.f32.mrf.mxu0 }
 0x29d   : > { %v1250_v0 = vadd.f32 %v1249_v56, %v1077_v59 }
 0x29e   : > { %v1251_v57 = vpop.f32.mrf.mxu0 }
 0x29f   : > { %v1252_v60 = vadd.f32 %v1251_v57, %v1073_v54 }
 0x2a0   : > { %v1253_v61 = vpop.f32.mrf.mxu0  ;;  %v1290_v3 = vpop.f32.mrf.mxu1 }
 0x2a1   : > { %v7143_v62 = vpack.c.bf16 %v1252_v60, %v1248_v58  ;;  %v1254_v63 = vadd.f32 %v1253_v61, %v1077_v59  ;;  %v1291_v6 = vadd.f32 %v1290_v3, %v1081_v5 }
 0x2a2   : > { %v5812_v4 = vpop.f32.mrf.mxu1 }
 0x2a3   : > { %1303 = vrot.lane.b32.xlu0 %v7143_v62, %s6729_s3  ;;  %1301 = vrot.lane.b32.xlu1 %v7143_v62, %s6730_s10  ;;  %v1298_v1 = vpack.c.bf16 %v1254_v63, %v1250_v0  ;;  %v1349_v37 = vshrl.u32 %v7143_v62, 16 }
 0x2a4   : > { %v1293_v7 = vpop.f32.mrf.mxu1 }
 0x2a5   : > { %v1294_v8 = vadd.f32 %v1293_v7, %v1081_v5  ;;  %v1381_v31 = vshrl.u32 %v1298_v1, 16 }
 0x2a6   : > { %v5813_v9 = vpop.f32.mrf.mxu1 }
 0x2a7   : > { %1316 = vrot.lane.b32.xlu0 %v1298_v1, %s6730_s10  ;;  %1305 = vrot.lane.b32.xlu1 %v7143_v62, %s6731_s12  ;;  %v7167_v10 = vpack.c.bf16 %v1294_v8, %v1291_v6 }
 0x2ab   : > { %1318 = vrot.lane.b32.xlu0 %v1298_v1, %s6729_s3  ;;  %1320 = vrot.lane.b32.xlu1 %v1298_v1, %s6731_s12 }
 0x2af   : > { %1324 = vrot.lane.b32.xlu0 %v1298_v1, %s6732_s4  ;;  %1322 = vrot.lane.b32.xlu1 %v1298_v1, %s6733_s20 }
 0x2b3   : > { %1328 = vrot.lane.b32.xlu0 %v1298_v1, %s6734_s13  ;;  %1326 = vrot.lane.b32.xlu1 %v1298_v1, %s6735_s23 }
 0x2b7   : > { %1307 = vrot.lane.b32.xlu0 %v7143_v62, %s6733_s20  ;;  %1309 = vrot.lane.b32.xlu1 %v7143_v62, %s6732_s4 }
 0x2bb   : > { %1311 = vrot.lane.b32.xlu0 %v7143_v62, %s6735_s23  ;;  %1313 = vrot.lane.b32.xlu1 %v7143_v62, %s6734_s13 }
 0x2bf   : > { %1331 = vrot.lane.b32.xlu1 %v7167_v10, %s6730_s10  ;;  %1333 = vrot.lane.b32.xlu0 %v7167_v10, %s6729_s3 }
 0x2c3   : > { %1335 = vrot.lane.b32.xlu1 %v7167_v10, %s6731_s12 }
 0x315   : > { %v7169_v11 = vpop.permute.xlu0 %1303  ;;  %v1302_v12 = vpop.permute.xlu1 %1301 }
 0x316   : > { %v1357_v42 = vshrl.u32 %v7169_v11, 16  ;;  %v7188_v43 = vpack.i.b16 %v1302_v12, %v7143_v62  ;;  %v1350_v52 = vshrl.u32 %v1302_v12, 16 }
 0x318   : > { %v1351_v7 = vpack.i.b16 %v1350_v52, %v1349_v37 }
 0x319   : > { %v1317_v13 = vpop.permute.xlu0 %1316  ;;  %v7175_v14 = vpop.permute.xlu1 %1305 }
 0x31a   : > { %v1382_v26 = vshrl.u32 %v1317_v13, 16  ;;  %v1379_v30 = vpack.i.b16 %v1317_v13, %v1298_v1  ;;  %v1358_v8 = vshrl.u32 %v7175_v14, 16 }
 0x31c   : > { %v1383_v44 = vpack.i.b16 %v1382_v26, %v1381_v31 }
 0x31d   : > { %v1319_v19 = vpop.permute.xlu0 %1318  ;;  %v1321_v20 = vpop.permute.xlu1 %1320 }
 0x31e   : > { %v1389_v32 = vshrl.u32 %v1319_v19, 16  ;;  %v1390_v33 = vshrl.u32 %v1321_v20, 16  ;;  %v1387_v46 = vpack.i.b16 %v1321_v20, %v1319_v19 }
 0x320   : > { %v1391_v53 = vpack.i.b16 %v1390_v33, %v1389_v32 }
 0x321   : > { %v1325_v24 = vpop.permute.xlu0 %1324  ;;  %v1323_v25 = vpop.permute.xlu1 %1322 }
 0x322   : > { %v1398_v27 = vshrl.u32 %v1325_v24, 16  ;;  %v1395_v28 = vpack.i.b16 %v1325_v24, %v1323_v25  ;;  %v1397_v29 = vshrl.u32 %v1323_v25, 16 }
 0x324   : > { %v1399_v34 = vpack.i.b16 %v1398_v27, %v1397_v29  ;;  %v1473_v38 = vcombine.low %v1379_v30, %v1395_v28  ;;  %v1474_v45 = vcombine.high %v1379_v30, %v1395_v28 }
 0x325   : > { %v1329_v39 = vpop.permute.xlu0 %1328  ;;  %v1327_v40 = vpop.permute.xlu1 %1326 }
 0x326   : > { %v1406_v47 = vshrl.u32 %v1329_v39, 16  ;;  %v1403_v48 = vpack.i.b16 %v1329_v39, %v1327_v40  ;;  %v1405_v49 = vshrl.u32 %v1327_v40, 16  ;;  %v1609_v54 = vcombine.low %v1383_v44, %v1399_v34 }
 0x327   : > { %v1610_v56 = vcombine.high %v1383_v44, %v1399_v34  ;;  %v1481_v57 = vrot.slane %v1473_v38, %v7180_v35  ;;  %v1488_v62 = vrot.slane %v1474_v45, %v7180_v35 }
 0x328   : > { %v1407_v58 = vpack.i.b16 %v1406_v47, %v1405_v49  ;;  %v1489_v59 = vcombine.low %v1387_v46, %v1403_v48  ;;  %v1490_v60 = vcombine.high %v1387_v46, %v1403_v48  ;;  %v1617_v9 = vrot.slane %v1609_v54, %v7180_v35 }
 0x329   : > { %v1308_v61 = vpop.permute.xlu0 %1307  ;;  %v1310_v63 = vpop.permute.xlu1 %1309  ;;  %v1624_v12 = vrot.slane %v1610_v56, %v7180_v35  ;;  %v1355_v46 = vpack.i.b16 %v7175_v14, %v7169_v11  ;;  %v1359_v47 = vpack.i.b16 %v1358_v8, %v1357_v42 }
 0x32a   : > { %v1365_v0 = vshrl.u32 %v1308_v61, 16  ;;  %v1363_v1 = vpack.i.b16 %v1310_v63, %v1308_v61  ;;  %v1366_v2 = vshrl.u32 %v1310_v63, 16  ;;  %v1497_v3 = vrot.slane %v1489_v59, %v7180_v35 }
 0x32b   : > { %v1504_v4 = vrot.slane %v1490_v60, %v7180_v35  ;;  %v1625_v5 = vcombine.low %v1391_v53, %v1407_v58  ;;  %v1626_v6 = vcombine.high %v1391_v53, %v1407_v58 }
 0x32c   : > { %v1537_v13 = vcombine.low %v1481_v57, %v1497_v3  ;;  %v1538_v15 = vcombine.high %v1481_v57, %v1497_v3  ;;  %v1367_v20 = vpack.i.b16 %v1366_v2, %v1365_v0  ;;  %v1441_v21 = vcombine.low %v7188_v43, %v1363_v1 }
 0x32d   : > { %v1553_v16 = vcombine.low %v1488_v62, %v1504_v4  ;;  %v1554_v17 = vcombine.high %v1488_v62, %v1504_v4  ;;  %v1633_v18 = vrot.slane %v1625_v5, %v7180_v35  ;;  %v1640_v19 = vrot.slane %v1626_v6, %v7180_v35  ;;  %v1312_v44 = vpop.permute.xlu0 %1311  ;;  %v1314_v45 = vpop.permute.xlu1 %1313 }
 0x32e   : > { %v1545_v23 = vrot.slane %v1537_v13, %v7183_v36  ;;  %v1552_v24 = vrot.slane %v1538_v15, %v7183_v36  ;;  %v1442_v49 = vcombine.high %v7188_v43, %v1363_v1  ;;  %v1577_v58 = vcombine.low %v1351_v7, %v1367_v20 }
 0x32f   : > { %v1561_v25 = vrot.slane %v1553_v16, %v7183_v36  ;;  %v1568_v26 = vrot.slane %v1554_v17, %v7183_v36  ;;  %v1673_v27 = vcombine.low %v1617_v9, %v1633_v18  ;;  %v1674_v28 = vcombine.high %v1617_v9, %v1633_v18 }
 0x330   : > { %v1689_v29 = vcombine.low %v1624_v12, %v1640_v19  ;;  %v1690_v30 = vcombine.high %v1624_v12, %v1640_v19  ;;  %v5486_v31 = vcombine.low %v1545_v23, %v1552_v24  ;;  %v5488_v32 = vcombine.high %v1545_v23, %v1552_v24 }
 0x331   : > { %v5490_v33 = vcombine.low %v1561_v25, %v1568_v26  ;;  %v5492_v34 = vcombine.high %v1561_v25, %v1568_v26  ;;  %v1681_v37 = vrot.slane %v1673_v27, %v7183_v36  ;;  %v1688_v38 = vrot.slane %v1674_v28, %v7183_v36 }
 0x332   : > { %v1697_v39 = vrot.slane %v1689_v29, %v7183_v36  ;;  %v1704_v40 = vrot.slane %v1690_v30, %v7183_v36  ;;  %v7211_v48 = vrot.slane %v5486_v31, %v7180_v35  ;;  %v7215_v52 = vrot.slane %v5488_v32, %v7180_v35 }
 0x333   : > { %v7218_v53 = vrot.slane %v5490_v33, %v7180_v35  ;;  %v5494_v54 = vcombine.low %v1681_v37, %v1688_v38  ;;  %v5496_v56 = vcombine.high %v1681_v37, %v1688_v38  ;;  %v7221_v57 = vrot.slane %v5492_v34, %v7180_v35 }
 0x334   : > { %v1373_v59 = vshrl.u32 %v1312_v44, 16  ;;  %v1371_v11 = vpack.i.b16 %v1314_v45, %v1312_v44  ;;  %v5498_v14 = vcombine.low %v1697_v39, %v1704_v40  ;;  %v1449_v42 = vrot.slane %v1441_v21, %v7180_v35 }
 0x335   : > { %v1578_v60 = vcombine.high %v1351_v7, %v1367_v20  ;;  %v1374_v61 = vshrl.u32 %v1314_v45, 16  ;;  %v5500_v43 = vcombine.high %v1697_v39, %v1704_v40  ;;  %v1456_v63 = vrot.slane %v1442_v49, %v7180_v35 }
 0x336   : > { %v1457_v62 = vcombine.low %v1355_v46, %v1371_v11  ;;  %v1458_v0 = vcombine.high %v1355_v46, %v1371_v11  ;;  %v1929_v2 = vcombine.low %v7211_v48, %v7215_v52  ;;  %v7228_v3 = vrot.slane %v5494_v54, %v7180_v35 }
 0x337   : > { %v1375_v1 = vpack.i.b16 %v1374_v61, %v1373_v59  ;;  %v7231_v4 = vrot.slane %v5496_v56, %v7180_v35  ;;  %v1585_v5 = vrot.slane %v1577_v58, %v7180_v35  ;;  %v1961_v8 = vcombine.low %v7218_v53, %v7221_v57 }
 0x338   : > { %v1465_v6 = vrot.slane %v1457_v62, %v7180_v35  ;;  %v1472_v7 = vrot.slane %v1458_v0, %v7180_v35  ;;  %v1592_v9 = vrot.slane %v1578_v60, %v7180_v35  ;;  %v7240_v15 = vrot.slane %v5498_v14, %v7180_v35 }
 0x339   : > { %v1593_v12 = vcombine.low %v1359_v47, %v1375_v1  ;;  %v1594_v13 = vcombine.high %v1359_v47, %v1375_v1  ;;  %v7245_v23 = vrot.slane %v5500_v43, %v7180_v35  ;;  %v2065_v24 = vcombine.low %v7228_v3, %v7231_v4 }
 0x33a   : > { %v1505_v16 = vcombine.low %v1449_v42, %v1465_v6  ;;  %v1506_v17 = vcombine.high %v1449_v42, %v1465_v6  ;;  %v1521_v18 = vcombine.low %v1456_v63, %v1472_v7  ;;  %v1522_v19 = vcombine.high %v1456_v63, %v1472_v7 }
 0x33b   : > { %v1601_v20 = vrot.slane %v1593_v12, %v7180_v35  ;;  %v1608_v21 = vrot.slane %v1594_v13, %v7180_v35  ;;  %v2097_v60 = vcombine.low %v7240_v15, %v7245_v23  ;;  %v1937_v0 = vrot.slane %v1929_v2, %v7183_v36 }
 0x33c   : > { %v1513_v25 = vrot.slane %v1505_v16, %v7183_v36  ;;  %v1520_v26 = vrot.slane %v1506_v17, %v7183_v36  ;;  %v1529_v27 = vrot.slane %v1521_v18, %v7183_v36  ;;  %v1536_v28 = vrot.slane %v1522_v19, %v7183_v36 }
 0x33d   : > { %v1641_v29 = vcombine.low %v1585_v5, %v1601_v20  ;;  %v1642_v30 = vcombine.high %v1585_v5, %v1601_v20  ;;  %v1657_v31 = vcombine.low %v1592_v9, %v1608_v21  ;;  %v1658_v32 = vcombine.high %v1592_v9, %v1608_v21 }
 0x33e   : > { %v5485_v33 = vcombine.low %v1513_v25, %v1520_v26  ;;  %v5487_v34 = vcombine.high %v1513_v25, %v1520_v26  ;;  %v5489_v37 = vcombine.low %v1529_v27, %v1536_v28  ;;  %v5491_v38 = vcombine.high %v1529_v27, %v1536_v28 }
 0x33f   : > { %v1649_v39 = vrot.slane %v1641_v29, %v7183_v36  ;;  %v1656_v40 = vrot.slane %v1642_v30, %v7183_v36  ;;  %v1665_v44 = vrot.slane %v1657_v31, %v7183_v36  ;;  %v1672_v45 = vrot.slane %v1658_v32, %v7183_v36 }
 0x340   : > { %v7258_v46 = vrot.slane %v5485_v33, %v7180_v35  ;;  %v7261_v47 = vrot.slane %v5487_v34, %v7180_v35  ;;  %v7264_v49 = vrot.slane %v5489_v37, %v7180_v35  ;;  %v7267_v54 = vrot.slane %v5491_v38, %v7180_v35 }
 0x341   : > { %v5493_v56 = vcombine.low %v1649_v39, %v1656_v40  ;;  %v5495_v58 = vcombine.high %v1649_v39, %v1656_v40  ;;  %v5497_v59 = vcombine.low %v1665_v44, %v1672_v45  ;;  %v5499_v11 = vcombine.high %v1665_v44, %v1672_v45 }
 0x342   : > { %v1913_v14 = vcombine.low %v7258_v46, %v7261_v47  ;;  %v1945_v42 = vcombine.low %v7264_v49, %v7267_v54  ;;  %v1969_v1 = vrot.slane %v1961_v8, %v7183_v36  ;;  %v2073_v5 = vrot.slane %v2065_v24, %v7183_v36 }
 0x343   : > { %v7276_v61 = vrot.slane %v5493_v56, %v7180_v35  ;;  %v7279_v43 = vrot.slane %v5495_v58, %v7180_v35  ;;  %v7282_v63 = vrot.slane %v5497_v59, %v7180_v35  ;;  %v7285_v62 = vrot.slane %v5499_v11, %v7180_v35 }
 0x344   : > { %v2105_v9 = vrot.slane %v2097_v60, %v7183_v36  ;;  %v1921_v12 = vrot.slane %v1913_v14, %v7183_v36  ;;  %v1953_v13 = vrot.slane %v1945_v42, %v7183_v36  ;;  %v1981_v17 = vcombine.low %v1937_v0, %v1969_v1 }
 0x345   : > { %v2049_v6 = vcombine.low %v7276_v61, %v7279_v43  ;;  %v2081_v7 = vcombine.low %v7282_v63, %v7285_v62  ;;  %v1982_v18 = vcombine.high %v1937_v0, %v1969_v1  ;;  %v1930_v29 = vcombine.high %v7211_v48, %v7215_v52 }
 0x346   : > { %v2117_v8 = vcombine.low %v2073_v5, %v2105_v9  ;;  %v2118_v19 = vcombine.high %v2073_v5, %v2105_v9  ;;  %v7303_v27 = vcombine.low %v1921_v12, %v1953_v13  ;;  %v1978_v28 = vcombine.high %v1921_v12, %v1953_v13 }
 0x347   : > { %v2057_v16 = vrot.slane %v2049_v6, %v7183_v36  ;;  %v2089_v2 = vrot.slane %v2081_v7, %v7183_v36  ;;  %v2290_v32 = vshrl.u32 %v1982_v18, 16  ;;  %v1962_v33 = vcombine.high %v7218_v53, %v7221_v57 }
 0x348   : > { %v2283_v21 = vpack.i.b16 %v2117_v8, %v1981_v17  ;;  %v7301_v24 = vpack.i.b16 %v2118_v19, %v1982_v18  ;;  %v2291_v26 = vshrl.u32 %v2118_v19, 16  ;;  %v7320_v48 = vrot.slane %v1930_v29, %v7183_v36 }
 0x349   : > { %v7299_v20 = vcombine.low %v2057_v16, %v2089_v2  ;;  %v2114_v25 = vcombine.high %v2057_v16, %v2089_v2  ;;  %v7325_v52 = vrot.slane %v1962_v33, %v7183_v36  ;;  %v2066_v53 = vcombine.high %v7228_v3, %v7231_v4 }
 0x34a   : > { %v5521_v30 = vcombine.low %v2283_v21, %v2283_v21  ;;  %v5525_v31 = vcombine.low %v7301_v24, %v7301_v24  ;;  %v7317_v40 = vpack.i.b16 %v2291_v26, %v2290_v32  ;;  %v2098_v57 = vcombine.high %v7240_v15, %v7245_v23 }
 0x34b   : > { %v2259_v34 = vpack.i.b16 %v7299_v20, %v7303_v27  ;;  %v7315_v39 = vpack.i.b16 %v2114_v25, %v1978_v28  ;;  %v5522_v45 = vcombine.high %v2283_v21, %v2283_v21  ;;  %v2285_v56 = vshrl.u32 %v2117_v8, 16 }
 0x34c   : > { %v2430_v37 = vsel %vm2425_vm2, %v5521_v30, 0  ;;  %v2614_v38 = vsel %vm2425_vm2, %v5525_v31, 0  ;;  %v5527_v59 = vcombine.low %v7317_v40, %v7317_v40  ;;  %v2080_v11 = vrot.slane %v2066_v53, %v7183_v36 }
 0x34d   : > { %5815 = vmatpush3.bf16.xpose.msra.mxu1 %v2430_v37  ;;  %5839 = vmatpush3.bf16.xpose.msra.mxu0 %v2614_v38  ;;  %v5505_v44 = vcombine.low %v2259_v34, %v2259_v34  ;;  %v5509_v58 = vcombine.low %v7315_v39, %v7315_v39  ;;  %v2112_v14 = vrot.slane %v2098_v57, %v7183_v36  ;;  %v2267_v4 = vshrl.u32 %v2114_v25, 16 }
 0x34e   : > { %5820 = vmatprep.subr.bf16.mxu1 %v6727_v41  ;;  %5850 = vmatprep.subr.bf16.mxu0 %v6727_v41  ;;  %v2050_v42 = vcombine.high %v7276_v61, %v7279_v43  ;;  %v2082_v3 = vcombine.high %v7282_v63, %v7285_v62  ;;  %v2284_v15 = vshrl.u32 %v1981_v17, 16  ;;  %v1983_v23 = vcombine.low %v7320_v48, %v7325_v52 }
 0x34f   : > { %v2119_v60 = vcombine.low %v2080_v11, %v2112_v14  ;;  %v1914_v0 = vcombine.high %v7258_v46, %v7261_v47  ;;  %v1946_v1 = vcombine.high %v7264_v49, %v7267_v54  ;;  %v2266_v5 = vshrl.u32 %v1978_v28, 16 }
 0x350   : > { %v2476_v61 = vsel %vm2425_vm2, %v5522_v45, 0  ;;  %v2706_v43 = vsel %vm2425_vm2, %v5527_v59, 0  ;;  %v2286_v63 = vpack.i.b16 %v2285_v56, %v2284_v15  ;;  %v2064_v47 = vrot.slane %v2050_v42, %v7183_v36 }
 0x351   : > { %v7351_v62 = vpack.i.b16 %v2119_v60, %v1983_v23  ;;  %v7357_v46 = vpack.i.b16 %v2267_v4, %v2266_v5  ;;  %v2096_v49 = vrot.slane %v2082_v3, %v7183_v36  ;;  %v1928_v54 = vrot.slane %v1914_v0, %v7183_v36 }
 0x352   : > { %v1960_v6 = vrot.slane %v1946_v1, %v7183_v36  ;;  %v5523_v7 = vcombine.low %v2286_v63, %v2286_v63  ;;  %v2297_v12 = vshrl.u32 %v2119_v60, 16  ;;  %v5506_v13 = vcombine.high %v2259_v34, %v2259_v34 }
 0x353   : > { %v5529_v9 = vcombine.low %v7351_v62, %v7351_v62  ;;  %v5511_v16 = vcombine.low %v7357_v46, %v7357_v46  ;;  %v2261_v2 = vshrl.u32 %v7299_v20, 16  ;;  %v2115_v17 = vcombine.low %v2064_v47, %v2096_v49 }
 0x354   : > { %5817 = vmatmul.mubr.msk.bf16.vlgmr.msra.gmra.mxu1 %vm2425_vm2, %v5505_v44  ;;  %5841 = vmatmul.mubr.msk.bf16.vlgmr.msra.gmra.mxu0 %vm2425_vm2, %v5509_v58  ;;  %v2296_v8 = vshrl.u32 %v1983_v23, 16  ;;  %v2260_v18 = vshrl.u32 %v7303_v27, 16  ;;  %v2522_v19 = vsel %vm2425_vm2, %v5523_v7, 0  ;;  %v1979_v25 = vcombine.low %v1928_v54, %v1960_v6 }
 0x355   : > { %5821 = vmatpush3.bf16.xpose.msra.mxu1 %v2476_v61  ;;  %5851 = vmatpush3.bf16.xpose.msra.mxu0 %v2706_v43  ;;  %v2798_v21 = vsel %vm2425_vm2, %v5529_v9, 0  ;;  %v5524_v28 = vcombine.high %v2286_v63, %v2286_v63  ;;  %v2120_v30 = vcombine.high %v2080_v11, %v2112_v14  ;;  %v2273_v33 = vshrl.u32 %v2115_v17, 16 }
 0x356   : > { %5822 = vmatprep.mubr.msk.bf16.mxu1 %vm6728_vm1, %v6727_v41  ;;  %5852 = vmatprep.mubr.msk.bf16.mxu0 %vm6728_vm1, %v6727_v41  ;;  %v7375_v26 = vpack.i.b16 %v2297_v12, %v2296_v8  ;;  %v2262_v20 = vpack.i.b16 %v2261_v2, %v2260_v18  ;;  %v7381_v27 = vpack.i.b16 %v2115_v17, %v1979_v25  ;;  %v2272_v53 = vshrl.u32 %v1979_v25, 16 }
 0x357   : > { %5826 = vmatprep.subr.bf16.mxu1 %v6727_v41  ;;  %5862 = vmatprep.subr.bf16.mxu0 %v6727_v41  ;;  %v1984_v34 = vcombine.high %v7320_v48, %v7325_v52  ;;  %v2568_v37 = vsel %vm2425_vm2, %v5524_v28, 0  ;;  %v5526_v52 = vcombine.high %v7301_v24, %v7301_v24  ;;  %v2303_v45 = vshrl.u32 %v2120_v30, 16 }
 0x358   : > { %v5531_v29 = vcombine.low %v7375_v26, %v7375_v26  ;;  %v5507_v31 = vcombine.low %v2262_v20, %v2262_v20  ;;  %v5513_v32 = vcombine.low %v7381_v27, %v7381_v27  ;;  %v2274_v48 = vpack.i.b16 %v2273_v33, %v2272_v53 }
 0x359   : > { %v7395_v57 = vpack.i.b16 %v2120_v30, %v1984_v34  ;;  %v5508_v56 = vcombine.high %v2262_v20, %v2262_v20  ;;  %v2116_v59 = vcombine.high %v2064_v47, %v2096_v49  ;;  %v2302_v11 = vshrl.u32 %v1984_v34, 16 }
 0x35a   : > { %v2890_v38 = vsel %vm2425_vm2, %v5531_v29, 0  ;;  %v5515_v58 = vcombine.low %v2274_v48, %v2274_v48  ;;  %v2660_v14 = vsel %vm2425_vm2, %v5526_v52, 0  ;;  %v1980_v3 = vcombine.high %v1928_v54, %v1960_v6 }
 0x35b   : > { %v5533_v44 = vcombine.low %v7395_v57, %v7395_v57  ;;  %v2304_v4 = vpack.i.b16 %v2303_v45, %v2302_v11  ;;  %v5528_v15 = vcombine.high %v7317_v40, %v7317_v40  ;;  %v5510_v60 = vcombine.high %v7315_v39, %v7315_v39 }
 0x35c   : > { %5823 = vmatmul.mubr.msk.bf16.vlgmr.msra.gmra.mxu1 %vm2425_vm2, %v5506_v13  ;;  %5853 = vmatmul.mubr.msk.bf16.vlgmr.msra.gmra.mxu0 %vm2425_vm2, %v5511_v16  ;;  %v2277_v24 = vpack.i.b16 %v2116_v59, %v1980_v3  ;;  %v2279_v1 = vshrl.u32 %v2116_v59, 16  ;;  %v2278_v43 = vshrl.u32 %v1980_v3, 16  ;;  %v5530_v40 = vcombine.high %v7351_v62, %v7351_v62 }
 0x35d   : > { %5827 = vmatpush3.bf16.xpose.msra.mxu1 %v2522_v19  ;;  %5863 = vmatpush3.bf16.xpose.msra.mxu0 %v2798_v21  ;;  %v2982_v42 = vsel %vm2425_vm2, %v5533_v44, 0  ;;  %v5535_v23 = vcombine.low %v2304_v4, %v2304_v4  ;;  %v2752_v5 = vsel %vm2425_vm2, %v5528_v15, 0  ;;  %v5512_v63 = vcombine.high %v7357_v46, %v7357_v46 }
 0x35e   : > { %5828 = vmatprep.mubr.msk.bf16.mxu1 %vm6728_vm1, %v6727_v41  ;;  %5864 = vmatprep.mubr.msk.bf16.mxu0 %vm6728_vm1, %v6727_v41  ;;  %v5517_v0 = vcombine.low %v2277_v24, %v2277_v24  ;;  %v2280_v39 = vpack.i.b16 %v2279_v1, %v2278_v43  ;;  %v2844_v49 = vsel %vm2425_vm2, %v5530_v40, 0  ;;  %v5532_v62 = vcombine.high %v7375_v26, %v7375_v26 }
 0x35f   : > { %5832 = vmatprep.subr.bf16.mxu1 %v6727_v41  ;;  %5874 = vmatprep.subr.bf16.mxu0 %v6727_v41  ;;  %v3074_v61 = vsel %vm2425_vm2, %v5535_v23, 0  ;;  %v5514_v46 = vcombine.high %v7381_v27, %v7381_v27  ;;  %v5534_v6 = vcombine.high %v7395_v57, %v7395_v57  ;;  %v5516_v7 = vcombine.high %v2274_v48, %v2274_v48 }
 0x360   : > { %v5519_v47 = vcombine.low %v2280_v39, %v2280_v39  ;;  %v2936_v54 = vsel %vm2425_vm2, %v5532_v62, 0  ;;  %v5536_v12 = vcombine.high %v2304_v4, %v2304_v4  ;;  %v5518_v13 = vcombine.high %v2277_v24, %v2277_v24 }
 0x361   : > { %v3028_v9 = vsel %vm2425_vm2, %v5534_v6, 0  ;;  %v5520_v2 = vcombine.high %v2280_v39, %v2280_v39 }
 0x362   : > { %v3120_v16 = vsel %vm2425_vm2, %v5536_v12, 0 }
 0x364   : > { %5829 = vmatmul.mubr.msk.bf16.vlgmr.msra.gmra.mxu1 %vm2425_vm2, %v5507_v31  ;;  %5865 = vmatmul.mubr.msk.bf16.vlgmr.msra.gmra.mxu0 %vm2425_vm2, %v5513_v32 }
 0x365   : > { %5833 = vmatpush3.bf16.xpose.msra.mxu1 %v2568_v37  ;;  %5875 = vmatpush3.bf16.xpose.msra.mxu0 %v2890_v38 }
 0x366   : > { %5834 = vmatprep.mubr.msk.bf16.mxu1 %vm6728_vm1, %v6727_v41  ;;  %5876 = vmatprep.mubr.msk.bf16.mxu0 %vm6728_vm1, %v6727_v41 }
 0x367   : > { %5844 = vmatprep.subr.bf16.mxu1 %v6727_v41  ;;  %5886 = vmatprep.subr.bf16.mxu0 %v6727_v41 }
 0x36c   : > { %5835 = vmatmul.mubr.msk.bf16.vlgmr.msra.gmra.mxu1 %vm2425_vm2, %v5508_v56  ;;  %5877 = vmatmul.mubr.msk.bf16.vlgmr.msra.gmra.mxu0 %vm2425_vm2, %v5515_v58 }
 0x36d   : > { %5845 = vmatpush3.bf16.xpose.msra.mxu1 %v2660_v14  ;;  %5887 = vmatpush3.bf16.xpose.msra.mxu0 %v2982_v42 }
 0x36e   : > { %5846 = vmatprep.mubr.msk.bf16.mxu1 %vm6728_vm1, %v6727_v41  ;;  %5888 = vmatprep.mubr.msk.bf16.mxu0 %vm6728_vm1, %v6727_v41 }
 0x36f   : > { %5856 = vmatprep.subr.bf16.mxu1 %v6727_v41  ;;  %5898 = vmatprep.subr.bf16.mxu0 %v6727_v41 }
 0x374   : > { %5847 = vmatmul.mubr.msk.bf16.vlgmr.msra.gmra.mxu1 %vm2425_vm2, %v5510_v60  ;;  %5889 = vmatmul.mubr.msk.bf16.vlgmr.msra.gmra.mxu0 %vm2425_vm2, %v5517_v0 }
 0x375   : > { %5857 = vmatpush3.bf16.xpose.msra.mxu1 %v2752_v5  ;;  %5899 = vmatpush3.bf16.xpose.msra.mxu0 %v3074_v61 }
 0x376   : > { %5858 = vmatprep.mubr.msk.bf16.mxu1 %vm6728_vm1, %v6727_v41  ;;  %5900 = vmatprep.mubr.msk.bf16.mxu0 %vm6728_vm1, %v6727_v41 }
 0x377   : > { %5868 = vmatprep.subr.bf16.mxu1 %v6727_v41  ;;  %5910 = vmatprep.subr.bf16.mxu0 %v6727_v41 }
 0x37c   : > { %5859 = vmatmul.mubr.msk.bf16.vlgmr.msra.gmra.mxu1 %vm2425_vm2, %v5512_v63  ;;  %5901 = vmatmul.mubr.msk.bf16.vlgmr.msra.gmra.mxu0 %vm2425_vm2, %v5519_v47 }
 0x37d   : > { %5869 = vmatpush3.bf16.xpose.msra.mxu1 %v2844_v49  ;;  %5870 = vmatprep.mubr.msk.bf16.mxu1 %vm6728_vm1, %v6727_v41 }
 0x37e   : > { %5880 = vmatprep.subr.bf16.mxu1 %v6727_v41  ;;  %5912 = vmatprep.mubr.msk.bf16.mxu0 %vm6728_vm1, %v6727_v41 }
 0x384   : > { %5871 = vmatmul.mubr.msk.bf16.vlgmr.msra.gmra.mxu1 %vm2425_vm2, %v5514_v46 }
 0x385   : > { %5881 = vmatpush3.bf16.xpose.msra.mxu1 %v2936_v54  ;;  %5882 = vmatprep.mubr.msk.bf16.mxu1 %vm6728_vm1, %v6727_v41 }
 0x386   : > { %5892 = vmatprep.subr.bf16.mxu1 %v6727_v41 }
 0x38c   : > { %5883 = vmatmul.mubr.msk.bf16.vlgmr.msra.gmra.mxu1 %vm2425_vm2, %v5516_v7 }
 0x38d   : > { %5893 = vmatpush3.bf16.xpose.msra.mxu1 %v3028_v9  ;;  %5894 = vmatprep.mubr.msk.bf16.mxu1 %vm6728_vm1, %v6727_v41 }
 0x38e   : > { %5904 = vmatprep.subr.bf16.mxu1 %v6727_v41 }
 0x394   : > { %5895 = vmatmul.mubr.msk.bf16.vlgmr.msra.gmra.mxu1 %vm2425_vm2, %v5518_v13 }
 0x395   : > { %5905 = vmatpush3.bf16.xpose.msra.mxu1 %v3120_v16  ;;  %5906 = vmatprep.mubr.msk.bf16.mxu1 %vm6728_vm1, %v6727_v41 }
 0x396   : > { %5916 = vmatprep.subr.bf16.mxu1 %v6727_v41 }
 0x39c   : > { %5907 = vmatmul.mubr.msk.bf16.vlgmr.msra.gmra.mxu1 %vm2425_vm2, %v5520_v2 }
 0x39d   : > { %5918 = vmatprep.mubr.msk.bf16.mxu1 %vm6728_vm1, %v6727_v41 }
 0x414   : > { %v2466_v17 = vpop.f32.mrf.mxu1  ;;  %v2650_v8 = vpop.f32.mrf.mxu0 }
 0x415   : > { %v7467_v18 = vmul.f32 0.25, %v2466_v17  ;;  %v7469_v19 = vmul.f32 0.25, %v2650_v8 }
 0x416   : > { %v5818_v21 = vpop.f32.mrf.mxu1  ;;  %v5842_v25 = vpop.f32.mrf.mxu0 }
 0x417   : > { %v3191_v26 = vsel %vm3178_vm3, %v7469_v19, -inf  ;;  %v3179_v20 = vsel %vm3178_vm3, %v7467_v18, -inf }
 0x418   : > { %3192 = vmax.xlane.f32.xlu1 %v3191_v26  ;;  %v2653_v27 = vpop.f32.mrf.mxu0  ;;  %3180 = vmax.xlane.f32.xlu0 %v3179_v20  ;;  %v2469_v28 = vpop.f32.mrf.mxu1 }
 0x41a   : > { %v5819_v29 = vpop.f32.mrf.mxu1  ;;  %v5843_v30 = vpop.f32.mrf.mxu0 }
 0x41c   : > { %v2512_v31 = vpop.f32.mrf.mxu1  ;;  %v2742_v32 = vpop.f32.mrf.mxu0 }
 0x41d   : > { %v7475_v33 = vmul.f32 0.25, %v2512_v31  ;;  %v7491_v29 = vmul.f32 0.25, %v2742_v32 }
 0x41e   : > { %v5824_v34 = vpop.f32.mrf.mxu1  ;;  %v5854_v37 = vpop.f32.mrf.mxu0 }
 0x41f   : > { %v3182_v38 = vsel %vm3178_vm3, %v7475_v33, -inf }
 0x420   : > { %v2745_v53 = vpop.f32.mrf.mxu0  ;;  %3183 = vmax.xlane.f32.xlu1 %v3182_v38  ;;  %v2515_v57 = vpop.f32.mrf.mxu1  ;;  %v3197_v38 = vsel %vm3178_vm3, %v7491_v29, -inf }
 0x422   : > { %v5825_v48 = vpop.f32.mrf.mxu1  ;;  %v5855_v52 = vpop.f32.mrf.mxu0 }
 0x424   : > { %v2558_v44 = vpop.f32.mrf.mxu1  ;;  %v2834_v45 = vpop.f32.mrf.mxu0 }
 0x425   : > { %v7479_v56 = vmul.f32 0.25, %v2558_v44  ;;  %v7493_v34 = vmul.f32 0.25, %v2834_v45 }
 0x426   : > { %v5830_v58 = vpop.f32.mrf.mxu1  ;;  %v5866_v59 = vpop.f32.mrf.mxu0 }
 0x427   : > { %v3185_v11 = vsel %vm3178_vm3, %v7479_v56, -inf  ;;  %v3203_v52 = vsel %vm3178_vm3, %v7493_v34, -inf }
 0x428   : > { %v2837_v14 = vpop.f32.mrf.mxu0  ;;  %3186 = vmax.xlane.f32.xlu0 %v3185_v11  ;;  %v2561_v42 = vpop.f32.mrf.mxu1 }
 0x42a   : > { %v5831_v3 = vpop.f32.mrf.mxu1  ;;  %v5867_v4 = vpop.f32.mrf.mxu0 }
 0x42c   : > { %v2604_v24 = vpop.f32.mrf.mxu1  ;;  %v2926_v15 = vpop.f32.mrf.mxu0 }
 0x42d   : > { %v7483_v23 = vmul.f32 0.25, %v2604_v24  ;;  %v7497_v57 = vmul.f32 0.25, %v2926_v15 }
 0x42e   : > { %v5836_v60 = vpop.f32.mrf.mxu1  ;;  %v5878_v0 = vpop.f32.mrf.mxu0 }
 0x42f   : > { %v3188_v1 = vsel %vm3178_vm3, %v7483_v23, -inf  ;;  %v3209_v45 = vsel %vm3178_vm3, %v7497_v57, -inf }
 0x430   : > { %v2929_v5 = vpop.f32.mrf.mxu0  ;;  %3189 = vmax.xlane.f32.xlu0 %v3188_v1  ;;  %v2607_v61 = vpop.f32.mrf.mxu1 }
 0x431   : > { %1337 = vrot.lane.b32.xlu1 %v7167_v10, %s6733_s20 }
 0x432   : > { %v5837_v43 = vpop.f32.mrf.mxu1  ;;  %v5879_v39 = vpop.f32.mrf.mxu0 }
 0x434   : > { %v2696_v40 = vpop.f32.mrf.mxu1  ;;  %v3018_v63 = vpop.f32.mrf.mxu0 }
 0x435   : > { %v7501_v32 = vmul.f32 0.25, %v3018_v63  ;;  %v7505_v11 = vmul.f32 0.25, %v2696_v40 }
 0x436   : > { %v5848_v47 = vpop.f32.mrf.mxu1  ;;  %v5890_v49 = vpop.f32.mrf.mxu0 }
 0x437   : > { %v3215_v3 = vsel %vm3178_vm3, %v7501_v32, -inf  ;;  %v3194_v60 = vsel %vm3178_vm3, %v7505_v11, -inf  ;;  %v7539_v49 = vpop.permute.xlu1 %1331 }
 0x438   : > { %v2699_v62 = vpop.f32.mrf.mxu1  ;;  %v3021_v46 = vpop.f32.mrf.mxu0 }
 0x439   : > { %v7541_v62 = vpop.permute.xlu0 %1333 }
 0x43a   : > { %v5849_v54 = vpop.f32.mrf.mxu1  ;;  %v5891_v6 = vpop.f32.mrf.mxu0 }
 0x43b   : > { %v7543_v46 = vpop.permute.xlu1 %1335 }
 0x43c   : > { %v2788_v7 = vpop.f32.mrf.mxu1  ;;  %v3110_v9 = vpop.f32.mrf.mxu0 }
 0x43d   : > { %v7507_v14 = vmul.f32 0.25, %v3110_v9  ;;  %v7511_v24 = vmul.f32 0.25, %v2788_v7 }
 0x43e   : > { %v5860_v12 = vpop.f32.mrf.mxu1  ;;  %v5902_v13 = vpop.f32.mrf.mxu0 }
 0x43f   : > { %v3221_v15 = vsel %vm3178_vm3, %v7507_v14, -inf  ;;  %v3200_v1 = vsel %vm3178_vm3, %v7511_v24, -inf }
 0x440   : > { %v2791_v16 = vpop.f32.mrf.mxu1  ;;  %v3113_v2 = vpop.f32.mrf.mxu0 }
 0x442   : > { %v5861_v17 = vpop.f32.mrf.mxu1  ;;  %v5903_v8 = vpop.f32.mrf.mxu0 }
 0x444   : > { %v2880_v21 = vpop.f32.mrf.mxu1 }
 0x445   : > { %v7517_v0 = vmul.f32 0.25, %v2880_v21 }
 0x446   : > { %1339 = vrot.lane.b32.xlu0 %v7167_v10, %s6732_s4  ;;  %v5872_v25 = vpop.f32.mrf.mxu1 }
 0x447   : > { %v3206_v61 = vsel %vm3178_vm3, %v7517_v0, -inf }
 0x448   : > { %v2883_v26 = vpop.f32.mrf.mxu1 }
 0x44a   : > { %v5873_v20 = vpop.f32.mrf.mxu1 }
 0x44c   : > { %v2972_v27 = vpop.f32.mrf.mxu1 }
 0x44d   : > { %v7521_v5 = vmul.f32 0.25, %v2972_v27 }
 0x44e   : > { %v5884_v28 = vpop.f32.mrf.mxu1 }
 0x44f   : > { %v3212_v39 = vsel %vm3178_vm3, %v7521_v5, -inf }
 0x450   : > { %v2975_v30 = vpop.f32.mrf.mxu1 }
 0x452   : > { %v5885_v31 = vpop.f32.mrf.mxu1 }
 0x454   : > { %v3064_v37 = vpop.f32.mrf.mxu1 }
 0x455   : > { %3198 = vmax.xlane.f32.xlu1 %v3197_v38  ;;  %v7525_v43 = vmul.f32 0.25, %v3064_v37 }
 0x456   : > { %v5896_v53 = vpop.f32.mrf.mxu1 }
 0x457   : > { %v3218_v63 = vsel %vm3178_vm3, %v7525_v43, -inf }
 0x458   : > { %v3067_v48 = vpop.f32.mrf.mxu1 }
 0x459   : > { %3204 = vmax.xlane.f32.xlu1 %v3203_v52 }
 0x45a   : > { %v5897_v44 = vpop.f32.mrf.mxu1 }
 0x45c   : > { %v3156_v58 = vpop.f32.mrf.mxu1 }
 0x45d   : > { %3210 = vmax.xlane.f32.xlu1 %v3209_v45  ;;  %v7529_v40 = vmul.f32 0.25, %v3156_v58 }
 0x45e   : > { %v5908_v59 = vpop.f32.mrf.mxu1 }
 0x45f   : > { %v3224_v47 = vsel %vm3178_vm3, %v7529_v40, -inf }
 0x460   : > { %v3159_v42 = vpop.f32.mrf.mxu1 }
 0x461   : > { %3216 = vmax.xlane.f32.xlu1 %v3215_v3 }
 0x462   : > { %v5909_v4 = vpop.f32.mrf.mxu1 }
 0x465   : > { %3222 = vmax.xlane.f32.xlu1 %v3221_v15  ;;  %3195 = vmax.xlane.f32.xlu0 %v3194_v60 }
 0x469   : > { %3201 = vmax.xlane.f32.xlu0 %v3200_v1 }
 0x46d   : > { %3207 = vmax.xlane.f32.xlu0 %v3206_v61 }
 0x471   : > { %3213 = vmax.xlane.f32.xlu0 %v3212_v39 }
 0x475   : > { %3219 = vmax.xlane.f32.xlu0 %v3218_v63 }
 0x476   : > { %1341 = vrot.lane.b32.xlu1 %v7167_v10, %s6735_s23 }
 0x479   : > { %3225 = vmax.xlane.f32.xlu0 %v3224_v47 }
 0x48f   : > { %1343 = vrot.lane.b32.xlu0 %v7167_v10, %s6734_s13 }
 0x4a1   : > { %v3181_v54 = vpop.xlane.xlu0 %3180  ;;  %v3193_v9 = vpop.xlane.xlu1 %3192 }
 0x4a2   : > { %v3227_v6 = vsub.f32 %v7467_v18, %v3181_v54  ;;  %v3231_v2 = vsub.f32 %v7469_v19, %v3193_v9 }
 0x4a4   : > { %v3243_v7 = vmul.f32 1.442695, %v3227_v6  ;;  %v3251_v25 = vmul.f32 1.442695, %v3231_v2 }
 0x4a6   : > { %6289 = vpow2.f32 %v3243_v7 }
 0x4a9   : > { %v3184_v12 = vpop.xlane.xlu1 %3183 }
 0x4aa   : > { %v3228_v13 = vsub.f32 %v7475_v33, %v3184_v12 }
 0x4ac   : > { %v3245_v16 = vmul.f32 1.442695, %v3228_v13 }
 0x4ad   : > { %v7570_v53 = vpop.permute.xlu1 %1337 }
 0x4ae   : > { %6291 = vpow2.f32 %v3245_v16 }
 0x4b1   : > { %v3187_v17 = vpop.xlane.xlu0 %3186 }
 0x4b2   : > { %v3229_v8 = vsub.f32 %v7479_v56, %v3187_v17 }
 0x4b3   : > { %v7549_v21 = vpop.eup %6289 }
 0x4b4   : > { %v3247_v26 = vmul.f32 1.442695, %v3229_v8  ;;  %v3275_v18 = vsel %vm3178_vm3, %v7549_v21, 0.0 }
 0x4b5   : > { %3276 = vadd.xlane.f32.xlu1 %v3275_v18 }
 0x4b6   : > { %6293 = vpow2.f32 %v3247_v26 }
 0x4b7   : > { %6295 = vpow2.f32 %v3251_v25 }
 0x4b9   : > { %v3190_v20 = vpop.xlane.xlu0 %3189 }
 0x4ba   : > { %v3230_v33 = vsub.f32 %v7483_v23, %v3190_v20 }
 0x4bb   : > { %v7554_v27 = vpop.eup %6291 }
 0x4bc   : > { %v3249_v28 = vmul.f32 1.442695, %v3230_v33  ;;  %v3278_v19 = vsel %vm3178_vm3, %v7554_v27, 0.0 }
 0x4bd   : > { %3279 = vadd.xlane.f32.xlu0 %v3278_v19  ;;  %v1340_v15 = vpop.permute.xlu0 %1339 }
 0x4be   : > { %6297 = vpow2.f32 %v3249_v28  ;;  %v1430_v28 = vshrl.u32 %v1340_v15, 16 }
 0x4c3   : > { %v7558_v56 = vpop.eup %6293 }
 0x4c4   : > { %v3281_v30 = vsel %vm3178_vm3, %v7558_v56, 0.0  ;;  %v7562_v31 = vpop.eup %6295 }
 0x4c5   : > { %3282 = vadd.xlane.f32.xlu0 %v3281_v30  ;;  %v3287_v37 = vsel %vm3178_vm3, %v7562_v31, 0.0  ;;  %v1413_v30 = vshrl.u32 %v7167_v10, 16 }
 0x4c9   : > { %3288 = vadd.xlane.f32.xlu0 %v3287_v37 }
 0x4cb   : > { %v7566_v23 = vpop.eup %6297 }
 0x4cc   : > { %v3284_v38 = vsel %vm3178_vm3, %v7566_v23, 0.0 }
 0x4cd   : > { %3285 = vadd.xlane.f32.xlu1 %v3284_v38  ;;  %v1414_v38 = vshrl.u32 %v7539_v49, 16 }
 0x4de   : > { %v3199_v48 = vpop.xlane.xlu1 %3198 }
 0x4df   : > { %v3233_v52 = vsub.f32 %v7491_v29, %v3199_v48  ;;  %v1429_v48 = vshrl.u32 %v7570_v53, 16 }
 0x4e1   : > { %v3255_v44 = vmul.f32 1.442695, %v3233_v52  ;;  %v1427_v52 = vpack.i.b16 %v1340_v15, %v7570_v53 }
 0x4e2   : > { %v3205_v58 = vpop.xlane.xlu1 %3204 }
 0x4e3   : > { %6299 = vpow2.f32 %v3255_v44  ;;  %v3235_v45 = vsub.f32 %v7493_v34, %v3205_v58 }
 0x4e5   : > { %v3259_v59 = vmul.f32 1.442695, %v3235_v45 }
 0x4e6   : > { %v3211_v42 = vpop.xlane.xlu1 %3210 }
 0x4e7   : > { %6301 = vpow2.f32 %v3259_v59  ;;  %v3237_v3 = vsub.f32 %v7497_v57, %v3211_v42  ;;  %v1411_v59 = vpack.i.b16 %v7539_v49, %v7167_v10  ;;  %v1421_v42 = vshrl.u32 %v7541_v62, 16 }
 0x4e9   : > { %v3263_v4 = vmul.f32 1.442695, %v3237_v3  ;;  %v1422_v3 = vshrl.u32 %v7543_v46, 16 }
 0x4ea   : > { %v3217_v60 = vpop.xlane.xlu1 %3216 }
 0x4eb   : > { %6303 = vpow2.f32 %v3263_v4  ;;  %v3239_v1 = vsub.f32 %v7501_v32, %v3217_v60  ;;  %v1431_v4 = vpack.i.b16 %v1430_v28, %v1429_v48 }
 0x4ed   : > { %v3267_v61 = vmul.f32 1.442695, %v3239_v1  ;;  %v1415_v1 = vpack.i.b16 %v1414_v38, %v1413_v30 }
 0x4ee   : > { %v3223_v39 = vpop.xlane.xlu1 %3222  ;;  %v3196_v63 = vpop.xlane.xlu0 %3195 }
 0x4ef   : > { %6305 = vpow2.f32 %v3267_v61  ;;  %v3241_v29 = vsub.f32 %v7507_v14, %v3223_v39  ;;  %v3232_v47 = vsub.f32 %v7505_v11, %v3196_v63  ;;  %v1713_v61 = vcombine.low %v1411_v59, %v1427_v52 }
 0x4f0   : > { %v7578_v34 = vpop.eup %6299  ;;  %v1714_v39 = vcombine.high %v1411_v59, %v1427_v52 }
 0x4f1   : > { %v3271_v54 = vmul.f32 1.442695, %v3241_v29  ;;  %v3253_v6 = vmul.f32 1.442695, %v3232_v47  ;;  %v3293_v57 = vsel %vm3178_vm3, %v7578_v34, 0.0 }
 0x4f2   : > { %v3202_v7 = vpop.xlane.xlu0 %3201  ;;  %3294 = vadd.xlane.f32.xlu0 %v3293_v57  ;;  %v1342_v60 = vpop.permute.xlu1 %1341 }
 0x4f3   : > { %6307 = vpow2.f32 %v3271_v54  ;;  %v3234_v32 = vsub.f32 %v7511_v24, %v3202_v7  ;;  %v1437_v29 = vshrl.u32 %v1342_v60, 16  ;;  %v1423_v54 = vpack.i.b16 %v1422_v3, %v1421_v42 }
 0x4f4   : > { %v7583_v9 = vpop.eup %6301  ;;  %6309 = vpow2.f32 %v3253_v6  ;;  %v1781_v6 = vcombine.low %v1415_v1, %v1431_v4 }
 0x4f5   : > { %v3257_v12 = vmul.f32 1.442695, %v3234_v32  ;;  %v3299_v14 = vsel %vm3178_vm3, %v7583_v9, 0.0 }
 0x4f6   : > { %v3208_v11 = vpop.xlane.xlu0 %3207  ;;  %3300 = vadd.xlane.f32.xlu0 %v3299_v14  ;;  %v1782_v14 = vcombine.high %v1415_v1, %v1431_v4 }
 0x4f7   : > { %6311 = vpow2.f32 %v3257_v12  ;;  %v3236_v13 = vsub.f32 %v7517_v0, %v3208_v11 }
 0x4f8   : > { %v7588_v16 = vpop.eup %6303  ;;  %v1796_v28 = vrot.slane %v1782_v14, %v7180_v35 }
 0x4f9   : > { %v3261_v2 = vmul.f32 1.442695, %v3236_v13  ;;  %v3305_v17 = vsel %vm3178_vm3, %v7588_v16, 0.0 }
 0x4fa   : > { %v3214_v8 = vpop.xlane.xlu0 %3213  ;;  %3306 = vadd.xlane.f32.xlu0 %v3305_v17 }
 0x4fb   : > { %6313 = vpow2.f32 %v3261_v2  ;;  %v3238_v24 = vsub.f32 %v7521_v5, %v3214_v8 }
 0x4fc   : > { %v7593_v25 = vpop.eup %6305 }
 0x4fd   : > { %v3265_v26 = vmul.f32 1.442695, %v3238_v24  ;;  %v3311_v18 = vsel %vm3178_vm3, %v7593_v25, 0.0  ;;  %v1789_v24 = vrot.slane %v1781_v6, %v7180_v35 }
 0x4fe   : > { %v3220_v20 = vpop.xlane.xlu0 %3219  ;;  %3312 = vadd.xlane.f32.xlu0 %v3311_v18 }
 0x4ff   : > { %6315 = vpow2.f32 %v3265_v26  ;;  %v3240_v0 = vsub.f32 %v7525_v43, %v3220_v20 }
 0x500   : > { %v7598_v33 = vpop.eup %6307 }
 0x501   : > { %v7600_v19 = vpop.eup %6309  ;;  %v3269_v37 = vmul.f32 1.442695, %v3240_v0  ;;  %v3317_v5 = vsel %vm3178_vm3, %v7598_v33, 0.0 }
 0x502   : > { %v3290_v43 = vsel %vm3178_vm3, %v7600_v19, 0.0  ;;  %3318 = vadd.xlane.f32.xlu0 %v3317_v5  ;;  %v3226_v44 = vpop.xlane.xlu0 %3225 }
 0x503   : > { %3291 = vadd.xlane.f32.xlu1 %v3290_v43  ;;  %v3242_v58 = vsub.f32 %v7529_v40, %v3226_v44  ;;  %6317 = vpow2.f32 %v3269_v37  ;;  %v1419_v40 = vpack.i.b16 %v7543_v46, %v7541_v62  ;;  %v1721_v62 = vrot.slane %v1713_v61, %v7180_v35 }
 0x504   : > { %v7611_v45 = vpop.eup %6311  ;;  %v1728_v46 = vrot.slane %v1714_v39, %v7180_v35 }
 0x505   : > { %v3273_v53 = vmul.f32 1.442695, %v3242_v58  ;;  %v3296_v15 = vsel %vm3178_vm3, %v7611_v45, 0.0 }
 0x506   : > { %v1344_v63 = vpop.permute.xlu0 %1343 }
 0x507   : > { %6319 = vpow2.f32 %v3273_v53  ;;  %3297 = vadd.xlane.f32.xlu1 %v3296_v15  ;;  %v1435_v10 = vpack.i.b16 %v1344_v63, %v1342_v60  ;;  %v1438_v49 = vshrl.u32 %v1344_v63, 16 }
 0x508   : > { %v7621_v47 = vpop.eup %6313 }
 0x509   : > { %v1439_v57 = vpack.i.b16 %v1438_v49, %v1437_v29  ;;  %v1729_v7 = vcombine.low %v1419_v40, %v1435_v10  ;;  %v1730_v32 = vcombine.high %v1419_v40, %v1435_v10  ;;  %v3302_v12 = vsel %vm3178_vm3, %v7621_v47, 0.0 }
 0x50b   : > { %v1737_v11 = vrot.slane %v1729_v7, %v7180_v35  ;;  %v1744_v13 = vrot.slane %v1730_v32, %v7180_v35  ;;  %v1797_v2 = vcombine.low %v1423_v54, %v1439_v57  ;;  %v1798_v17 = vcombine.high %v1423_v54, %v1439_v57  ;;  %3303 = vadd.xlane.f32.xlu1 %v3302_v12 }
 0x50c   : > { %v7629_v8 = vpop.eup %6315 }
 0x50d   : > { %v1745_v26 = vcombine.low %v1721_v62, %v1737_v11  ;;  %v1746_v18 = vcombine.high %v1721_v62, %v1737_v11  ;;  %v1761_v20 = vcombine.low %v1728_v46, %v1744_v13  ;;  %v1762_v0 = vcombine.high %v1728_v46, %v1744_v13 }
 0x50e   : > { %v1805_v30 = vrot.slane %v1797_v2, %v7180_v35  ;;  %v1812_v37 = vrot.slane %v1798_v17, %v7180_v35  ;;  %v3308_v5 = vsel %vm3178_vm3, %v7629_v8, 0.0 }
 0x50f   : > { %v1753_v38 = vrot.slane %v1745_v26, %v7183_v36  ;;  %v1760_v48 = vrot.slane %v1746_v18, %v7183_v36  ;;  %v1769_v52 = vrot.slane %v1761_v20, %v7183_v36  ;;  %v1776_v43 = vrot.slane %v1762_v0, %v7183_v36  ;;  %3309 = vadd.xlane.f32.xlu1 %v3308_v5 }
 0x510   : > { %v1813_v44 = vcombine.low %v1789_v24, %v1805_v30  ;;  %v1814_v58 = vcombine.high %v1789_v24, %v1805_v30  ;;  %v1829_v59 = vcombine.low %v1796_v28, %v1812_v37  ;;  %v1830_v42 = vcombine.high %v1796_v28, %v1812_v37  ;;  %v7641_v15 = vpop.eup %6317 }
 0x511   : > { %v2121_v3 = vcombine.low %v1753_v38, %v1760_v48  ;;  %v5501_v4 = vcombine.high %v1753_v38, %v1760_v48  ;;  %v2137_v60 = vcombine.low %v1769_v52, %v1776_v43  ;;  %v5502_v53 = vcombine.high %v1769_v52, %v1776_v43 }
 0x512   : > { %v1821_v1 = vrot.slane %v1813_v44, %v7183_v36  ;;  %v1828_v40 = vrot.slane %v1814_v58, %v7183_v36  ;;  %v1837_v61 = vrot.slane %v1829_v59, %v7183_v36  ;;  %v1844_v39 = vrot.slane %v1830_v42, %v7183_v36 }
 0x513   : > { %v2128_v63 = vrot.slane %v2121_v3, %v7180_v35  ;;  %v2136_v29 = vrot.slane %v5501_v4, %v7180_v35  ;;  %v2144_v10 = vrot.slane %v2137_v60, %v7180_v35  ;;  %v2152_v49 = vrot.slane %v5502_v53, %v7180_v35 }
 0x514   : > { %v7651_v54 = vpop.eup %6319  ;;  %v2189_v6 = vcombine.low %v1821_v1, %v1828_v40  ;;  %v5503_v57 = vcombine.high %v1821_v1, %v1828_v40  ;;  %v2205_v7 = vcombine.low %v1837_v61, %v1844_v39  ;;  %v5504_v32 = vcombine.high %v1837_v61, %v1844_v39 }
 0x515   : > { %v3314_v12 = vsel %vm3178_vm3, %v7641_v15, 0.0  ;;  %v3320_v62 = vsel %vm3178_vm3, %v7651_v54, 0.0  ;;  %v2153_v46 = vcombine.low %v2128_v63, %v2136_v29  ;;  %v2169_v14 = vcombine.low %v2144_v10, %v2152_v49 }
 0x516   : > { %3315 = vadd.xlane.f32.xlu1 %v3314_v12  ;;  %v2196_v11 = vrot.slane %v2189_v6, %v7180_v35  ;;  %v2204_v13 = vrot.slane %v5503_v57, %v7180_v35  ;;  %v2212_v2 = vrot.slane %v2205_v7, %v7180_v35  ;;  %v2220_v17 = vrot.slane %v5504_v32, %v7180_v35 }
 0x517   : > { %v2161_v24 = vrot.slane %v2153_v46, %v7183_v36  ;;  %v2177_v26 = vrot.slane %v2169_v14, %v7183_v36  ;;  %v2154_v18 = vcombine.high %v2128_v63, %v2136_v29  ;;  %v2170_v20 = vcombine.high %v2144_v10, %v2152_v49 }
 0x518   : > { %v2221_v0 = vcombine.low %v2196_v11, %v2204_v13  ;;  %v2237_v28 = vcombine.low %v2212_v2, %v2220_v17  ;;  %v2222_v30 = vcombine.high %v2196_v11, %v2204_v13  ;;  %v2238_v37 = vcombine.high %v2212_v2, %v2220_v17 }
 0x519   : > { %v2186_v5 = vcombine.high %v2161_v24, %v2177_v26  ;;  %v2168_v38 = vrot.slane %v2154_v18, %v7183_v36  ;;  %v2184_v48 = vrot.slane %v2170_v20, %v7183_v36  ;;  %v2185_v59 = vcombine.low %v2161_v24, %v2177_v26 }
 0x51a   : > { %3321 = vadd.xlane.f32.xlu1 %v3320_v62  ;;  %v2229_v52 = vrot.slane %v2221_v0, %v7183_v36  ;;  %v2245_v43 = vrot.slane %v2237_v28, %v7183_v36  ;;  %v2236_v44 = vrot.slane %v2222_v30, %v7183_v36  ;;  %v2252_v58 = vrot.slane %v2238_v37, %v7183_v36 }
 0x51b   : > { %v2187_v42 = vcombine.low %v2168_v38, %v2184_v48  ;;  %v2188_v3 = vcombine.high %v2168_v38, %v2184_v48  ;;  %v2314_v39 = vshrl.u32 %v2186_v5, 16 }
 0x51c   : > { %v2253_v4 = vcombine.low %v2229_v52, %v2245_v43  ;;  %v2254_v60 = vcombine.high %v2229_v52, %v2245_v43  ;;  %v2255_v53 = vcombine.low %v2236_v44, %v2252_v58  ;;  %v2256_v1 = vcombine.high %v2236_v44, %v2252_v58 }
 0x51d   : > { %v2320_v10 = vshrl.u32 %v2187_v42, 16  ;;  %v2326_v26 = vshrl.u32 %v2188_v3, 16 }
 0x51e   : > { %v2307_v40 = vpack.i.b16 %v2253_v4, %v2185_v59  ;;  %v7669_v61 = vpack.i.b16 %v2254_v60, %v2186_v5  ;;  %v2315_v63 = vshrl.u32 %v2254_v60, 16  ;;  %v2319_v29 = vpack.i.b16 %v2255_v53, %v2187_v42 }
 0x51f   : > { %v2321_v49 = vshrl.u32 %v2255_v53, 16  ;;  %v2325_v6 = vpack.i.b16 %v2256_v1, %v2188_v3  ;;  %v2327_v32 = vshrl.u32 %v2256_v1, 16 }
 0x520   : > { %v5537_v57 = vcombine.low %v2307_v40, %v2307_v40  ;;  %v5538_v7 = vcombine.high %v2307_v40, %v2307_v40  ;;  %v5542_v12 = vcombine.high %v7669_v61, %v7669_v61  ;;  %v2316_v62 = vpack.i.b16 %v2315_v63, %v2314_v39 }
 0x521   : > { %v5545_v46 = vcombine.low %v2319_v29, %v2319_v29  ;;  %v2322_v14 = vpack.i.b16 %v2321_v49, %v2320_v10  ;;  %v5549_v28 = vcombine.low %v2325_v6, %v2325_v6  ;;  %v5546_v30 = vcombine.high %v2319_v29, %v2319_v29 }
 0x522   : > { %v3376_v11 = vsel %vm3374_vm4, %v5537_v57, 0  ;;  %v3422_v13 = vsel %vm3374_vm4, %v5538_v7, 0  ;;  %v7676_v2 = vsel %vm3374_vm4, %v5542_v12, 0  ;;  %v5543_v17 = vcombine.low %v2316_v62, %v2316_v62 }
 0x523   : > { %5911 = vmatpush3.bf16.msra.mxu0 %v3376_v11  ;;  %5917 = vmatpush3.bf16.msra.mxu1 %v3422_v13  ;;  %v7679_v24 = vsel %vm3374_vm4, %v5545_v46, 0  ;;  %v5547_v18 = vcombine.low %v2322_v14, %v2322_v14  ;;  %v5544_v20 = vcombine.high %v2316_v62, %v2316_v62  ;;  %v2328_v37 = vpack.i.b16 %v2327_v32, %v2326_v26 }
 0x524   : > { %5922 = vmatprep.subr.bf16.mxu0 %v6727_v41  ;;  %5928 = vmatprep.subr.bf16.mxu1 %v6727_v41  ;;  %v7684_v0 = vsel %vm3374_vm4, %v5543_v17, 0  ;;  %v5548_v48 = vcombine.high %v2322_v14, %v2322_v14  ;;  %v5550_v52 = vcombine.high %v2325_v6, %v2325_v6  ;;  %v7693_v43 = vsel %vm3374_vm4, %v5549_v28, 0 }
 0x525   : > { %v7687_v5 = vsel %vm3374_vm4, %v5547_v18, 0  ;;  %v7690_v38 = vsel %vm3374_vm4, %v5544_v20, 0  ;;  %v7696_v44 = vsel %vm3374_vm4, %v5546_v30, 0  ;;  %v5551_v58 = vcombine.low %v2328_v37, %v2328_v37 }
 0x526   : > { %v5552_v42 = vcombine.high %v2328_v37, %v2328_v37  ;;  %v7699_v3 = vsel %vm3374_vm4, %v5548_v48, 0  ;;  %v7702_v60 = vsel %vm3374_vm4, %v5550_v52, 0  ;;  %v2309_v63 = vshrl.u32 %v2253_v4, 16 }
 0x527   : > { %v7705_v53 = vsel %vm3374_vm4, %v5551_v58, 0  ;;  %v2308_v29 = vshrl.u32 %v2185_v59, 16 }
 0x528   : > { %v7708_v1 = vsel %vm3374_vm4, %v5552_v42, 0 }
 0x529   : > { %v2310_v10 = vpack.i.b16 %v2309_v63, %v2308_v29 }
 0x52b   : > { %v5539_v7 = vcombine.low %v2310_v10, %v2310_v10  ;;  %v5540_v46 = vcombine.high %v2310_v10, %v2310_v10 }
 0x52d   : > { %v3468_v12 = vsel %vm3374_vm4, %v5539_v7, 0  ;;  %v3514_v11 = vsel %vm3374_vm4, %v5540_v46, 0 }
 0x53e   : > { %v3277_v40 = vpop.xlane.xlu1 %3276 }
 0x53f   : > { %6321 = vrcp.f32 %v3277_v40 }
 0x546   : > { %v3280_v39 = vpop.xlane.xlu0 %3279 }
 0x547   : > { %6323 = vrcp.f32 %v3280_v39 }
 0x54c   : > { %v6322_v49 = vpop.eup %6321 }
 0x54d   : > { %v3339_v57 = vmul.f32 %v6322_v49, %v7549_v21 }
 0x54e   : > { %v3283_v6 = vpop.xlane.xlu0 %3282 }
 0x54f   : > { %6325 = vrcp.f32 %v3283_v6  ;;  %v3355_v32 = vpack.c.bf16 %v3339_v57, %v3339_v57 }
 0x551   : > { %5913 = vmatmul.mubr.msk.bf16.vlgmr.msra.gmra.mxu0 %vm3178_vm3, %v3355_v32 }
 0x552   : > { %v3289_v62 = vpop.xlane.xlu0 %3288  ;;  %5923 = vmatpush3.bf16.msra.mxu0 %v3468_v12  ;;  %5924 = vmatprep.mubr.msk.bf16.mxu0 %vm6728_vm1, %v6727_v41 }
 0x553   : > { %6327 = vrcp.f32 %v3289_v62  ;;  %5934 = vmatprep.subr.bf16.mxu0 %v6727_v41 }
 0x554   : > { %v6324_v4 = vpop.eup %6323 }
 0x555   : > { %v3340_v59 = vmul.f32 %v6324_v4, %v7554_v27  ;;  %v5541_v27 = vcombine.low %v7669_v61, %v7669_v61 }
 0x556   : > { %v3286_v21 = vpop.xlane.xlu1 %3285 }
 0x557   : > { %6329 = vrcp.f32 %v3286_v21  ;;  %v3356_v14 = vpack.c.bf16 %v3340_v59, %v3340_v59  ;;  %v3560_v20 = vsel %vm3374_vm4, %v5541_v27, 0 }
 0x559   : > { %5919 = vmatmul.mubr.msk.bf16.vlgmr.msra.gmra.mxu1 %vm3178_vm3, %v3356_v14 }
 0x55a   : > { %5929 = vmatpush3.bf16.msra.mxu1 %v3514_v11  ;;  %5930 = vmatprep.mubr.msk.bf16.mxu1 %vm6728_vm1, %v6727_v41 }
 0x55b   : > { %5940 = vmatprep.subr.bf16.mxu1 %v6727_v41 }
 0x55c   : > { %v6326_v13 = vpop.eup %6325 }
 0x55d   : > { %v3341_v17 = vmul.f32 %v6326_v13, %v7558_v56 }
 0x55f   : > { %v3357_v26 = vpack.c.bf16 %v3341_v17, %v3341_v17 }
 0x560   : > { %v6328_v18 = vpop.eup %6327 }
 0x561   : > { %5925 = vmatmul.mubr.msk.bf16.vlgmr.msra.gmra.mxu0 %vm3178_vm3, %v3357_v26  ;;  %v3343_v28 = vmul.f32 %v6328_v18, %v7562_v31 }
 0x562   : > { %5935 = vmatpush3.bf16.msra.mxu0 %v3560_v20  ;;  %5936 = vmatprep.mubr.msk.bf16.mxu0 %vm6728_vm1, %v6727_v41 }
 0x563   : > { %5946 = vmatprep.subr.bf16.mxu0 %v6727_v41  ;;  %v3359_v48 = vpack.c.bf16 %v3343_v28, %v3343_v28 }
 0x564   : > { %v6330_v30 = vpop.eup %6329 }
 0x565   : > { %v3342_v56 = vmul.f32 %v6330_v30, %v7566_v23 }
 0x567   : > { %v3358_v37 = vpack.c.bf16 %v3342_v56, %v3342_v56 }
 0x569   : > { %5931 = vmatmul.mubr.msk.bf16.vlgmr.msra.gmra.mxu1 %vm3178_vm3, %v3358_v37  ;;  %5937 = vmatmul.mubr.msk.bf16.vlgmr.msra.gmra.mxu0 %vm3178_vm3, %v3359_v48 }
 0x56a   : > { %5941 = vmatpush3.bf16.msra.mxu1 %v7676_v2  ;;  %5947 = vmatpush3.bf16.msra.mxu0 %v7684_v0 }
 0x56b   : > { %5948 = vmatprep.mubr.msk.bf16.mxu0 %vm6728_vm1, %v6727_v41  ;;  %5958 = vmatprep.subr.bf16.mxu0 %v6727_v41 }
 0x56c   : > { %5942 = vmatprep.mubr.msk.bf16.mxu1 %vm6728_vm1, %v6727_v41  ;;  %5952 = vmatprep.subr.bf16.mxu1 %v6727_v41 }
 0x57b   : > { %v3295_v31 = vpop.xlane.xlu0 %3294 }
 0x57c   : > { %6331 = vrcp.f32 %v3295_v31 }
 0x57f   : > { %v3301_v23 = vpop.xlane.xlu0 %3300 }
 0x580   : > { %6333 = vrcp.f32 %v3301_v23 }
 0x583   : > { %v3307_v61 = vpop.xlane.xlu0 %3306 }
 0x584   : > { %6335 = vrcp.f32 %v3307_v61 }
 0x587   : > { %v3313_v40 = vpop.xlane.xlu0 %3312 }
 0x589   : > { %v6332_v52 = vpop.eup %6331 }
 0x58a   : > { %v3345_v2 = vmul.f32 %v6332_v52, %v7578_v34 }
 0x58b   : > { %v3319_v10 = vpop.xlane.xlu0 %3318 }
 0x58c   : > { %v3292_v0 = vpop.xlane.xlu1 %3291  ;;  %v3361_v58 = vpack.c.bf16 %v3345_v2, %v3345_v2 }
 0x58d   : > { %v6334_v42 = vpop.eup %6333  ;;  %6337 = vrcp.f32 %v3292_v0 }
 0x58e   : > { %5949 = vmatmul.mubr.msk.bf16.vlgmr.msra.gmra.mxu0 %vm3178_vm3, %v3361_v58  ;;  %6339 = vrcp.f32 %v3313_v40  ;;  %v3347_v63 = vmul.f32 %v6334_v42, %v7583_v9 }
 0x58f   : > { %5959 = vmatpush3.bf16.msra.mxu0 %v7679_v24  ;;  %5960 = vmatprep.mubr.msk.bf16.mxu0 %vm6728_vm1, %v6727_v41 }
 0x590   : > { %v3298_v39 = vpop.xlane.xlu1 %3297  ;;  %5970 = vmatprep.subr.bf16.mxu0 %v6727_v41  ;;  %v3363_v34 = vpack.c.bf16 %v3347_v63, %v3347_v63 }
 0x591   : > { %6341 = vrcp.f32 %v3298_v39  ;;  %v6336_v29 = vpop.eup %6335 }
 0x592   : > { %6343 = vrcp.f32 %v3319_v10  ;;  %v3349_v24 = vmul.f32 %v6336_v29, %v7588_v16  ;;  %v6241_v29 = vld [vmem:[%s7042_s24 + $0x38] sm:$0xff]   ;;  %v6242_v10 = vld [vmem:[%s7042_s24 + $0x30] sm:$0xff]  }
 0x594   : > { %v3304_v49 = vpop.xlane.xlu1 %3303  ;;  %v3365_v57 = vpack.c.bf16 %v3349_v24, %v3349_v24  ;;  %v6244_v24 = vld [vmem:[%s7042_s24 + $0x20] sm:$0xff]  }
 0x595   : > { %6345 = vrcp.f32 %v3304_v49  ;;  %v6243_v49 = vld [vmem:[%s7042_s24 + $0x28] sm:$0xff]  }
 0x596   : > { %5961 = vmatmul.mubr.msk.bf16.vlgmr.msra.gmra.mxu0 %vm3178_vm3, %v3363_v34 }
 0x597   : > { %5971 = vmatpush3.bf16.msra.mxu0 %v7687_v5  ;;  %5972 = vmatprep.mubr.msk.bf16.mxu0 %vm6728_vm1, %v6727_v41 }
 0x598   : > { %5982 = vmatprep.subr.bf16.mxu0 %v6727_v41  ;;  %v3310_v62 = vpop.xlane.xlu1 %3309 }
 0x599   : > { %6347 = vrcp.f32 %v3310_v62 }
 0x59a   : > { %v6338_v6 = vpop.eup %6337 }
 0x59b   : > { %v3344_v9 = vmul.f32 %v6338_v6, %v7600_v19  ;;  %v6340_v7 = vpop.eup %6339  ;;  %v6245_v6 = vld [vmem:[%s7042_s24 + $0x18] sm:$0xff]  }
 0x59c   : > { %v3351_v16 = vmul.f32 %v6340_v7, %v7593_v25 }
 0x59d   : > { %v3360_v32 = vpack.c.bf16 %v3344_v9, %v3344_v9 }
 0x59e   : > { %v6342_v12 = vpop.eup %6341  ;;  %5973 = vmatmul.mubr.msk.bf16.vlgmr.msra.gmra.mxu0 %vm3178_vm3, %v3365_v57  ;;  %v3367_v5 = vpack.c.bf16 %v3351_v16, %v3351_v16 }
 0x59f   : > { %5943 = vmatmul.mubr.msk.bf16.vlgmr.msra.gmra.mxu1 %vm3178_vm3, %v3360_v32  ;;  %5983 = vmatpush3.bf16.msra.mxu0 %v7693_v43  ;;  %v3346_v19 = vmul.f32 %v6342_v12, %v7611_v45  ;;  %v6344_v4 = vpop.eup %6343 }
 0x5a0   : > { %5953 = vmatpush3.bf16.msra.mxu1 %v7690_v38  ;;  %5954 = vmatprep.mubr.msk.bf16.mxu1 %vm6728_vm1, %v6727_v41  ;;  %v3316_v38 = vpop.xlane.xlu1 %3315  ;;  %v3353_v25 = vmul.f32 %v6344_v4, %v7598_v33 }
 0x5a1   : > { %5964 = vmatprep.subr.bf16.mxu1 %v6727_v41  ;;  %5984 = vmatprep.mubr.msk.bf16.mxu0 %vm6728_vm1, %v6727_v41  ;;  %v3362_v43 = vpack.c.bf16 %v3346_v19, %v3346_v19  ;;  %6349 = vrcp.f32 %v3316_v38 }
 0x5a2   : > { %5994 = vmatprep.subr.bf16.mxu0 %v6727_v41  ;;  %v6346_v59 = vpop.eup %6345  ;;  %v3369_v46 = vpack.c.bf16 %v3353_v25, %v3353_v25 }
 0x5a3   : > { %v3348_v45 = vmul.f32 %v6346_v59, %v7621_v47 }
 0x5a4   : > { %v3322_v14 = vpop.xlane.xlu1 %3321 }
 0x5a5   : > { %v3364_v21 = vpack.c.bf16 %v3348_v45, %v3348_v45  ;;  %6351 = vrcp.f32 %v3322_v14 }
 0x5a6   : > { %5985 = vmatmul.mubr.msk.bf16.vlgmr.msra.gmra.mxu0 %vm3178_vm3, %v3367_v5 }
 0x5a7   : > { %5955 = vmatmul.mubr.msk.bf16.vlgmr.msra.gmra.mxu1 %vm3178_vm3, %v3362_v43  ;;  %5995 = vmatpush3.bf16.msra.mxu0 %v7705_v53  ;;  %v6348_v53 = vpop.eup %6347 }
 0x5a8   : > { %5965 = vmatpush3.bf16.msra.mxu1 %v7696_v44  ;;  %5966 = vmatprep.mubr.msk.bf16.mxu1 %vm6728_vm1, %v6727_v41  ;;  %v3350_v33 = vmul.f32 %v6348_v53, %v7629_v8 }
 0x5a9   : > { %5976 = vmatprep.subr.bf16.mxu1 %v6727_v41  ;;  %5996 = vmatprep.mubr.msk.bf16.mxu0 %vm6728_vm1, %v6727_v41 }
 0x5aa   : > { %6006 = vmatprep.subr.bf16.mxu0 %v6727_v41  ;;  %v3366_v47 = vpack.c.bf16 %v3350_v33, %v3350_v33 }
 0x5ae   : > { %5997 = vmatmul.mubr.msk.bf16.vlgmr.msra.gmra.mxu0 %vm3178_vm3, %v3369_v46  ;;  %v6350_v44 = vpop.eup %6349 }
 0x5af   : > { %5967 = vmatmul.mubr.msk.bf16.vlgmr.msra.gmra.mxu1 %vm3178_vm3, %v3364_v21  ;;  %6022 = vmatprep.mubr.msk.bf16.mxu0 %vm6728_vm1, %v6727_v41 }
 0x5b0   : > { %5977 = vmatpush3.bf16.msra.mxu1 %v7699_v3  ;;  %5978 = vmatprep.mubr.msk.bf16.mxu1 %vm6728_vm1, %v6727_v41  ;;  %v3352_v3 = vmul.f32 %v6350_v44, %v7641_v15 }
 0x5b1   : > { %5988 = vmatprep.subr.bf16.mxu1 %v6727_v41  ;;  %6007 = vmatpush3.bf16.msra.mxu0 %v6241_v29 }
 0x5b2   : > { %v3368_v11 = vpack.c.bf16 %v3352_v3, %v3352_v3  ;;  %v6352_v13 = vpop.eup %6351  ;;  %6008 = vmatprep.subr.bf16.mxu0 %v6727_v41 }
 0x5b3   : > { %v3354_v8 = vmul.f32 %v6352_v13, %v7651_v54 }
 0x5b5   : > { %v3370_v17 = vpack.c.bf16 %v3354_v8, %v3354_v8  ;;  %6009 = vmatpush3.bf16.msra.mxu0 %v6242_v10 }
 0x5b6   : > { %6010 = vmatprep.subr.bf16.mxu0 %v6727_v41 }
 0x5b7   : > { %5979 = vmatmul.mubr.msk.bf16.vlgmr.msra.gmra.mxu1 %vm3178_vm3, %v3366_v47 }
 0x5b8   : > { %5989 = vmatpush3.bf16.msra.mxu1 %v7702_v60  ;;  %5990 = vmatprep.mubr.msk.bf16.mxu1 %vm6728_vm1, %v6727_v41 }
 0x5b9   : > { %6000 = vmatprep.subr.bf16.mxu1 %v6727_v41  ;;  %6011 = vmatpush3.bf16.msra.mxu0 %v6243_v49 }
 0x5ba   : > { %6012 = vmatprep.subr.bf16.mxu0 %v6727_v41 }
 0x5bd   : > { %6013 = vmatpush3.bf16.msra.mxu0 %v6244_v24 }
 0x5be   : > { %6014 = vmatprep.subr.bf16.mxu0 %v6727_v41 }
 0x5bf   : > { %5991 = vmatmul.mubr.msk.bf16.vlgmr.msra.gmra.mxu1 %vm3178_vm3, %v3368_v11 }
 0x5c0   : > { %6001 = vmatpush3.bf16.msra.mxu1 %v7708_v1  ;;  %6002 = vmatprep.mubr.msk.bf16.mxu1 %vm6728_vm1, %v6727_v41 }
 0x5c1   : > { %6015 = vmatpush3.bf16.msra.mxu0 %v6245_v6 }
 0x5c2   : > { %6016 = vmatprep.subr.bf16.mxu0 %v6727_v41 }
 0x5c7   : > { %6003 = vmatmul.mubr.msk.bf16.vlgmr.msra.gmra.mxu1 %vm3178_vm3, %v3370_v17 }
 0x5c8   : > { %4782 = vmatprep.mubr.bf16.mxu1 %v6726_v22 }
 0x611   : > { %v3412_v60 = vpop.f32.mrf.mxu0 }
 0x613   : > { %v5914_v27 = vpop.f32.mrf.mxu0 }
 0x615   : > { %v3415_v26 = vpop.f32.mrf.mxu0 }
 0x617   : > { %v5915_v15 = vpop.f32.mrf.mxu0 }
 0x619   : > { %v3458_v18 = vpop.f32.mrf.mxu1 }
 0x61a   : > { %v4108_v20 = vpack.c.bf16 %v3458_v18, %v3412_v60 }
 0x61b   : > { %v5920_v28 = vpop.f32.mrf.mxu1 }
 0x61c   : > { %v4120_v2 = vshrl.u32 %v4108_v20, 16 }
 0x61d   : > { %v3461_v30 = vpop.f32.mrf.mxu1 }
 0x61f   : > { %v5921_v56 = vpop.f32.mrf.mxu1 }
 0x621   : > { %v3504_v1 = vpop.f32.mrf.mxu0 }
 0x623   : > { %v5926_v37 = vpop.f32.mrf.mxu0 }
 0x625   : > { %v3507_v48 = vpop.f32.mrf.mxu0 }
 0x627   : > { %v5927_v31 = vpop.f32.mrf.mxu0 }
 0x629   : > { %v3550_v54 = vpop.f32.mrf.mxu1  ;;  %v7802_v23 = vpop.f32.mrf.mxu0 }
 0x62a   : > { %v4109_v61 = vpack.c.bf16 %v3550_v54, %v3504_v1 }
 0x62b   : > { %v5932_v22 = vpop.f32.mrf.mxu1  ;;  %v5938_v52 = vpop.f32.mrf.mxu0 }
 0x62c   : > { %v7804_v0 = vpack.i.b16 %v4109_v61, %v4108_v20  ;;  %v4121_v58 = vshrl.u32 %v4109_v61, 16 }
 0x62d   : > { %v3553_v42 = vpop.f32.mrf.mxu1  ;;  %v3599_v40 = vpop.f32.mrf.mxu0 }
 0x62e   : > { %v7806_v39 = vpack.i.b16 %v4121_v58, %v4120_v2 }
 0x62f   : > { %v5933_v63 = vpop.f32.mrf.mxu1  ;;  %v5939_v34 = vpop.f32.mrf.mxu0 }
 0x64e   : > { %v3688_v9 = vpop.f32.mrf.mxu0 }
 0x650   : > { %v5950_v57 = vpop.f32.mrf.mxu0 }
 0x652   : > { %v3691_v7 = vpop.f32.mrf.mxu0 }
 0x654   : > { %v5951_v32 = vpop.f32.mrf.mxu0 }
 0x656   : > { %v3780_v12 = vpop.f32.mrf.mxu0 }
 0x658   : > { %v5962_v62 = vpop.f32.mrf.mxu0 }
 0x65a   : > { %v3783_v16 = vpop.f32.mrf.mxu0 }
 0x65c   : > { %v5963_v19 = vpop.f32.mrf.mxu0 }
 0x65e   : > { %v3872_v5 = vpop.f32.mrf.mxu0 }
 0x65f   : > { %v3642_v4 = vpop.f32.mrf.mxu1 }
 0x660   : > { %v5974_v43 = vpop.f32.mrf.mxu0  ;;  %v4110_v22 = vpack.c.bf16 %v3642_v4, %v7802_v23 }
 0x661   : > { %v5944_v59 = vpop.f32.mrf.mxu1 }
 0x662   : > { %v3875_v38 = vpop.f32.mrf.mxu0  ;;  %v4128_v10 = vshrl.u32 %v4110_v22, 16 }
 0x663   : > { %v3645_v25 = vpop.f32.mrf.mxu1 }
 0x664   : > { %v5975_v45 = vpop.f32.mrf.mxu0 }
 0x665   : > { %v5945_v46 = vpop.f32.mrf.mxu1 }
 0x666   : > { %v3964_v21 = vpop.f32.mrf.mxu0 }
 0x667   : > { %v3734_v53 = vpop.f32.mrf.mxu1 }
 0x668   : > { %v5986_v14 = vpop.f32.mrf.mxu0  ;;  %v4111_v61 = vpack.c.bf16 %v3734_v53, %v3688_v9 }
 0x669   : > { %v5956_v33 = vpop.f32.mrf.mxu1 }
 0x66a   : > { %v3967_v47 = vpop.f32.mrf.mxu0  ;;  %v4129_v34 = vshrl.u32 %v4111_v61, 16  ;;  %v4126_v7 = vpack.i.b16 %v4111_v61, %v4110_v22 }
 0x66b   : > { %v3737_v44 = vpop.f32.mrf.mxu1 }
 0x66c   : > { %v5987_v3 = vpop.f32.mrf.mxu0  ;;  %v4130_v62 = vpack.i.b16 %v4129_v34, %v4128_v10 }
 0x66d   : > { %v5957_v11 = vpop.f32.mrf.mxu1 }
 0x66e   : > { %v4056_v13 = vpop.f32.mrf.mxu0 }
 0x66f   : > { %v3826_v8 = vpop.f32.mrf.mxu1 }
 0x670   : > { %v5998_v17 = vpop.f32.mrf.mxu0  ;;  %v4112_v31 = vpack.c.bf16 %v3826_v8, %v3780_v12 }
 0x671   : > { %v5968_v60 = vpop.f32.mrf.mxu1 }
 0x672   : > { %v4059_v27 = vpop.f32.mrf.mxu0  ;;  %v4136_v40 = vshrl.u32 %v4112_v31, 16 }
 0x673   : > { %v3829_v26 = vpop.f32.mrf.mxu1 }
 0x674   : > { %v5999_v15 = vpop.f32.mrf.mxu0 }
 0x675   : > { %v5969_v18 = vpop.f32.mrf.mxu1 }
 0x677   : > { %v3918_v20 = vpop.f32.mrf.mxu1 }
 0x678   : > { %v4113_v37 = vpack.c.bf16 %v3918_v20, %v3872_v5 }
 0x679   : > { %v5980_v28 = vpop.f32.mrf.mxu1 }
 0x67a   : > { %v4134_v52 = vpack.i.b16 %v4113_v37, %v4112_v31  ;;  %v4137_v2 = vshrl.u32 %v4113_v37, 16 }
 0x67b   : > { %v3921_v30 = vpop.f32.mrf.mxu1 }
 0x67c   : > { %v4138_v49 = vpack.i.b16 %v4137_v2, %v4136_v40  ;;  %v4148_v24 = vcombine.low %v7804_v0, %v4134_v52  ;;  %v4149_v6 = vcombine.high %v7804_v0, %v4134_v52 }
 0x67d   : > { %v5981_v56 = vpop.f32.mrf.mxu1 }
 0x67e   : > { %v4156_v4 = vrot.slane %v4148_v24, %v7180_v35  ;;  %v4163_v43 = vrot.slane %v4149_v6, %v7180_v35  ;;  %v4216_v59 = vcombine.low %v7806_v39, %v4138_v49  ;;  %v4217_v38 = vcombine.high %v7806_v39, %v4138_v49  ;;  %v6246_v49 = vld [vmem:[%s7042_s24 + $0x10] sm:$0xff]  }
 0x67f   : > { %v4010_v1 = vpop.f32.mrf.mxu1  ;;  %6017 = vmatpush3.bf16.msra.mxu0 %v6246_v49  ;;  %v6361_v49 = vld [vmem:[#allocation2] sm:$0xff] }
 0x680   : > { %v4114_v42 = vpack.c.bf16 %v4010_v1, %v3964_v21  ;;  %v4224_v44 = vrot.slane %v4216_v59, %v7180_v35  ;;  %v4231_v3 = vrot.slane %v4217_v38, %v7180_v35  ;;  %6018 = vmatprep.subr.bf16.mxu0 %v6727_v41 }
 0x681   : > { %v5992_v48 = vpop.f32.mrf.mxu1 }
 0x682   : > { %v4144_v32 = vshrl.u32 %v4114_v42, 16 }
 0x683   : > { %v4013_v54 = vpop.f32.mrf.mxu1 }
 0x685   : > { %v5993_v58 = vpop.f32.mrf.mxu1 }
 0x687   : > { %v4102_v63 = vpop.f32.mrf.mxu1 }
 0x688   : > { %v4115_v29 = vpack.c.bf16 %v4102_v63, %v4056_v13 }
 0x689   : > { %v6004_v57 = vpop.f32.mrf.mxu1 }
 0x68a   : > { %v4142_v9 = vpack.i.b16 %v4115_v29, %v4114_v42  ;;  %v4145_v12 = vshrl.u32 %v4115_v29, 16 }
 0x68b   : > { %v4105_v23 = vpop.f32.mrf.mxu1 }
 0x68c   : > { %v4146_v16 = vpack.i.b16 %v4145_v12, %v4144_v32  ;;  %v4164_v19 = vcombine.low %v4126_v7, %v4142_v9  ;;  %v4165_v5 = vcombine.high %v4126_v7, %v4142_v9 }
 0x68d   : > { %v6005_v25 = vpop.f32.mrf.mxu1 }
 0x68e   : > { %v4172_v0 = vrot.slane %v4164_v19, %v7180_v35  ;;  %v4179_v45 = vrot.slane %v4165_v5, %v7180_v35  ;;  %v4232_v46 = vcombine.low %v4130_v62, %v4146_v16  ;;  %v4233_v21 = vcombine.high %v4130_v62, %v4146_v16 }
 0x690   : > { %v4180_v53 = vcombine.low %v4156_v4, %v4172_v0  ;;  %v4181_v14 = vcombine.high %v4156_v4, %v4172_v0  ;;  %v4196_v33 = vcombine.low %v4163_v43, %v4179_v45  ;;  %v4197_v47 = vcombine.high %v4163_v43, %v4179_v45 }
 0x691   : > { %v4240_v11 = vrot.slane %v4232_v46, %v7180_v35  ;;  %v4247_v13 = vrot.slane %v4233_v21, %v7180_v35 }
 0x692   : > { %v4188_v39 = vrot.slane %v4180_v53, %v7183_v36  ;;  %v4195_v8 = vrot.slane %v4181_v14, %v7183_v36  ;;  %v4204_v17 = vrot.slane %v4196_v33, %v7183_v36  ;;  %v4211_v60 = vrot.slane %v4197_v47, %v7183_v36 }
 0x693   : > { %v4248_v27 = vcombine.low %v4224_v44, %v4240_v11  ;;  %v4249_v26 = vcombine.high %v4224_v44, %v4240_v11  ;;  %v4264_v15 = vcombine.low %v4231_v3, %v4247_v13  ;;  %v4265_v18 = vcombine.high %v4231_v3, %v4247_v13  ;;  %v6248_v13 = vld [vmem:[%s7042_s24] sm:$0xff]  }
 0x694   : > { %v4284_v20 = vcombine.low %v4188_v39, %v4195_v8  ;;  %v5585_v28 = vcombine.high %v4188_v39, %v4195_v8  ;;  %v4300_v30 = vcombine.low %v4204_v17, %v4211_v60  ;;  %v5586_v56 = vcombine.high %v4204_v17, %v4211_v60 }
 0x695   : > { %v4256_v1 = vrot.slane %v4248_v27, %v7183_v36  ;;  %v4263_v37 = vrot.slane %v4249_v26, %v7183_v36  ;;  %v4272_v48 = vrot.slane %v4264_v15, %v7183_v36  ;;  %v4279_v31 = vrot.slane %v4265_v18, %v7183_v36 }
 0x696   : > { %v4291_v54 = vrot.slane %v4284_v20, %v7180_v35  ;;  %v4299_v61 = vrot.slane %v5585_v28, %v7180_v35  ;;  %v4307_v22 = vrot.slane %v4300_v30, %v7180_v35  ;;  %v4315_v52 = vrot.slane %v5586_v56, %v7180_v35 }
 0x697   : > { %v4352_v2 = vcombine.low %v4256_v1, %v4263_v37  ;;  %v5587_v58 = vcombine.high %v4256_v1, %v4263_v37  ;;  %v4368_v42 = vcombine.low %v4272_v48, %v4279_v31  ;;  %v5588_v40 = vcombine.high %v4272_v48, %v4279_v31 }
 0x698   : > { %v4316_v63 = vcombine.low %v4291_v54, %v4299_v61  ;;  %v4332_v34 = vcombine.low %v4307_v22, %v4315_v52  ;;  %v4317_v29 = vcombine.high %v4291_v54, %v4299_v61  ;;  %v4333_v10 = vcombine.high %v4307_v22, %v4315_v52 }
 0x699   : > { %v4359_v24 = vrot.slane %v4352_v2, %v7180_v35  ;;  %v4367_v6 = vrot.slane %v5587_v58, %v7180_v35  ;;  %v4375_v57 = vrot.slane %v4368_v42, %v7180_v35  ;;  %v4383_v7 = vrot.slane %v5588_v40, %v7180_v35  ;;  %v6247_v35 = vld [vmem:[%s7042_s24 + $0x8] sm:$0xff]  }
 0x69a   : > { %v4324_v32 = vrot.slane %v4316_v63, %v7183_v36  ;;  %v4340_v9 = vrot.slane %v4332_v34, %v7183_v36  ;;  %v4331_v12 = vrot.slane %v4317_v29, %v7183_v36  ;;  %v4347_v23 = vrot.slane %v4333_v10, %v7183_v36  ;;  %6019 = vmatpush3.bf16.msra.mxu0 %v6247_v35  ;;  %v5589_v63 = vld [vmem:[%s8072_s27] ss:$0 sm:$0xff] }
 0x69b   : > { %v4384_v62 = vcombine.low %v4359_v24, %v4367_v6  ;;  %v4400_v16 = vcombine.low %v4375_v57, %v4383_v7  ;;  %v4385_v19 = vcombine.high %v4359_v24, %v4367_v6  ;;  %v4401_v5 = vcombine.high %v4375_v57, %v4383_v7  ;;  %6020 = vmatprep.subr.bf16.mxu0 %v6727_v41  ;;  %v6263_v35 = vld [vmem:[%s7044_s2 + $0x34] ss:$8 sps:$4 sm:$0xff]  }
 0x69c   : > { %v4349_v4 = vcombine.high %v4324_v32, %v4340_v9  ;;  %v4348_v43 = vcombine.low %v4324_v32, %v4340_v9  ;;  %v4350_v59 = vcombine.low %v4331_v12, %v4347_v23  ;;  %v4351_v38 = vcombine.high %v4331_v12, %v4347_v23  ;;  %v6362_v32 = vld [vmem:[#allocation2 + $0x8] sm:$0xff] }
 0x69d   : > { %v4392_v25 = vrot.slane %v4384_v62, %v7183_v36  ;;  %v4408_v0 = vrot.slane %v4400_v16, %v7183_v36  ;;  %v4399_v45 = vrot.slane %v4385_v19, %v7183_v36  ;;  %v4415_v46 = vrot.slane %v4401_v5, %v7183_v36  ;;  %v6249_v62 = vld [vmem:[%s7044_s2 + $0x70] ss:$8 sps:$4 sm:$0xff]   ;;  %v6251_v16 = vld [vmem:[%s7044_s2 + $0x74] ss:$8 sps:$4 sm:$0xff]   ;;  %v6252_v19 = vld [vmem:[%s7044_s2 + $0x60] ss:$8 sps:$4 sm:$0xff]  }
 0x69e   : > { %v4423_v47 = vshrl.u32 %v4348_v43, 16  ;;  %v4429_v44 = vshrl.u32 %v4349_v4, 16  ;;  %v4435_v3 = vshrl.u32 %v4350_v59, 16  ;;  %v4441_v11 = vshrl.u32 %v4351_v38, 16  ;;  %6021 = vmatpush3.bf16.msra.mxu0 %v6248_v13  ;;  %4750 = vmatprep.subr.bf16.mxu1 %v6251_v16  ;;  %v6254_v5 = vld [vmem:[%s7044_s2 + $0x64] ss:$8 sps:$4 sm:$0xff]  }
 0x69f   : > { %v4417_v21 = vcombine.high %v4392_v25, %v4408_v0  ;;  %v4416_v53 = vcombine.low %v4392_v25, %v4408_v0  ;;  %v4418_v14 = vcombine.low %v4399_v45, %v4415_v46  ;;  %v4419_v33 = vcombine.high %v4399_v45, %v4415_v46  ;;  %4751 = vmatpush1.bf16.msra.mxu1 %v6249_v62  ;;  %v6261_v25 = vld [vmem:[%s7044_s2 + $0x30] ss:$8 sps:$4 sm:$0xff]   ;;  %v6266_v0 = vld [vmem:[%s7044_s2 + $0x24] ss:$8 sps:$4 sm:$0xff]   ;;  %v6264_v45 = vld [vmem:[%s7044_s2 + $0x20] ss:$8 sps:$4 sm:$0xff]  }
 0x6a0   : > { %4752 = vmatprep.subr.bf16.mxu1 %v6254_v5  ;;  %v6269_v46 = vld [vmem:[%s7044_s2 + $0x14] ss:$8 sps:$4 sm:$0xff]   ;;  %v6278_v13 = vld [vmem:[%s7046_s26 + $0x28] sm:$0xff]  }
 0x6a1   : > { %v4428_v39 = vpack.i.b16 %v4417_v21, %v4349_v4  ;;  %v4424_v8 = vshrl.u32 %v4416_v53, 16  ;;  %v4430_v17 = vshrl.u32 %v4417_v21, 16  ;;  %v4434_v60 = vpack.i.b16 %v4418_v14, %v4350_v59  ;;  %v6257_v4 = vld [vmem:[%s7044_s2 + $0x54] ss:$8 sps:$4 sm:$0xff]   ;;  %v6260_v59 = vld [vmem:[%s7044_s2 + $0x44] ss:$8 sps:$4 sm:$0xff]  }
 0x6a2   : > { %v4436_v27 = vshrl.u32 %v4418_v14, 16  ;;  %v4440_v26 = vpack.i.b16 %v4419_v33, %v4351_v38  ;;  %v4442_v15 = vshrl.u32 %v4419_v33, 16  ;;  %v4422_v36 = vpack.i.b16 %v4416_v53, %v4348_v43  ;;  %v6255_v43 = vld [vmem:[%s7044_s2 + $0x50] ss:$8 sps:$4 sm:$0xff]   ;;  %v6258_v38 = vld [vmem:[%s7044_s2 + $0x40] ss:$8 sps:$4 sm:$0xff]  }
 0x6a3   : > { %4446 = vrot.lane.b32.xlu1 %v4428_v39, %s6735_s23  ;;  %v4425_v18 = vpack.i.b16 %v4424_v8, %v4423_v47  ;;  %v4431_v20 = vpack.i.b16 %v4430_v17, %v4429_v44  ;;  %4753 = vmatpush1.bf16.msra.mxu1 %v6252_v19  ;;  %v6267_v21 = vld [vmem:[%s7044_s2 + $0x10] ss:$8 sps:$4 sm:$0xff]   ;;  %v6272_v53 = vld [vmem:[%s7044_s2 + $0x4] ss:$8 sps:$4 sm:$0xff]   ;;  %v6270_v44 = vld [vmem:[%s7044_s2] ss:$8 sps:$4 sm:$0xff]  }
 0x6a4   : > { %v4437_v28 = vpack.i.b16 %v4436_v27, %v4435_v3  ;;  %v4443_v41 = vpack.i.b16 %v4442_v15, %v4441_v11  ;;  %4754 = vmatprep.subr.bf16.mxu1 %v6257_v4  ;;  %v6273_v14 = vld [vmem:[%s7046_s26 + $0x78] sm:$0xff]   ;;  %v6275_v47 = vld [vmem:[%s7046_s26 + $0x70] sm:$0xff]   ;;  %v6277_v11 = vld [vmem:[%s7046_s26 + $0x68] sm:$0xff]  }
 0x6a5   : > { %4444 = vrot.lane.b32.xlu0 %v4425_v18, %s6734_s13  ;;  %v6274_v33 = vld [vmem:[%s7046_s26 + $0x38] sm:$0xff]   ;;  %5743 = vmatprep.subr.bf16.mxu0 %v6273_v14  ;;  %v6276_v3 = vld [vmem:[%s7046_s26 + $0x30] sm:$0xff]   ;;  %v6279_v39 = vld [vmem:[%s7046_s26 + $0x60] sm:$0xff]  }
 0x6a6   : > { %v6280_v8 = vld [vmem:[%s7046_s26 + $0x20] sm:$0xff]   ;;  %v6281_v17 = vld [vmem:[%s7046_s26 + $0x58] sm:$0xff]  }
 0x6a7   : > { %4448 = vrot.lane.b32.xlu1 %v4431_v20, %s6732_s4  ;;  %4755 = vmatpush1.bf16.msra.mxu1 %v6255_v43  ;;  %v4658_v62 = vld [vmem:[%s7078_s16] sm:$0x3] }
 0x6a8   : > { %4756 = vmatprep.subr.bf16.mxu1 %v6260_v59  ;;  %v4667_v19 = vrot.slane %v4658_v62, %v1076_v55  ;;  %v4663_v5 = vrot.slane %v4658_v62, %v1072_v51 }
 0x6a9   : > { %4450 = vrot.lane.b32.xlu0 %v4434_v60, %s6733_s20  ;;  %v6282_v60 = vld [vmem:[%s7046_s26 + $0x18] sm:$0xff]  }
 0x6ab   : > { %4452 = vrot.lane.b32.xlu1 %v4437_v28, %s6731_s12  ;;  %4757 = vmatpush1.bf16.msra.mxu1 %v6258_v38 }
 0x6ac   : > { %4758 = vmatprep.subr.bf16.mxu1 %v6263_v35 }
 0x6ad   : > { %4454 = vrot.lane.b32.xlu0 %v4440_v26, %s6729_s3 }
 0x6af   : > { %4456 = vrot.lane.b32.xlu1 %v4443_v41, %s6730_s10  ;;  %4759 = vmatpush1.bf16.msra.mxu1 %v6261_v25 }
 0x6b0   : > { %4760 = vmatprep.subr.bf16.mxu1 %v6266_v0 }
 0x6b3   : > { %4761 = vmatpush1.bf16.msra.mxu1 %v6264_v45 }
 0x6b4   : > { %4762 = vmatprep.subr.bf16.mxu1 %v6269_v46 }
 0x6b7   : > { %4763 = vmatpush1.bf16.msra.mxu1 %v6267_v21 }
 0x6b8   : > { %4764 = vmatprep.subr.bf16.mxu1 %v6272_v53 }
 0x6bb   : > { %4765 = vmatpush1.bf16.msra.mxu1 %v6270_v44 }
 0x715   : > { %v4447_v30 = vpop.permute.xlu1 %4446 }
 0x717   : > { %v4445_v56 = vpop.permute.xlu0 %4444 }
 0x718   : > { %v4460_v1 = vsel %vm2425_vm2, %v4422_v36, %v4445_v56 }
 0x719   : > { %v4449_v37 = vpop.permute.xlu1 %4448  ;;  %v4463_v48 = vsel %vm4461_vm5, %v4460_v1, %v4447_v30 }
 0x71a   : > { %v4466_v31 = vsel %vm4464_vm6, %v4463_v48, %v4449_v37 }
 0x71b   : > { %v4451_v54 = vpop.permute.xlu0 %4450 }
 0x71c   : > { %v4469_v61 = vsel %vm4467_vm7, %v4466_v31, %v4451_v54 }
 0x71d   : > { %v4453_v22 = vpop.permute.xlu1 %4452 }
 0x71e   : > { %v4472_v52 = vsel %vm4470_vm8, %v4469_v61, %v4453_v22 }
 0x71f   : > { %v4455_v2 = vpop.permute.xlu0 %4454 }
 0x720   : > { %v4475_v58 = vsel %vm4473_vm9, %v4472_v52, %v4455_v2 }
 0x721   : > { %v4457_v42 = vpop.permute.xlu1 %4456 }
 0x722   : > { %v4478_v40 = vsel %vm4476_vm10, %v4475_v58, %v4457_v42  ;;  %v5598_v58 = vld [vmem:[%s8074_s17] ss:$0 sm:$0xff] }
 0x723   : > { %6023 = vmatmul.mubr.bf16.vlgmr.msra.gmra.mxu0 %v4478_v40 }
 0x724   : > { %5744 = vmatpush3.bf16.msra.mxu0 %v6274_v33 }
 0x725   : > { %5745 = vmatprep.subr.bf16.mxu0 %v6275_v47 }
 0x728   : > { %5746 = vmatpush3.bf16.msra.mxu0 %v6276_v3 }
 0x729   : > { %5747 = vmatprep.subr.bf16.mxu0 %v6277_v11 }
 0x72c   : > { %5748 = vmatpush3.bf16.msra.mxu0 %v6278_v13 }
 0x72d   : > { %5749 = vmatprep.subr.bf16.mxu0 %v6279_v39 }
 0x730   : > { %5750 = vmatpush3.bf16.msra.mxu0 %v6280_v8 }
 0x731   : > { %5751 = vmatprep.subr.bf16.mxu0 %v6281_v17 }
 0x734   : > { %5752 = vmatpush3.bf16.msra.mxu0 %v6282_v60 }
 0x7e3   : > { %v4585_v34 = vpop.f32.mrf.mxu0 }
 0x7e4   : > { %v4586_v29 = vadd.f32 %v5589_v63, %v4585_v34 }
 0x7e5   : > { %v6024_v10 = vpop.f32.mrf.mxu0 }
 0x7e6   : > { %v7873_v24 = vadd.f32 %v6361_v49, %v4586_v29  ;;  %v5599_v29 = vld [vmem:[%s8076_s29] ss:$0 sm:$0xff] }
 0x7e7   : > { %v4588_v6 = vpop.f32.mrf.mxu0 }
 0x7e8   : > { %v4589_v57 = vadd.f32 %v5589_v63, %v4588_v6  ;;  %4596 = vadd.xlane.f32.xlu0 %v7873_v24  ;;  %v4603_v12 = vmul.f32 %v7873_v24, %v7873_v24 }
 0x7e9   : > { %v6025_v7 = vpop.f32.mrf.mxu0 }
 0x7ea   : > { %v7876_v9 = vadd.f32 %v6362_v32, %v4589_v57  ;;  %v6283_v57 = vld [vmem:[%s7046_s26 + $0x50] sm:$0xff]   ;;  %v6285_v32 = vld [vmem:[%s7046_s26 + $0x48] sm:$0xff]  }
 0x7eb   : > { %v6284_v7 = vld [vmem:[%s7046_s26 + $0x10] sm:$0xff]   ;;  %5753 = vmatprep.subr.bf16.mxu0 %v6283_v57 }
 0x7ec   : > { %4605 = vadd.xlane.f32.xlu0 %v4603_v12  ;;  %4598 = vadd.xlane.f32.xlu1 %v7876_v9  ;;  %v4604_v23 = vmul.f32 %v7876_v9, %v7876_v9  ;;  %v6287_v12 = vld [vmem:[%s7046_s26 + $0x40] sm:$0xff]  }
 0x7ed   : > { %5754 = vmatpush3.bf16.msra.mxu0 %v6284_v7 }
 0x7ee   : > { %5755 = vmatprep.subr.bf16.mxu0 %v6285_v32 }
 0x7f0   : > { %4607 = vadd.xlane.f32.xlu0 %v4604_v23  ;;  %v6288_v23 = vld [vmem:[%s7046_s26] sm:$0xff]  }
 0x871   : > { %v4597_v27 = vpop.xlane.xlu0 %4596 }
 0x872   : > { %v4601_v26 = vmul.f32 0.0078125, %v4597_v27 }
 0x874   : > { %v4611_v18 = vmul.f32 %v4601_v26, %v4601_v26  ;;  %v4617_v22 = vsub.f32 %v7873_v24, %v4601_v26 }
 0x875   : > { %v4606_v15 = vpop.xlane.xlu0 %4605  ;;  %v4599_v36 = vpop.xlane.xlu1 %4598 }
 0x876   : > { %v4609_v20 = vmul.f32 0.0078125, %v4606_v15  ;;  %v4602_v28 = vmul.f32 0.0078125, %v4599_v36 }
 0x878   : > { %v4613_v41 = vsub.f32 %v4609_v20, %v4611_v18  ;;  %v4612_v1 = vmul.f32 %v4602_v28, %v4602_v28  ;;  %v4618_v42 = vsub.f32 %v7876_v9, %v4602_v28  ;;  %v6286_v9 = vld [vmem:[%s7046_s26 + $0x8] sm:$0xff]  }
 0x879   : > { %v4608_v30 = vpop.xlane.xlu0 %4607  ;;  %5756 = vmatpush3.bf16.msra.mxu0 %v6286_v9 }
 0x87a   : > { %v4615_v56 = vmax.f32 %v4613_v41, 0.0  ;;  %v4610_v37 = vmul.f32 0.0078125, %v4608_v30  ;;  %5757 = vmatprep.subr.bf16.mxu0 %v6287_v12 }
 0x87c   : > { %v4619_v48 = vadd.f32 1e-05, %v4615_v56  ;;  %v4614_v31 = vsub.f32 %v4610_v37, %v4612_v1 }
 0x87d   : > { %5758 = vmatpush3.bf16.msra.mxu0 %v6288_v23 }
 0x87e   : > { %6353 = vrsqrt.f32 %v4619_v48  ;;  %v4616_v54 = vmax.f32 %v4614_v31, 0.0 }
 0x880   : > { %v4620_v61 = vadd.f32 1e-05, %v4616_v54 }
 0x882   : > { %6355 = vrsqrt.f32 %v4620_v61 }
 0x88b   : > { %v6354_v52 = vpop.eup %6353 }
 0x88c   : > { %v4623_v2 = vmul.f32 %v6354_v52, %v4617_v22 }
 0x88e   : > { %v4631_v34 = vmul.f32 %v5598_v58, %v4623_v2 }
 0x88f   : > { %v6356_v40 = vpop.eup %6355 }
 0x890   : > { %v4624_v63 = vmul.f32 %v6356_v40, %v4618_v42  ;;  %v4639_v49 = vadd.f32 %v5599_v29, %v4631_v34  ;;  %v5634_v40 = vld [vmem:[%s902_s21] ss:$0 sm:$0xff] }
 0x892   : > { %v4632_v10 = vmul.f32 %v5598_v58, %v4624_v63  ;;  %v5633_v58 = vld [vmem:[%s899_s6] ss:$0 sm:$0xff]  ;;  %s8080_s6 = sld [smem:[#allocation43_spill]] (!%p5635_p12) }
 0x894   : > { %v4640_v24 = vadd.f32 %v5599_v29, %v4632_v10 }
 0x896   : > { %v4641_v6 = vpack.c.bf16 %v4640_v24, %v4639_v49 }
 0x898   : > { %4783 = vmatmul.mubr.bf16.vlgmr.msra.gmra.mxu1 %v4641_v6 }
 0x958   : > { %v4784_v16 = vpop.f32.mrf.mxu1 }
 0x959   : > { %v4785_v35 = vadd.f32 %v4784_v16, %v4663_v5 }
 0x95a   : > { %v4786_v4 = vpop.f32.mrf.mxu1 }
 0x95b   : > { %v4787_v59 = vadd.f32 %v4786_v4, %v4667_v19  ;;  %v4793_v53 = vmax.f32 %v4785_v35, 0.0 }
 0x95c   : > { %v4788_v43 = vpop.f32.mrf.mxu1 }
 0x95d   : > { %v4789_v38 = vadd.f32 %v4788_v43, %v4663_v5  ;;  %v4794_v46 = vmax.f32 %v4787_v59, 0.0 }
 0x95e   : > { %v4790_v25 = vpop.f32.mrf.mxu1 }
 0x95f   : > { %v4791_v0 = vadd.f32 %v4790_v25, %v4667_v19  ;;  %v4795_v45 = vmax.f32 %v4789_v38, 0.0 }
 0x961   : > { %v4796_v21 = vmax.f32 %v4791_v0, 0.0  ;;  %v4797_v33 = vpack.c.bf16 %v4795_v45, %v4793_v53 }
 0x963   : > { %v4798_v14 = vpack.c.bf16 %v4796_v21, %v4794_v46 }
 0x965   : > { %4966 = vmatprep.mubr.bf16.mxu0 %v4798_v14 }
 0x966   : > { %4967 = vmatmul.mubr.bf16.vlgmr.msra.gmra.mxu0 %v4797_v33 }
 0xa26   : > { %v5759_v55 = vpop.f32.mrf.mxu0 }
 0xa28   : > { %v5760_v51 = vpop.f32.mrf.mxu0 }
 0xa29   : > { %v5761_v47 = vadd.f32 %v5760_v51, %v5759_v55 }
 0xa2a   : > { %v5762_v44 = vpop.f32.mrf.mxu0 }
 0xa2b   : > { %v4969_v3 = vadd.f32 %v5761_v47, %v5616_v50 }
 0xa2c   : > { %v5763_v11 = vpop.f32.mrf.mxu0 }
 0xa2d   : > { %v5764_v13 = vadd.f32 %v5763_v11, %v5762_v44  ;;  %v4975_v39 = vadd.f32 %v4969_v3, %v4639_v49 }
 0xa2f   : > { %v4972_v8 = vadd.f32 %v5764_v13, %v5616_v50  ;;  %4979 = vadd.xlane.f32.xlu1 %v4975_v39  ;;  %v4985_v60 = vmul.f32 %v4975_v39, %v4975_v39 }
 0xa31   : > { %v4976_v17 = vadd.f32 %v4972_v8, %v4640_v24 }
 0xa33   : > { %4981 = vadd.xlane.f32.xlu0 %v4976_v17  ;;  %4987 = vadd.xlane.f32.xlu1 %v4985_v60  ;;  %v4986_v27 = vmul.f32 %v4976_v17, %v4976_v17 }
 0xa37   : > { %4989 = vadd.xlane.f32.xlu0 %v4986_v27 }
 0xab8   : > { %v4980_v26 = vpop.xlane.xlu1 %4979 }
 0xab9   : > { %v4983_v15 = vmul.f32 0.0078125, %v4980_v26 }
 0xabb   : > { %v4993_v20 = vmul.f32 %v4983_v15, %v4983_v15  ;;  %v4999_v52 = vsub.f32 %v4975_v39, %v4983_v15 }
 0xabc   : > { %v4982_v36 = vpop.xlane.xlu0 %4981  ;;  %v4988_v18 = vpop.xlane.xlu1 %4987 }
 0xabd   : > { %v4984_v28 = vmul.f32 0.0078125, %v4982_v36  ;;  %v4991_v41 = vmul.f32 0.0078125, %v4988_v18 }
 0xabf   : > { %v4995_v30 = vsub.f32 %v4991_v41, %v4993_v20  ;;  %v4994_v1 = vmul.f32 %v4984_v28, %v4984_v28  ;;  %v5000_v63 = vsub.f32 %v4976_v17, %v4984_v28 }
 0xac0   : > { %v4990_v56 = vpop.xlane.xlu0 %4989 }
 0xac1   : > { %v4997_v37 = vmax.f32 %v4995_v30, 0.0  ;;  %v4992_v48 = vmul.f32 0.0078125, %v4990_v56 }
 0xac3   : > { %v5001_v31 = vadd.f32 1e-05, %v4997_v37  ;;  %v4996_v54 = vsub.f32 %v4992_v48, %v4994_v1 }
 0xac5   : > { %6357 = vrsqrt.f32 %v5001_v31  ;;  %v4998_v61 = vmax.f32 %v4996_v54, 0.0 }
 0xac7   : > { %v5002_v22 = vadd.f32 1e-05, %v4998_v61 }
 0xac9   : > { %6359 = vrsqrt.f32 %v5002_v22 }
 0xad2   : > { %v6358_v2 = vpop.eup %6357 }
 0xad3   : > { %v5005_v42 = vmul.f32 %v6358_v2, %v4999_v52 }
 0xad5   : > { %v5013_v34 = vmul.f32 %v5633_v58, %v5005_v42 }
 0xad6   : > { %v6360_v29 = vpop.eup %6359 }
 0xad7   : > { %v5021_v10 = vadd.f32 %v5634_v40, %v5013_v34  ;;  %v5006_v49 = vmul.f32 %v6360_v29, %v5000_v63 }
 0xad9   : > { %5023 = vst [vmem:[#allocation2] sm:$0xff] %v5021_v10  ;;  %v5014_v24 = vmul.f32 %v5633_v58, %v5006_v49  ;;  %5028 = sbr.rel (%p5635_p12) target bundleno = 3014 (0xbc6), region = 136 }
 0xadb   : > { %v5022_v6 = vadd.f32 %v5634_v40, %v5014_v24 }
 0xadd   : > { %5024 = vst [vmem:[#allocation2 + $0x8] sm:$0xff] %v5022_v6 }
 0xade   : > { %v6363_v57 = vld [vmem:[#allocation15 + $0x38] sm:$0xff]   ;;  %v6738_v7 = vmov 0.0   ;;  %v6364_v32 = vld [vmem:[#allocation15 + $0x30] sm:$0xff]   ;;  %vm6739_vm11 = vmmov 0   ;;  %v5029_v9 = vrot.slane %v5021_v10, 4  ;;  %v5035_v12 = vrot.slane %v5022_v6, 4 }
 0xadf   : > { %6026 = vmatprep.subr.bf16.mxu0 %v6738_v7  ;;  %6042 = vmatprep.mubr.msk.bf16.mxu0 %vm6739_vm11, %v6738_v7  ;;  %v6365_v16 = vld [vmem:[#allocation15 + $0x28] sm:$0xff]   ;;  %v6366_v59 = vld [vmem:[#allocation15 + $0x20] sm:$0xff]   ;;  %v6367_v45 = vld [vmem:[#allocation15 + $0x18] sm:$0xff]   ;;  %vm5072_vm12 = vcmask 1041409  }
 0xae0   : > { %6027 = vmatpush3.bf16.msra.mxu0 %v6363_v57  ;;  %v5030_v23 = vadd.f32 %v5029_v9, %v5021_v10  ;;  %v5036_v62 = vadd.f32 %v5035_v12, %v5022_v6  ;;  %v6368_v53 = vld [vmem:[#allocation15 + $0x10] sm:$0xff]   ;;  %v6369_v55 = vld [vmem:[#allocation15 + $0x8] sm:$0xff]   ;;  %v6370_v47 = vld [vmem:[#allocation15] sm:$0xff]  }
 0xae1   : > { %6028 = vmatprep.subr.bf16.mxu0 %v6738_v7  ;;  %v5636_v11 = vld [vmem:[%s8080_s6] ss:$0 sm:$0xff] }
 0xae2   : > { %v5031_v19 = vrot.slane %v5030_v23, 2  ;;  %v5037_v5 = vrot.slane %v5036_v62, 2 }
 0xae4   : > { %6029 = vmatpush3.bf16.msra.mxu0 %v6364_v32  ;;  %v5032_v4 = vadd.f32 %v5031_v19, %v5030_v23  ;;  %v5038_v43 = vadd.f32 %v5037_v5, %v5036_v62 }
 0xae5   : > { %6030 = vmatprep.subr.bf16.mxu0 %v6738_v7 }
 0xae6   : > { %v5033_v38 = vrot.slane %v5032_v4, 1  ;;  %v5039_v35 = vrot.slane %v5038_v43, 1 }
 0xae8   : > { %6031 = vmatpush3.bf16.msra.mxu0 %v6365_v16  ;;  %v5034_v25 = vadd.f32 %v5033_v38, %v5032_v4  ;;  %v5040_v0 = vadd.f32 %v5039_v35, %v5038_v43 }
 0xae9   : > { %6032 = vmatprep.subr.bf16.mxu0 %v6738_v7 }
 0xaea   : > { %v5041_v46 = vmul.f32 0.125, %v5034_v25  ;;  %v5042_v21 = vmul.f32 0.125, %v5040_v0 }
 0xaec   : > { %6033 = vmatpush3.bf16.msra.mxu0 %v6366_v59  ;;  %v5043_v14 = vpack.c.bf16 %v5041_v46, %v5041_v46  ;;  %v5044_v33 = vpack.c.bf16 %v5042_v21, %v5042_v21 }
 0xaed   : > { %6034 = vmatprep.subr.bf16.mxu0 %v6738_v7 }
 0xaee   : > { %v5070_v50 = vunpack.c.l.b16 %v5043_v14  ;;  %v5071_v51 = vunpack.c.l.b16 %v5044_v33 }
 0xaf0   : > { %6035 = vmatpush3.bf16.msra.mxu0 %v6367_v45  ;;  %v5073_v44 = vsel %vm5072_vm12, %v5071_v51, %v5070_v50 }
 0xaf1   : > { %6036 = vmatprep.subr.bf16.mxu0 %v6738_v7  ;;  %v5074_v3 = vpack.c.b16 %v5073_v44, %v5073_v44 }
 0xaf4   : > { %6037 = vmatpush3.bf16.msra.mxu0 %v6368_v53 }
 0xaf5   : > { %6038 = vmatprep.subr.bf16.mxu0 %v6738_v7 }
 0xaf8   : > { %6039 = vmatpush3.bf16.msra.mxu0 %v6369_v55 }
 0xaf9   : > { %6040 = vmatprep.subr.bf16.mxu0 %v6738_v7 }
 0xafc   : > { %6041 = vmatpush3.bf16.msra.mxu0 %v6370_v47 }
 0xaff   : > { %6043 = vmatmul.mubr.bf16.vlgmr.msra.gmra.mxu0 %v5074_v3 }
 0xbbf   : > { %v5158_v13 = vpop.f32.mrf.mxu0 }
 0xbc0   : > { %v5159_v39 = vadd.f32 %v5636_v11, %v5158_v13 }
 0xbc1   : > { %v6044_v8 = vpop.f32.mrf.mxu0 }
 0xbc2   : > { %5164 = vst [vmem:[#allocation16] sm:$0x3] %v5159_v39 }
 0xbc3   : > { %v5161_v17 = vpop.f32.mrf.mxu0 }
 0xbc5   : > { %v6045_v60 = vpop.f32.mrf.mxu0 }
 0xbc6 PF: > { %p6122_p1 = scmp.eq.s32.totalorder %s6865_s1, 1  ;;  %s6740_s21 = smov [#allocation16]  }
 0xbc7   : > { %s5174_s20 = sshll.u32 %s6740_s21, 4  ;;  %s5175_s20 = int_to_ptr.vmem [resolvable:$true] %s5174_s20 }
 0xbc8   : > { %s6613_s13 = scalar_lea.vmem %s5175_s20, 32  ;;  %p6620_p6 = scmp.lt.s32.totalorder %s5175_s20, %s5175_s20 }
 0xbc9   : > { %p6614_p2 = scmp.ne.s32.totalorder %s5175_s20, %s6613_s13  ;;  %p6621_p10 = scmp.lt.s32.totalorder %s6613_s13, %s6613_s13 }
 0xbcb   : > { %p6615_p3 = pnand %p6614_p2, %p6122_p1  ;;  %p6622_p4 = por %p6621_p10, %p6620_p6 }
 0xbcd   : > { %p6616_p9 = pneg %p6615_p3 }
 0xbcf   : > { %p6623_p5 = pnand %p6622_p4, %p6616_p9 }
 0xbd1   : > { %6626 = shalt.err (!%p6623_p5)
}
 0xbd2   : > { %s8081_s11 = sld [smem:[#allocation44_spill]] }
 0xbd8   : > { %6079 = dma.vmem_to_hbm [thread:$0]  (%p6122_p1), %s5175_s20, 32, %s8081_s11, [#allocation5]  }
 0xbd9   : > { %6682 = dma.done.wait (%p6122_p1), [#allocation5], 32  }
 0xbda   : > { %6684 = vsyncadd (%p6122_p1), [#allocation5], 4294967264 }
 0xbdb PF: > { %s8082_s27 = sld [smem:[#allocation24_spill]]  ;;  %s8088_s30 = smov %s6703_s0 }
 0xbdc   : > { %s8083_s2 = sld [smem:[#allocation23_spill]] }
 0xbdd   : > { %s8084_s29 = sld [smem:[#allocation26_spill]] }
 0xbde   : > { %s8085_s14 = sld [smem:[#allocation25_spill]] }
 0xbe1   : > { %s32_s19 = sadd.s32 1, %s8082_s27   ;;  %s8086_s27 = smov %s6691_s28 }
 0xbe2   : > { %p29_p8 = scmp.ge.s32.totalorder %s32_s19, 4   ;;  %s8087_s28 = smov %s8083_s2 }
 0xbe4   : > { %s8089_s0 = smov %s8085_s14  ;;  %31 = sbr.rel (!%p29_p8) target bundleno = 25 (0x19), region = 215 }
 0xbe9   :  { %5187 = vsyncpa [#allocation4], 1 }
 0xbea   :  { %5189 = vsyncpa [#allocation4 + $0x1], 1 }
 0xbeb   :  { %5190 = vsyncpa [#allocation7], 1 }
 0xbec   :  { %5191 = vsyncpa [#allocation10], 1 }
 0xbed   :  { %5192 = vsyncpa [#allocation5], 1 }
 0xbee   :  { %5194 = vsyncpa [#allocation5 + $0x1], 1 }

</bundles_post_ra>
